<compile_context>
chip_gen: v7x
topology: tpu7x:2x2x1
jax: 0.10.0
libtpu: 0.0.40
codegen_flags: <defaults>
</compile_context>

<pallas_src>
import functools

import jax
import jax.numpy as jnp
from jax.experimental import pallas as pl
from jax.experimental.pallas import tpu as pltpu


_SQRT_HALF = 0.7071067811865476


def _token_learner_kernel(x_ref, w1_ref, b1_ref, w2_ref, b2_ref, o_ref,
                          attn_acc, *, approx_gelu):
    BB, HW, C = x_ref.shape
    G = b2_ref.shape[-1]
    TCOL = w1_ref.shape[-1]
    Tf = TCOL // G                       # per-group hidden slab in this tile
    j = pl.program_id(1)                 # column (hidden) tile index

    @pl.when(j == 0)
    def _():
        attn_acc[...] = jnp.zeros_like(attn_acc)

    x = x_ref[...]                                   # (BB, HW, C), native dtype
    x2d = x.reshape(BB * HW, C)

    # First grouped 1x1 conv, this column tile: one dense MXU matmul (every
    # group sees the same input, so the grouped conv is a plain contraction).
    xm = x2d if x2d.dtype == w1_ref.dtype else x2d.astype(w1_ref.dtype)
    h = jnp.dot(xm, w1_ref[...], preferred_element_type=jnp.float32) + b1_ref[...]

    if approx_gelu:
        # tanh form goes to the EUP slot (nearly free); use only when the
        # exact-erf tolerance can be relaxed.
        h = jax.nn.gelu(h, approximate=True)
    else:
        # exact erf-GELU (matches torch.nn.GELU() default at 1e-5)
        h = 0.5 * h * (1.0 + jax.lax.erf(h * jnp.float32(_SQRT_HALF)))

    # Second grouped 1x1 conv as VPU multiply + per-group lane-slab reduction.
    # Columns inside this tile are group-major (col = g*Tf + f_local), so each
    # group's hidden slab is a contiguous lane range -> one lane reduce per
    # group (XLU slot), O(G) ops instead of an O(Cff) unaligned slice loop.
    p = h * w2_ref[...].astype(jnp.float32)          # (M, TCOL); w2 carries 1/HW
    parts = [jnp.sum(p[:, g * Tf:(g + 1) * Tf], axis=-1, keepdims=True)
             for g in range(G)]
    attn_acc[...] += jnp.concatenate(parts, axis=-1)  # (M, G) partial attention

    @pl.when(j == pl.num_programs(1) - 1)
    def _():
        attn = attn_acc[...] + b2_ref[...].astype(jnp.float32)  # b2 carries 1/HW
        # Token pooling: out[b, g, c] = sum_hw attn[b, hw, g] * x[b, hw, c].
        # attn stays f32 (pooling is ~0.05% of the FLOPs); output is (G, C) so
        # C sits on the lane axis -> lane-dense store.
        xp = x2d if x2d.dtype == jnp.float32 else x2d.astype(jnp.float32)
        if BB == 1:
            out = jax.lax.dot_general(attn, xp, (((0,), (0,)), ((), ())),
                                      preferred_element_type=jnp.float32)   # (G, C)
            o_ref[...] = out.reshape(1, G, C).astype(o_ref.dtype)
        else:
            attn3 = attn.reshape(BB, HW, G)
            xp3 = xp.reshape(BB, HW, C)
            out = jax.lax.dot_general(attn3, xp3, (((1,), (1,)), ((0,), (0,))),
                                      preferred_element_type=jnp.float32)   # (BB, G, C)
            o_ref[...] = out.astype(o_ref.dtype)


def _choose_group_slab(Cff, G, target_cols=2048):
    """Per-group hidden slab width Tf processed per column step (Tf | Cff).

    The column tile is Tf*G lanes; it must be a multiple of 128 (or be the
    full hidden width, which is always a legal full-array block)."""
    for steps in range(1, Cff + 1):
        if Cff % steps:
            continue
        tf = Cff // steps
        tcol = tf * G
        if tcol <= target_cols and tcol % 128 == 0:
            return tf                     # largest valid tile within budget
    return Cff                            # single step over the full width


def token_learner_forward(x_nchw, conv1_w, conv1_b, conv2_w, conv2_b, *,
                          num_output_tokens=8, ff_mult=2,
                          approx_gelu=False, matmul_dtype=None,
                          target_col_tile=2048):
    """x_nchw: (B, C, H, W). Returns (B, C, num_output_tokens)."""
    B, C, H, W = x_nchw.shape
    G = num_output_tokens
    Cff = C * ff_mult
    HW = H * W
    inv_hw = 1.0 / HW

    # ---- wrapper glue (free layout plumbing) --------------------------------
    # NCHW -> (B, HW, C): channels on the lane axis for the kernel.
    x = jnp.transpose(x_nchw, (0, 2, 3, 1)).reshape(B, HW, C)

    # Hidden-column tiling: grid axis 1 walks column tiles of width TCOL=Tf*G.
    # Inside a tile columns are group-major (col = g*Tf + f_local).
    Tf = _choose_group_slab(Cff, G, target_cols=target_col_tile)
    n_col = Cff // Tf
    TCOL = Tf * G

    w_dtype = matmul_dtype or conv1_w.dtype
    # conv1_w rows are group-major (row = g*Cff + f); rebuild columns ordered
    # [j (column step), g, f_local] so each tile has contiguous group slabs.
    w1 = (conv1_w.reshape(G, n_col, Tf, C)     # [g, j, f_local, c]
                 .transpose(3, 1, 0, 2)        # [c, j, g, f_local]
                 .reshape(C, n_col * TCOL)
                 .astype(w_dtype))
    b1 = (conv1_b.reshape(G, n_col, Tf)
                 .transpose(1, 0, 2)
                 .reshape(1, n_col * TCOL)
                 .astype(jnp.float32))
    # Fold the 1/HW "mean" into conv2's weight & bias (attn is linear in them).
    w2 = ((conv2_w * inv_hw).reshape(G, n_col, Tf)
                            .transpose(1, 0, 2)
                            .reshape(1, n_col * TCOL)
                            .astype(jnp.float32))
    b2 = (conv2_b * inv_hw).reshape(1, G).astype(jnp.float32)

    # ---- explicit VMEM budget from the chosen tiles -------------------------
    xi = jnp.dtype(x.dtype).itemsize
    wi = jnp.dtype(w_dtype).itemsize
    oi = jnp.dtype(x_nchw.dtype).itemsize
    est = (2 * HW * C * xi               # x block (double buffered)
           + 2 * C * TCOL * wi           # w1 column tile
           + 2 * 2 * TCOL * 4            # b1 + w2 column tiles
           + 2 * G * 4                   # b2
           + 2 * G * C * oi              # output block
           + 2 * HW * TCOL * 4           # h / p f32 intermediates
           + HW * G * 4)                 # attn accumulator scratch
    # Clamp so the budget is legal on every generation (v7x VMEM = 64 MiB).
    vmem_limit = int(min(max(2 * est, 32 << 20), 48 << 20))

    kernel = functools.partial(_token_learner_kernel, approx_gelu=approx_gelu)

    out_gc = pl.pallas_call(
        kernel,
        out_shape=jax.ShapeDtypeStruct((B, G, C), x_nchw.dtype),
        grid_spec=pltpu.PrefetchScalarGridSpec(
            num_scalar_prefetch=0,
            # Batch leading ("parallel": megacore shards it, each TC keeps a
            # private accumulator), hidden-column reduction trailing
            # ("arbitrary").
            grid=(B, n_col),
            in_specs=[
                pl.BlockSpec((1, HW, C), lambda b, j: (b, 0, 0)),   # x (j-invariant)
                pl.BlockSpec((C, TCOL), lambda b, j: (0, j)),       # w1 column tile
                pl.BlockSpec((1, TCOL), lambda b, j: (0, j)),       # b1 column tile
                pl.BlockSpec((1, TCOL), lambda b, j: (0, j)),       # w2 * 1/HW tile
                pl.BlockSpec((1, G), lambda b, j: (0, 0)),          # b2 * 1/HW
            ],
            out_specs=pl.BlockSpec((1, G, C), lambda b, j: (b, 0, 0)),
            scratch_shapes=[pltpu.VMEM((HW, G), jnp.float32)],      # attn accumulator
        ),
        compiler_params=pltpu.CompilerParams(
            dimension_semantics=("parallel", "arbitrary"),
            vmem_limit_bytes=vmem_limit),
    )(x, w1, b1, w2, b2)

    # glue: (B, G, C) -> (B, C, G)
    return jnp.transpose(out_gc, (0, 2, 1))


def token_learner_reference(x_nchw, conv1_w, conv1_b, conv2_w, conv2_b,
                            *, num_output_tokens=8, ff_mult=2):
    """Pure-JAX reference matching the PyTorch forward exactly."""
    B, C, H, W = x_nchw.shape
    G = num_output_tokens
    Cff = C * ff_mult
    hidden = jnp.einsum('oc,bchw->bohw', conv1_w, x_nchw) + conv1_b[None, :, None, None]
    hidden = jax.nn.gelu(hidden, approximate=False)
    hidden = hidden.reshape(B, G, Cff, H, W)
    attn = jnp.einsum('gj,bgjhw->bghw', conv2_w, hidden) + conv2_b[None, :, None, None]
    out = jnp.einsum('bchw,bghw->bcg', x_nchw, attn) / (H * W)
    return out


if __name__ == "__main__":
    # Module hyperparameters (small shapes consistent with the module)
    dim = 4                # = C
    ff_mult = 2
    num_output_tokens = 8  # = G
    B, H, W = 2, 16, 16

    C = dim
    G = num_output_tokens
    Cff = C * ff_mult
    inner_dim = C * ff_mult * G

    key = jax.random.PRNGKey(0)
    k_x, k_w1, k_b1, k_w2, k_b2 = jax.random.split(key, 5)

    x = jax.random.normal(k_x, (B, C, H, W), dtype=jnp.float32)

    # Shapes follow nn.Conv2d(..., 1, groups=G):
    #  conv1: weight (inner_dim, C) [per-group in-channels = C], bias (inner_dim,)
    #  conv2: weight (G, Cff)       [per-group in-channels = Cff], bias (G,)
    conv1_w = jax.random.normal(k_w1, (inner_dim, C), dtype=jnp.float32) * 0.2
    conv1_b = jax.random.normal(k_b1, (inner_dim,), dtype=jnp.float32) * 0.1
    conv2_w = jax.random.normal(k_w2, (G, Cff), dtype=jnp.float32) * 0.2
    conv2_b = jax.random.normal(k_b2, (G,), dtype=jnp.float32) * 0.1

    out = token_learner_forward(
        x, conv1_w, conv1_b, conv2_w, conv2_b,
        num_output_tokens=G, ff_mult=ff_mult)
    out = jax.block_until_ready(out)

    ref = token_learner_reference(
        x, conv1_w, conv1_b, conv2_w, conv2_b,
        num_output_tokens=G, ff_mult=ff_mult)

    assert out.shape == (B, C, G), out.shape
    assert jnp.allclose(out, ref, rtol=1e-5, atol=1e-5), \
        f"max abs err = {jnp.max(jnp.abs(out - ref))}"

    print("KERNEL_OK")
</pallas_src>

<mosaic_0001>
module attributes {stable_mosaic.version = 11 : i64} {
  func.func @_token_learner_kernel(%arg0: i32, %arg1: i32, %arg2: memref<1x256x4xf32, #tpu.memory_space<vmem>>, %arg3: memref<4x64xf32, #tpu.memory_space<vmem>>, %arg4: memref<1x64xf32, #tpu.memory_space<vmem>>, %arg5: memref<1x64xf32, #tpu.memory_space<vmem>>, %arg6: memref<1x8xf32, #tpu.memory_space<vmem>>, %arg7: memref<1x8x4xf32, #tpu.memory_space<vmem>>, %arg8: memref<256x8xf32, #tpu.memory_space<vmem>>) attributes {dimension_semantics = [#tpu.dimension_semantics<parallel>, #tpu.dimension_semantics<arbitrary>], iteration_bounds = array<i64: 2, 1>, scalar_prefetch = 0 : i64, scratch_operands = 1 : i64, tpu.core_type = #tpu.core_type<tc>, window_params = [{transform_indices = @transform_0, window_bounds = array<i64: 1, 256, 4>}, {transform_indices = @transform_1, window_bounds = array<i64: 4, 64>}, {transform_indices = @transform_2, window_bounds = array<i64: 1, 64>}, {transform_indices = @transform_3, window_bounds = array<i64: 1, 64>}, {pipeline_mode = #tpu.pipeline_mode<synchronous>, transform_indices = @transform_4, window_bounds = array<i64: 1, 8>}, {transform_indices = @transform_5, window_bounds = array<i64: 1, 8, 4>}]} {
    %c0_i32 = arith.constant 0 : i32
    %0 = arith.cmpi eq, %arg1, %c0_i32 : i32
    %1 = arith.extui %0 : i1 to i32
    %c0_i32_0 = arith.constant 0 : i32
    %2 = arith.cmpi ne, %1, %c0_i32_0 : i32
    scf.if %2 {
      %cst_26 = arith.constant 0.000000e+00 : f32
      %52 = vector.broadcast %cst_26 : f32 to vector<256x8xf32>
      %c0_27 = arith.constant 0 : index
      %c0_28 = arith.constant 0 : index
      %53 = vector.load %arg8[%c0_27, %c0_28] : memref<256x8xf32, #tpu.memory_space<vmem>>, vector<256x8xf32>
      tpu.vector_store %arg8[%c0_27, %c0_28], %52 {strides = array<i32>} : memref<256x8xf32, #tpu.memory_space<vmem>>, vector<256x8xf32>,
    } else {
    }
    %c0 = arith.constant 0 : index
    %c0_1 = arith.constant 0 : index
    %c0_2 = arith.constant 0 : index
    %3 = vector.load %arg2[%c0, %c0_1, %c0_2] : memref<1x256x4xf32, #tpu.memory_space<vmem>>, vector<1x256x4xf32>
    %4 = vector.shape_cast %3 : vector<1x256x4xf32> to vector<256x4xf32>
    %c0_3 = arith.constant 0 : index
    %c0_4 = arith.constant 0 : index
    %5 = vector.load %arg3[%c0_3, %c0_4] : memref<4x64xf32, #tpu.memory_space<vmem>>, vector<4x64xf32>
    %cst = arith.constant dense<0.000000e+00> : vector<256x64xf32>
    %6 = tpu.matmul %4, %5, %cst {dimension_numbers = #tpu.dot_dimension_numbers<[1], [0], [0], [1], [0, 0, 1, 1], [], []>} : vector<256x4xf32>, vector<4x64xf32>, vector<256x64xf32> -> vector<256x64xf32>
    %c0_5 = arith.constant 0 : index
    %c0_6 = arith.constant 0 : index
    %7 = vector.load %arg4[%c0_5, %c0_6] : memref<1x64xf32, #tpu.memory_space<vmem>>, vector<1x64xf32>
    %8 = vector.broadcast %7 : vector<1x64xf32> to vector<256x64xf32>
    %9 = arith.addf %6, %8 : vector<256x64xf32>
    %cst_7 = arith.constant 5.000000e-01 : f32
    %10 = vector.broadcast %cst_7 : f32 to vector<256x64xf32>
    %11 = arith.mulf %10, %9 : vector<256x64xf32>
    %cst_8 = arith.constant 0.707106769 : f32
    %12 = vector.broadcast %cst_8 : f32 to vector<256x64xf32>
    %13 = arith.mulf %9, %12 : vector<256x64xf32>
    %14 = math.erf %13 : vector<256x64xf32>
    %cst_9 = arith.constant 1.000000e+00 : f32
    %15 = vector.broadcast %cst_9 : f32 to vector<256x64xf32>
    %16 = arith.addf %15, %14 : vector<256x64xf32>
    %17 = arith.mulf %11, %16 : vector<256x64xf32>
    %c0_10 = arith.constant 0 : index
    %c0_11 = arith.constant 0 : index
    %18 = vector.load %arg5[%c0_10, %c0_11] : memref<1x64xf32, #tpu.memory_space<vmem>>, vector<1x64xf32>
    %19 = vector.broadcast %18 : vector<1x64xf32> to vector<256x64xf32>
    %20 = arith.mulf %17, %19 : vector<256x64xf32>
    %21 = vector.extract_strided_slice %20 {offsets = [0, 0], sizes = [256, 8], strides = [1, 1]} : vector<256x64xf32> to vector<256x8xf32>
    %cst_12 = arith.constant dense<0.000000e+00> : vector<256xf32>
    %22 = vector.multi_reduction <add>, %21, %cst_12 [1] : vector<256x8xf32> to vector<256xf32>
    %23 = vector.shape_cast %22 : vector<256xf32> to vector<256x1xf32>
    %24 = vector.extract_strided_slice %20 {offsets = [0, 8], sizes = [256, 8], strides = [1, 1]} : vector<256x64xf32> to vector<256x8xf32>
    %cst_13 = arith.constant dense<0.000000e+00> : vector<256xf32>
    %25 = vector.multi_reduction <add>, %24, %cst_13 [1] : vector<256x8xf32> to vector<256xf32>
    %26 = vector.shape_cast %25 : vector<256xf32> to vector<256x1xf32>
    %27 = vector.extract_strided_slice %20 {offsets = [0, 16], sizes = [256, 8], strides = [1, 1]} : vector<256x64xf32> to vector<256x8xf32>
    %cst_14 = arith.constant dense<0.000000e+00> : vector<256xf32>
    %28 = vector.multi_reduction <add>, %27, %cst_14 [1] : vector<256x8xf32> to vector<256xf32>
    %29 = vector.shape_cast %28 : vector<256xf32> to vector<256x1xf32>
    %30 = vector.extract_strided_slice %20 {offsets = [0, 24], sizes = [256, 8], strides = [1, 1]} : vector<256x64xf32> to vector<256x8xf32>
    %cst_15 = arith.constant dense<0.000000e+00> : vector<256xf32>
    %31 = vector.multi_reduction <add>, %30, %cst_15 [1] : vector<256x8xf32> to vector<256xf32>
    %32 = vector.shape_cast %31 : vector<256xf32> to vector<256x1xf32>
    %33 = vector.extract_strided_slice %20 {offsets = [0, 32], sizes = [256, 8], strides = [1, 1]} : vector<256x64xf32> to vector<256x8xf32>
    %cst_16 = arith.constant dense<0.000000e+00> : vector<256xf32>
    %34 = vector.multi_reduction <add>, %33, %cst_16 [1] : vector<256x8xf32> to vector<256xf32>
    %35 = vector.shape_cast %34 : vector<256xf32> to vector<256x1xf32>
    %36 = vector.extract_strided_slice %20 {offsets = [0, 40], sizes = [256, 8], strides = [1, 1]} : vector<256x64xf32> to vector<256x8xf32>
    %cst_17 = arith.constant dense<0.000000e+00> : vector<256xf32>
    %37 = vector.multi_reduction <add>, %36, %cst_17 [1] : vector<256x8xf32> to vector<256xf32>
    %38 = vector.shape_cast %37 : vector<256xf32> to vector<256x1xf32>
    %39 = vector.extract_strided_slice %20 {offsets = [0, 48], sizes = [256, 8], strides = [1, 1]} : vector<256x64xf32> to vector<256x8xf32>
    %cst_18 = arith.constant dense<0.000000e+00> : vector<256xf32>
    %40 = vector.multi_reduction <add>, %39, %cst_18 [1] : vector<256x8xf32> to vector<256xf32>
    %41 = vector.shape_cast %40 : vector<256xf32> to vector<256x1xf32>
    %42 = vector.extract_strided_slice %20 {offsets = [0, 56], sizes = [256, 8], strides = [1, 1]} : vector<256x64xf32> to vector<256x8xf32>
    %cst_19 = arith.constant dense<0.000000e+00> : vector<256xf32>
    %43 = vector.multi_reduction <add>, %42, %cst_19 [1] : vector<256x8xf32> to vector<256xf32>
    %44 = vector.shape_cast %43 : vector<256xf32> to vector<256x1xf32>
    %c0_20 = arith.constant 0 : index
    %c0_21 = arith.constant 0 : index
    %45 = vector.load %arg8[%c0_20, %c0_21] : memref<256x8xf32, #tpu.memory_space<vmem>>, vector<256x8xf32>
    %46 = tpu.concatenate %23, %26, %29, %32, %35, %38, %41, %44 in 1 : vector<256x1xf32>, vector<256x1xf32>, vector<256x1xf32>, vector<256x1xf32>, vector<256x1xf32>, vector<256x1xf32>, vector<256x1xf32>, vector<256x1xf32> -> vector<256x8xf32>
    %47 = arith.addf %45, %46 : vector<256x8xf32>
    %c0_22 = arith.constant 0 : index
    %c0_23 = arith.constant 0 : index
    %48 = vector.load %arg8[%c0_22, %c0_23] : memref<256x8xf32, #tpu.memory_space<vmem>>, vector<256x8xf32>
    tpu.vector_store %arg8[%c0_22, %c0_23], %47 {strides = array<i32>} : memref<256x8xf32, #tpu.memory_space<vmem>>, vector<256x8xf32>,
    %c0_i32_24 = arith.constant 0 : i32
    %49 = arith.cmpi eq, %arg1, %c0_i32_24 : i32
    %50 = arith.extui %49 : i1 to i32
    %c0_i32_25 = arith.constant 0 : i32
    %51 = arith.cmpi ne, %50, %c0_i32_25 : i32
    scf.if %51 {
      %c0_26 = arith.constant 0 : index
      %c0_27 = arith.constant 0 : index
      %52 = vector.load %arg8[%c0_26, %c0_27] : memref<256x8xf32, #tpu.memory_space<vmem>>, vector<256x8xf32>
      %c0_28 = arith.constant 0 : index
      %c0_29 = arith.constant 0 : index
      %53 = vector.load %arg6[%c0_28, %c0_29] : memref<1x8xf32, #tpu.memory_space<vmem>>, vector<1x8xf32>
      %54 = vector.broadcast %53 : vector<1x8xf32> to vector<256x8xf32>
      %55 = arith.addf %52, %54 : vector<256x8xf32>
      %cst_30 = arith.constant dense<0.000000e+00> : vector<8x4xf32>
      %56 = tpu.matmul %55, %4, %cst_30 {dimension_numbers = #tpu.dot_dimension_numbers<[0], [0], [1], [1], [0, 1, 1, 1], [], []>} : vector<256x8xf32>, vector<256x4xf32>, vector<8x4xf32> -> vector<8x4xf32>
      %57 = vector.shape_cast %56 : vector<8x4xf32> to vector<1x8x4xf32>
      %c0_31 = arith.constant 0 : index
      %c0_32 = arith.constant 0 : index
      %c0_33 = arith.constant 0 : index
      %58 = vector.load %arg7[%c0_31, %c0_32, %c0_33] : memref<1x8x4xf32, #tpu.memory_space<vmem>>, vector<1x8x4xf32>
      tpu.vector_store %arg7[%c0_31, %c0_32, %c0_33], %57 {strides = array<i32>} : memref<1x8x4xf32, #tpu.memory_space<vmem>>, vector<1x8x4xf32>,
    } else {
    }
    return
  }
  func.func @transform_0(%arg0: i32, %arg1: i32) -> (i32, i32, i32) {
    %c0_i32 = arith.constant 0 : i32
    %c0_i32_0 = arith.constant 0 : i32
    %c0_i32_1 = arith.constant 0 : i32
    return %arg0, %c0_i32, %c0_i32_0 : i32, i32, i32
  }
  func.func @transform_1(%arg0: i32, %arg1: i32) -> (i32, i32) {
    %c0_i32 = arith.constant 0 : i32
    %c0_i32_0 = arith.constant 0 : i32
    return %c0_i32, %arg1 : i32, i32
  }
  func.func @transform_2(%arg0: i32, %arg1: i32) -> (i32, i32) {
    %c0_i32 = arith.constant 0 : i32
    %c0_i32_0 = arith.constant 0 : i32
    return %c0_i32, %arg1 : i32, i32
  }
  func.func @transform_3(%arg0: i32, %arg1: i32) -> (i32, i32) {
    %c0_i32 = arith.constant 0 : i32
    %c0_i32_0 = arith.constant 0 : i32
    return %c0_i32, %arg1 : i32, i32
  }
  func.func @transform_4(%arg0: i32, %arg1: i32) -> (i32, i32) {
    %c0_i32 = arith.constant 0 : i32
    %c0_i32_0 = arith.constant 0 : i32
    %c0_i32_1 = arith.constant 0 : i32
    return %c0_i32, %c0_i32_0 : i32, i32
  }
  func.func @transform_5(%arg0: i32, %arg1: i32) -> (i32, i32, i32) {
    %c0_i32 = arith.constant 0 : i32
    %c0_i32_0 = arith.constant 0 : i32
    %c0_i32_1 = arith.constant 0 : i32
    return %arg0, %c0_i32, %c0_i32_0 : i32, i32, i32
  }
}

</mosaic_0001>

<bundles_post_ra>
// kernel: tpu_custom_call.1
= control target key start
LH: loop header
LB: loop body
LE: loop exit
PB: predicated region body
PF: predicated region fallthrough
CT: control target
= control target key end

     0   :  { %s3418_s18 = smov 0   ;;  %s3420_s19 = smov 0   ;;  %s5569_s0 = inlined_call_operand.vmem [shape: f32[2,256,4], index: 0, kind: input, shape index: {}]   ;;  %s5570_s1 = inlined_call_operand.vmem [shape: f32[4,64], index: 1, kind: input, shape index: {}]   ;;  %s5571_s2 = inlined_call_operand.vmem [shape: f32[1,64], index: 2, kind: input, shape index: {}]   ;;  %s5572_s3 = inlined_call_operand.vmem [shape: f32[1,64], index: 3, kind: input, shape index: {}]   ;;  %s5573_s4 = inlined_call_operand.vmem [shape: f32[1,8], index: 4, kind: input, shape index: {}]   ;;  %s5574_s5 = inlined_call_operand.vmem [shape: f32[2,8,4], index: 5, kind: output, shape index: {}]  }
   0x1   :  { %s3422_s20 = smov 0  }
   0x2 LB: > { %s27_s21 = sadd.s32 1, %s3374_s19  ;;  %p2998_p0 = scmp.ge.s32.totalorder %s3378_s20, 1  ;;  %s3378_s20 = sphi %s3422_s20, %s15_s20   ;;  %s3374_s19 = sphi %s3420_s19, %s5892_s19   ;;  %s3370_s18 = sphi %s3418_s18, %s5891_s18  }
   0x3   : > { %p29_p1 = scmp.ge.s32.totalorder %s27_s21, 2  ;;  %p224_p2 = scmp.lt.s32.totalorder %s3378_s20, 3 }
   0x5   : > { %s5894_s21 = smov (%p29_p1, %s27_s21), 0  ;;  %p225_p3 = pnand %p2998_p0, %p224_p2 }
   0x7   : > { %228 = sbr.rel (%p225_p3) target bundleno = 2657 (0xa61), region = 40 }
   0xe   : > { %v349_v0 = vld [vmem:[%s5570_s1] sm:$0xf]  ;;  %vm454_vm0 = vcmask 1043456   ;;  %p261_p4 = scmp.lt.s32.totalorder %s3370_s18, 1  ;;  %vm357_vm1 = vcmask 31744   ;;  %vm284_vm2 = vcmask 64512  }
   0xf   : > { %3109 = vmatprep.subr.msk.mxu0 %vm454_vm0, %v349_v0  ;;  %v3478_v15 = vld [vmem:[%s5571_s2] ss:$0 sm:$0xff]  ;;  %s3380_s7 = smov 120   ;;  %s3381_s8 = smov 112   ;;  %vm2387_vm3 = vcmask 7168   ;;  %vm2420_vm4 = vcmask 15360  }
  0x10   : > { %3110 = vmatpush3.msk.msra.mxu0 %vm454_vm0, %v349_v0  ;;  %s5896_s18 = smov (!%p261_p4, %s3370_s18), 1  ;;  %v3492_v32 = vld [vmem:[%s5572_s3] ss:$0 sm:$0xff]  ;;  %s3382_s9 = smov 104   ;;  %vm2453_vm5 = vcmask 23552   ;;  %vm2518_vm6 = vcmask 39936  }
  0x11   : > { %s3040_s24 = sshll.u32 %s5896_s18, 8  ;;  %s3383_s10 = smov 96   ;;  %vm2551_vm7 = vcmask 48128   ;;  %vm2584_vm8 = vcmask 56320  }
  0x12   : > { %s3445_s27 = scalar_lea.vmem %s5569_s0, %s3040_s24  ;;  %s3384_s11 = smov 88  }
  0x13   : > { %v317_v1 = vld [vmem:[%s3445_s27] sm:$0xff]  ;;  %v318_v2 = vld [vmem:[%s3445_s27 + $0x8] sm:$0xff]  ;;  %v319_v3 = vld [vmem:[%s3445_s27 + $0x10] sm:$0xff]  ;;  %s3385_s12 = smov 80   ;;  %s3386_s13 = smov 72  }
  0x14   : > { %3111 = vmatprep.mubr.msk.f32.mxu0 %vm357_vm1, %v317_v1  ;;  %v320_v4 = vld [vmem:[%s3445_s27 + $0x18] sm:$0xff]  ;;  %v321_v5 = vld [vmem:[%s3445_s27 + $0x20] sm:$0xff]  ;;  %v322_v6 = vld [vmem:[%s3445_s27 + $0x28] sm:$0xff]  ;;  %s3001_s16 = sshll.u32 %s5896_s18, 3 }
  0x15   : > { %3112 = vmatmul.mubr.msk.f32.vlgmr.msra.gmra.mrb[0].mxu0 %vm357_vm1, %v318_v2  ;;  %v323_v7 = vld [vmem:[%s3445_s27 + $0x30] sm:$0xff]  ;;  %v324_v8 = vld [vmem:[%s3445_s27 + $0x38] sm:$0xff]  ;;  %v325_v9 = vld [vmem:[%s3445_s27 + $0x40] sm:$0xff]  ;;  %s279_s23 = scalar_lea.vmem %s5574_s5, %s3001_s16 }
  0x16   : > { %3114 = vmatprep.mubr.msk.f32.mxu0 %vm357_vm1, %v319_v3  ;;  %v326_v10 = vld [vmem:[%s3445_s27 + $0x48] sm:$0xff]  ;;  %v327_v11 = vld [vmem:[%s3445_s27 + $0x50] sm:$0xff]  ;;  %v328_v12 = vld [vmem:[%s3445_s27 + $0x58] sm:$0xff] }
  0x17   : > { %v329_v13 = vld [vmem:[%s3445_s27 + $0x60] sm:$0xff]  ;;  %v330_v14 = vld [vmem:[%s3445_s27 + $0x68] sm:$0xff]  ;;  %v331_v38 = vld [vmem:[%s3445_s27 + $0x70] sm:$0xff] }
  0x18   : > { %v332_v39 = vld [vmem:[%s3445_s27 + $0x78] sm:$0xff]  ;;  %v333_v58 = vld [vmem:[%s3445_s27 + $0x80] sm:$0xff]  ;;  %v334_v59 = vld [vmem:[%s3445_s27 + $0x88] sm:$0xff] }
  0x19   : > { %3115 = vmatmul.mubr.msk.f32.gmra.mrb[2].mxu0 %vm357_vm1, %v320_v4 }
  0x1a   : > { %3117 = vmatprep.mubr.msk.f32.mxu0 %vm357_vm1, %v321_v5 }
  0x1d   : > { %3118 = vmatmul.mubr.msk.f32.gmra.mrb[4].mxu0 %vm357_vm1, %v322_v6 }
  0x1e   : > { %3120 = vmatprep.mubr.msk.f32.mxu0 %vm357_vm1, %v323_v7 }
  0x21   : > { %3121 = vmatmul.mubr.msk.f32.gmra.mrb[6].mxu0 %vm357_vm1, %v324_v8 }
  0x22   : > { %3123 = vmatprep.mubr.msk.f32.mxu0 %vm357_vm1, %v325_v9 }
  0x25   : > { %3124 = vmatmul.mubr.msk.f32.gmra.mrb[8].mxu0 %vm357_vm1, %v326_v10 }
  0x26   : > { %3126 = vmatprep.mubr.msk.f32.mxu0 %vm357_vm1, %v327_v11 }
  0x29   : > { %3127 = vmatmul.mubr.msk.f32.gmra.mrb[10].mxu0 %vm357_vm1, %v328_v12 }
  0x2a   : > { %3129 = vmatprep.mubr.msk.f32.mxu0 %vm357_vm1, %v329_v13 }
  0x2d   : > { %3130 = vmatmul.mubr.msk.f32.gmra.mrb[12].mxu0 %vm357_vm1, %v330_v14 }
  0x2e   : > { %3132 = vmatprep.mubr.msk.f32.mxu0 %vm357_vm1, %v331_v38 }
  0x31   : > { %3133 = vmatmul.mubr.msk.f32.gmra.mrb[14].mxu0 %vm357_vm1, %v332_v39  ;;  %v337_v39 = vld [vmem:[%s3445_s27 + $0xa0] sm:$0xff] }
  0x32   : > { %3135 = vmatprep.mubr.msk.f32.mxu0 %vm357_vm1, %v333_v58 }
  0x35   : > { %3136 = vmatmul.mubr.msk.f32.gmra.mrb[16].mxu0 %vm357_vm1, %v334_v59 }
  0xe8   : > { %v3113_v16 = vpop.f32.mrb[0].mxu0 }
  0xe9   : > { %v530_v17 = vadd.f32 %v3113_v16, %v3478_v15  ;;  %v524_v18 = vpop.f32.mrb[1].mxu0  ;;  %v335_v16 = vld [vmem:[%s3445_s27 + $0x90] sm:$0xff] }
  0xea   : > { %v525_v28 = vadd.f32 %v3478_v15, %v524_v18  ;;  %3138 = vmatprep.mubr.msk.f32.mxu0 %vm357_vm1, %v335_v16 }
  0xeb   : > { %v716_v19 = vmul.f32 0.70710677, %v530_v17  ;;  %v684_v30 = vmul.f32 0.5, %v530_v17  ;;  %v336_v17 = vld [vmem:[%s3445_s27 + $0x98] sm:$0xff] }
  0xec   : > { %v3116_v20 = vpop.f32.mrb[2].mxu0  ;;  %v715_v34 = vmul.f32 0.70710677, %v525_v28  ;;  %v683_v46 = vmul.f32 0.5, %v525_v28  ;;  %3139 = vmatmul.mubr.msk.f32.gmra.mrb[18].mxu0 %vm357_vm1, %v336_v17 }
  0xed   : > { %3260 = verf.f32 %v716_v19  ;;  %v540_v21 = vadd.f32 %v3116_v20, %v3478_v15  ;;  %v534_v22 = vpop.f32.mrb[3].mxu0  ;;  %3141 = vmatprep.mubr.msk.f32.mxu0 %vm357_vm1, %v337_v39 }
  0xee   : > { %v535_v49 = vadd.f32 %v3478_v15, %v534_v22 }
  0xef   : > { %v718_v23 = vmul.f32 0.70710677, %v540_v21  ;;  %v686_v40 = vmul.f32 0.5, %v540_v21 }
  0xf0   : > { %v3482_v24 = vpop.f32.mrb[4].mxu0  ;;  %v717_v52 = vmul.f32 0.70710677, %v535_v49  ;;  %v685_v60 = vmul.f32 0.5, %v535_v49 }
  0xf1   : > { %3262 = verf.f32 %v718_v23  ;;  %v544_v25 = vpop.f32.mrb[5].mxu0  ;;  %v550_v5 = vadd.f32 %v3482_v24, %v3478_v15 }
  0xf2   : > { %3264 = verf.f32 %v715_v34  ;;  %v545_v54 = vadd.f32 %v3478_v15, %v544_v25 }
  0xf3   : > { %3266 = verf.f32 %v717_v52  ;;  %v720_v6 = vmul.f32 0.70710677, %v550_v5  ;;  %v688_v13 = vmul.f32 0.5, %v550_v5 }
  0xf4   : > { %v3484_v26 = vpop.f32.mrb[6].mxu0  ;;  %v719_v55 = vmul.f32 0.70710677, %v545_v54  ;;  %v687_v1 = vmul.f32 0.5, %v545_v54 }
  0xf5   : > { %v3486_v27 = vpop.f32.mrb[7].mxu0 }
  0xf6   : > { %3268 = verf.f32 %v719_v55  ;;  %v555_v10 = vadd.f32 %v3478_v15, %v3486_v27  ;;  %v560_v27 = vadd.f32 %v3484_v26, %v3478_v15  ;;  %v338_v26 = vld [vmem:[%s3445_s27 + $0xa8] sm:$0xff] }
  0xf7   : > { %v3261_v29 = vpop.eup %3260  ;;  %3270 = verf.f32 %v720_v6  ;;  %3142 = vmatmul.mubr.msk.f32.gmra.mrb[20].mxu0 %vm357_vm1, %v338_v26 }
  0xf8   : > { %v780_v31 = vadd.f32 1.0, %v3261_v29  ;;  %v3522_v50 = vpop.f32.mrb[8].mxu0  ;;  %v721_v11 = vmul.f32 0.70710677, %v555_v10  ;;  %v689_v22 = vmul.f32 0.5, %v555_v10 }
  0xf9   : > { %v3524_v51 = vpop.f32.mrb[9].mxu0  ;;  %v722_v28 = vmul.f32 0.70710677, %v560_v27 }
  0xfa   : > { %v812_v33 = vmul.f32 %v780_v31, %v684_v30  ;;  %3272 = verf.f32 %v721_v11 }
  0xfb   : > { %v3263_v35 = vpop.eup %3262  ;;  %3274 = verf.f32 %v722_v28 }
  0xfc   : > { %v3495_v36 = vmul.f32 %v3492_v32, %v812_v33  ;;  %v782_v37 = vadd.f32 1.0, %v3263_v35  ;;  %v3265_v44 = vpop.eup %3264  ;;  %v3551_v7 = vpop.f32.mrb[10].mxu0  ;;  %v565_v33 = vadd.f32 %v3478_v15, %v3524_v51  ;;  %v570_v51 = vadd.f32 %v3522_v50, %v3478_v15  ;;  %v340_v50 = vld [vmem:[%s3445_s27 + $0xb8] sm:$0xff] }
  0xfd   : > { %v779_v45 = vadd.f32 1.0, %v3265_v44  ;;  %v3267_v56 = vpop.eup %3266  ;;  %v3553_v8 = vpop.f32.mrb[11].mxu0 }
  0xfe   : > { %1013 = vrot.lane.b32.xlu1 %v3495_v36, %s3380_s7  ;;  %v886_v41 = vsel %vm284_vm2, %v3495_v36, 0.0  ;;  %v814_v42 = vmul.f32 %v782_v37, %v686_v40  ;;  %v781_v57 = vadd.f32 1.0, %v3267_v56  ;;  %v723_v34 = vmul.f32 0.70710677, %v565_v33 }
  0xff   : > { %887 = vadd.xlane.f32.xlu0 %v886_v41  ;;  %v811_v47 = vmul.f32 %v779_v45, %v683_v46  ;;  %v690_v37 = vmul.f32 0.5, %v560_v27  ;;  %v691_v45 = vmul.f32 0.5, %v565_v33  ;;  %v724_v52 = vmul.f32 0.70710677, %v570_v51 }
 0x100   : > { %v3508_v43 = vmul.f32 %v3492_v32, %v814_v42  ;;  %v813_v62 = vmul.f32 %v781_v57, %v685_v60  ;;  %v3269_v0 = vpop.eup %3268  ;;  %v3581_v29 = vpop.f32.mrb[12].mxu0  ;;  %3276 = verf.f32 %v723_v34  ;;  %v575_v56 = vadd.f32 %v3478_v15, %v3553_v8 }
 0x101   : > { %v3515_v48 = vmul.f32 %v3492_v32, %v811_v47  ;;  %v783_v2 = vadd.f32 1.0, %v3269_v0  ;;  %v3271_v12 = vpop.eup %3270  ;;  %v3583_v30 = vpop.f32.mrb[13].mxu0  ;;  %3278 = verf.f32 %v724_v52  ;;  %v692_v59 = vmul.f32 0.5, %v570_v51 }
 0x102   : > { %1205 = vrot.lane.b32.xlu1 %v3495_v36, %s3381_s8  ;;  %v892_v53 = vsel %vm284_vm2, %v3508_v43, 0.0  ;;  %v3536_v63 = vmul.f32 %v3492_v32, %v813_v62  ;;  %v784_v14 = vadd.f32 1.0, %v3271_v12  ;;  %v725_v57 = vmul.f32 0.70710677, %v575_v56 }
 0x103   : > { %v883_v61 = vsel %vm284_vm2, %v3515_v48, 0.0  ;;  %v815_v3 = vmul.f32 %v783_v2, %v687_v1  ;;  %v590_v34 = vadd.f32 %v3581_v29, %v3478_v15  ;;  %v344_v29 = vld [vmem:[%s3445_s27 + $0xd8] sm:$0xff] }
 0x104   : > { %v889_v9 = vsel %vm284_vm2, %v3536_v63, 0.0  ;;  %v816_v19 = vmul.f32 %v784_v14, %v688_v13  ;;  %v3273_v21 = vpop.eup %3272  ;;  %3280 = verf.f32 %v725_v57  ;;  %v585_v14 = vadd.f32 %v3478_v15, %v3583_v30 }
 0x105   : > { %v3543_v4 = vmul.f32 %v3492_v32, %v815_v3  ;;  %v785_v23 = vadd.f32 1.0, %v3273_v21  ;;  %v3275_v35 = vpop.eup %3274  ;;  %v693_v3 = vmul.f32 0.5, %v575_v56  ;;  %v341_v21 = vld [vmem:[%s3445_s27 + $0xc0] sm:$0xff] }
 0x106   : > { %1017 = vrot.lane.b32.xlu1 %v3508_v43, %s3380_s7  ;;  %v3566_v20 = vmul.f32 %v3492_v32, %v816_v19  ;;  %v786_v38 = vadd.f32 1.0, %v3275_v35  ;;  %v727_v16 = vmul.f32 0.70710677, %v585_v14  ;;  %v695_v28 = vmul.f32 0.5, %v585_v14 }
 0x107   : > { %v895_v18 = vsel %vm284_vm2, %v3543_v4, 0.0  ;;  %v817_v24 = vmul.f32 %v785_v23, %v689_v22  ;;  %v728_v35 = vmul.f32 0.70710677, %v590_v34 }
 0x108   : > { %v898_v31 = vsel %vm284_vm2, %v3566_v20, 0.0  ;;  %v818_v41 = vmul.f32 %v786_v38, %v690_v37 }
 0x109   : > { %v3573_v25 = vmul.f32 %v3492_v32, %v817_v24 }
 0x10a   : > { %1209 = vrot.lane.b32.xlu1 %v3508_v43, %s3381_s8  ;;  %v3596_v42 = vmul.f32 %v3492_v32, %v818_v41  ;;  %v3277_v44 = vpop.eup %3276 }
 0x10b   : > { %v901_v40 = vsel %vm284_vm2, %v3573_v25, 0.0  ;;  %v787_v46 = vadd.f32 1.0, %v3277_v44  ;;  %v3279_v58 = vpop.eup %3278  ;;  %v696_v44 = vmul.f32 0.5, %v590_v34 }
 0x10c   : > { %v904_v55 = vsel %vm284_vm2, %v3596_v42, 0.0  ;;  %v788_v60 = vadd.f32 1.0, %v3279_v58 }
 0x10d   : > { %v819_v47 = vmul.f32 %v787_v46, %v691_v45  ;;  %v343_v46 = vld [vmem:[%s3445_s27 + $0xd0] sm:$0xff] }
 0x10e   : > { %v820_v0 = vmul.f32 %v788_v60, %v692_v59  ;;  %v3281_v2 = vpop.eup %3280 }
 0x10f   : > { %v3603_v49 = vmul.f32 %v3492_v32, %v819_v47  ;;  %v789_v5 = vadd.f32 1.0, %v3281_v2 }
 0x110   : > { %v3626_v1 = vmul.f32 %v3492_v32, %v820_v0 }
 0x111   : > { %v907_v62 = vsel %vm284_vm2, %v3603_v49, 0.0  ;;  %v821_v6 = vmul.f32 %v789_v5, %v693_v3 }
 0x112   : > { %v910_v13 = vsel %vm284_vm2, %v3626_v1, 0.0 }
 0x113   : > { %v3633_v8 = vmul.f32 %v3492_v32, %v821_v6 }
 0x115   : > { %1011 = vrot.lane.b32.xlu0 %v3515_v48, %s3380_s7  ;;  %v913_v22 = vsel %vm284_vm2, %v3633_v8, 0.0 }
 0x119   : > { %1203 = vrot.lane.b32.xlu0 %v3515_v48, %s3381_s8 }
 0x12e   : > { %893 = vadd.xlane.f32.xlu1 %v892_v53  ;;  %v3611_v53 = vpop.f32.mrb[14].mxu0 }
 0x12f   : > { %v3613_v54 = vpop.f32.mrb[15].mxu0  ;;  %v600_v59 = vadd.f32 %v3611_v53, %v3478_v15  ;;  %v346_v53 = vld [vmem:[%s3445_s27 + $0xe8] sm:$0xff] }
 0x130   : > { %v3641_v11 = vpop.f32.mrb[16].mxu0  ;;  %v595_v26 = vadd.f32 %v3478_v15, %v3613_v54 }
 0x131   : > { %v3643_v12 = vpop.f32.mrb[17].mxu0  ;;  %v730_v60 = vmul.f32 0.70710677, %v600_v59  ;;  %v698_v5 = vmul.f32 0.5, %v600_v59 }
 0x132   : > { %v605_v0 = vadd.f32 %v3478_v15, %v3643_v12 }
 0x134   : > { %v731_v2 = vmul.f32 0.70710677, %v605_v0 }
 0x138   : > { %884 = vadd.xlane.f32.xlu0 %v883_v61  ;;  %v339_v61 = vld [vmem:[%s3445_s27 + $0xb0] sm:$0xff] }
 0x139   : > { %3144 = vmatprep.mubr.msk.f32.mxu0 %vm357_vm1, %v339_v61 }
 0x13a   : > { %3145 = vmatmul.mubr.msk.f32.gmra.mrb[22].mxu0 %vm357_vm1, %v340_v50 }
 0x13b   : > { %3147 = vmatprep.mubr.msk.f32.mxu0 %vm357_vm1, %v341_v21  ;;  %v610_v21 = vadd.f32 %v3641_v11, %v3478_v15 }
 0x13d   : > { %v700_v34 = vmul.f32 0.5, %v610_v21 }
 0x13f   : > { %1015 = vrot.lane.b32.xlu1 %v3536_v63, %s3380_s7 }
 0x143   : > { %1207 = vrot.lane.b32.xlu1 %v3536_v63, %s3381_s8 }
 0x14e   : > { %1019 = vrot.lane.b32.xlu0 %v3543_v4, %s3380_s7 }
 0x152   : > { %1211 = vrot.lane.b32.xlu0 %v3543_v4, %s3381_s8 }
 0x167   : > { %890 = vadd.xlane.f32.xlu1 %v889_v9  ;;  %v580_v9 = vadd.f32 %v3551_v7, %v3478_v15  ;;  %v342_v7 = vld [vmem:[%s3445_s27 + $0xc8] sm:$0xff] }
 0x168   : > { %3148 = vmatmul.mubr.msk.f32.gmra.mrb[24].mxu0 %vm357_vm1, %v342_v7  ;;  %v732_v7 = vmul.f32 0.70710677, %v610_v21 }
 0x169   : > { %v726_v10 = vmul.f32 0.70710677, %v580_v9  ;;  %3150 = vmatprep.mubr.msk.f32.mxu0 %vm357_vm1, %v343_v46 }
 0x16b   : > { %3282 = verf.f32 %v726_v10 }
 0x16c   : > { %3284 = verf.f32 %v727_v16  ;;  %3151 = vmatmul.mubr.msk.f32.gmra.mrb[26].mxu0 %vm357_vm1, %v344_v29  ;;  %v699_v16 = vmul.f32 0.5, %v605_v0 }
 0x16d   : > { %3286 = verf.f32 %v728_v35 }
 0x171   : > { %896 = vadd.xlane.f32.xlu0 %v895_v18  ;;  %v694_v18 = vmul.f32 0.5, %v580_v9  ;;  %v345_v9 = vld [vmem:[%s3445_s27 + $0xe0] sm:$0xff] }
 0x172   : > { %3153 = vmatprep.mubr.msk.f32.mxu0 %vm357_vm1, %v345_v9 }
 0x173   : > { %3154 = vmatmul.mubr.msk.f32.gmra.mrb[28].mxu0 %vm357_vm1, %v346_v53 }
 0x175   : > { %v3283_v17 = vpop.eup %3282 }
 0x176   : > { %v790_v19 = vadd.f32 1.0, %v3283_v17  ;;  %v3285_v27 = vpop.eup %3284 }
 0x177   : > { %v791_v30 = vadd.f32 1.0, %v3285_v27  ;;  %v3287_v41 = vpop.eup %3286 }
 0x178   : > { %1021 = vrot.lane.b32.xlu1 %v3566_v20, %s3380_s7  ;;  %v822_v23 = vmul.f32 %v790_v19, %v694_v18  ;;  %v792_v45 = vadd.f32 1.0, %v3287_v41 }
 0x17a   : > { %v3656_v24 = vmul.f32 %v3492_v32, %v822_v23  ;;  %v824_v51 = vmul.f32 %v792_v45, %v696_v44 }
 0x17c   : > { %1213 = vrot.lane.b32.xlu1 %v3566_v20, %s3381_s8  ;;  %v916_v39 = vsel %vm284_vm2, %v3656_v24, 0.0  ;;  %v3686_v52 = vmul.f32 %v3492_v32, %v824_v51 }
 0x187   : > { %1023 = vrot.lane.b32.xlu0 %v3573_v25, %s3380_s7 }
 0x18b   : > { %1215 = vrot.lane.b32.xlu0 %v3573_v25, %s3381_s8 }
 0x1a0   : > { %899 = vadd.xlane.f32.xlu1 %v898_v31  ;;  %v823_v31 = vmul.f32 %v791_v30, %v695_v28 }
 0x1a2   : > { %v3663_v33 = vmul.f32 %v3492_v32, %v823_v31 }
 0x1a4   : > { %v919_v47 = vsel %vm284_vm2, %v3663_v33, 0.0 }
 0x1aa   : > { %902 = vadd.xlane.f32.xlu0 %v901_v40  ;;  %v729_v40 = vmul.f32 0.70710677, %v595_v26 }
 0x1ac   : > { %3288 = verf.f32 %v729_v40 }
 0x1ad   : > { %3290 = verf.f32 %v730_v60 }
 0x1ae   : > { %3292 = verf.f32 %v731_v2 }
 0x1af   : > { %3294 = verf.f32 %v732_v7 }
 0x1b1   : > { %1025 = vrot.lane.b32.xlu1 %v3596_v42, %s3380_s7 }
 0x1b5   : > { %1217 = vrot.lane.b32.xlu1 %v3596_v42, %s3381_s8 }
 0x1b6   : > { %v3289_v54 = vpop.eup %3288 }
 0x1b7   : > { %v793_v56 = vadd.f32 1.0, %v3289_v54  ;;  %v3291_v3 = vpop.eup %3290 }
 0x1b8   : > { %v794_v6 = vadd.f32 1.0, %v3291_v3  ;;  %v3293_v12 = vpop.eup %3292 }
 0x1b9   : > { %v795_v17 = vadd.f32 1.0, %v3293_v12  ;;  %v3295_v31 = vpop.eup %3294 }
 0x1ba   : > { %v796_v35 = vadd.f32 1.0, %v3295_v31 }
 0x1bb   : > { %v827_v18 = vmul.f32 %v795_v17, %v699_v16 }
 0x1bc   : > { %v828_v40 = vmul.f32 %v796_v35, %v700_v34 }
 0x1bd   : > { %v3723_v19 = vmul.f32 %v3492_v32, %v827_v18 }
 0x1be   : > { %v3744_v41 = vmul.f32 %v3492_v32, %v828_v40 }
 0x1bf   : > { %v3671_v37 = vpop.f32.mrb[18].mxu0  ;;  %v931_v11 = vsel %vm284_vm2, %v3723_v19, 0.0 }
 0x1c0   : > { %1027 = vrot.lane.b32.xlu0 %v3603_v49, %s3380_s7  ;;  %v3673_v38 = vpop.f32.mrb[19].mxu0 }
 0x1c1   : > { %v615_v28 = vadd.f32 %v3478_v15, %v3673_v38 }
 0x1c3   : > { %v733_v30 = vmul.f32 0.70710677, %v615_v28  ;;  %v701_v44 = vmul.f32 0.5, %v615_v28 }
 0x1c4   : > { %1219 = vrot.lane.b32.xlu0 %v3603_v49, %s3381_s8 }
 0x1c5   : > { %3296 = verf.f32 %v733_v30 }
 0x1ca   : > { %v3701_v61 = vpop.f32.mrb[20].mxu0 }
 0x1cb   : > { %v3703_v50 = vpop.f32.mrb[21].mxu0 }
 0x1cf   : > { %v3297_v38 = vpop.eup %3296 }
 0x1d0   : > { %v797_v45 = vadd.f32 1.0, %v3297_v38 }
 0x1d2   : > { %v829_v46 = vmul.f32 %v797_v45, %v701_v44 }
 0x1d4   : > { %v3751_v29 = vmul.f32 %v3492_v32, %v829_v46 }
 0x1d9   : > { %905 = vadd.xlane.f32.xlu1 %v904_v55  ;;  %v697_v55 = vmul.f32 0.5, %v595_v26  ;;  %v348_v26 = vld [vmem:[%s3445_s27 + $0xf8] sm:$0xff] }
 0x1db   : > { %v825_v57 = vmul.f32 %v793_v56, %v697_v55  ;;  %v934_v56 = vsel %vm284_vm2, %v3744_v41, 0.0 }
 0x1dd   : > { %v3693_v58 = vmul.f32 %v3492_v32, %v825_v57  ;;  %v625_v57 = vadd.f32 %v3478_v15, %v3703_v50 }
 0x1df   : > { %v925_v10 = vsel %vm284_vm2, %v3693_v58, 0.0  ;;  %v735_v59 = vmul.f32 0.70710677, %v625_v57 }
 0x1e3   : > { %908 = vadd.xlane.f32.xlu0 %v907_v62  ;;  %v922_v62 = vsel %vm284_vm2, %v3686_v52, 0.0 }
 0x1ea   : > { %1029 = vrot.lane.b32.xlu1 %v3626_v1, %s3380_s7 }
 0x1ee   : > { %1221 = vrot.lane.b32.xlu1 %v3626_v1, %s3381_s8 }
 0x1f9   : > { %1031 = vrot.lane.b32.xlu0 %v3633_v8, %s3380_s7 }
 0x1fd   : > { %1223 = vrot.lane.b32.xlu0 %v3633_v8, %s3381_s8 }
 0x212   : > { %911 = vadd.xlane.f32.xlu1 %v910_v13  ;;  %v826_v13 = vmul.f32 %v794_v6, %v698_v5  ;;  %v703_v6 = vmul.f32 0.5, %v625_v57 }
 0x214   : > { %v3716_v14 = vmul.f32 %v3492_v32, %v826_v13 }
 0x216   : > { %v928_v27 = vsel %vm284_vm2, %v3716_v14, 0.0 }
 0x21c   : > { %914 = vadd.xlane.f32.xlu0 %v913_v22  ;;  %v3731_v22 = vpop.f32.mrb[22].mxu0 }
 0x21d   : > { %v634_v23 = vpop.f32.mrb[23].mxu0 }
 0x21e   : > { %v635_v18 = vadd.f32 %v3478_v15, %v634_v23 }
 0x220   : > { %v737_v21 = vmul.f32 0.70710677, %v635_v18  ;;  %v705_v35 = vmul.f32 0.5, %v635_v18 }
 0x223   : > { %1033 = vrot.lane.b32.xlu1 %v3656_v24, %s3380_s7 }
 0x227   : > { %1225 = vrot.lane.b32.xlu1 %v3656_v24, %s3381_s8 }
 0x232   : > { %1035 = vrot.lane.b32.xlu0 %v3663_v33, %s3380_s7 }
 0x236   : > { %1227 = vrot.lane.b32.xlu0 %v3663_v33, %s3381_s8 }
 0x23b   : > { %v3759_v54 = vpop.f32.mrb[24].mxu0 }
 0x23c   : > { %v644_v55 = vpop.f32.mrb[25].mxu0 }
 0x23d   : > { %v645_v46 = vadd.f32 %v3478_v15, %v644_v55 }
 0x23f   : > { %v3783_v12 = vpop.f32.mrb[26].mxu0 }
 0x240   : > { %v654_v16 = vpop.f32.mrb[27].mxu0 }
 0x246   : > { %v3806_v38 = vpop.f32.mrb[28].mxu0 }
 0x247   : > { %v664_v44 = vpop.f32.mrb[29].mxu0 }
 0x24b   : > { %917 = vadd.xlane.f32.xlu1 %v916_v39  ;;  %v347_v39 = vld [vmem:[%s3445_s27 + $0xf0] sm:$0xff] }
 0x24c   : > { %3156 = vmatprep.mubr.msk.f32.mxu0 %vm357_vm1, %v347_v39 }
 0x24d   : > { %3157 = vmatmul.mubr.msk.f32.gmra.mrb[30].mxu0 %vm357_vm1, %v348_v26 }
 0x255   : > { %920 = vadd.xlane.f32.xlu0 %v919_v47  ;;  %v620_v47 = vadd.f32 %v3671_v37, %v3478_v15  ;;  %v937_v37 = vsel %vm284_vm2, %v3751_v29, 0.0 }
 0x257   : > { %v734_v51 = vmul.f32 0.70710677, %v620_v47 }
 0x259   : > { %3298 = verf.f32 %v734_v51 }
 0x25a   : > { %3300 = verf.f32 %v735_v59 }
 0x25c   : > { %1037 = vrot.lane.b32.xlu1 %v3686_v52, %s3380_s7 }
 0x260   : > { %1229 = vrot.lane.b32.xlu1 %v3686_v52, %s3381_s8 }
 0x263   : > { %v3299_v60 = vpop.eup %3298 }
 0x264   : > { %v798_v0 = vadd.f32 1.0, %v3299_v60  ;;  %v3301_v5 = vpop.eup %3300 }
 0x265   : > { %v799_v50 = vadd.f32 1.0, %v3301_v5  ;;  %v650_v5 = vadd.f32 %v3759_v54, %v3478_v15 }
 0x267   : > { %v831_v9 = vmul.f32 %v799_v50, %v703_v6  ;;  %v740_v6 = vmul.f32 0.70710677, %v650_v5 }
 0x269   : > { %v3775_v53 = vmul.f32 %v3492_v32, %v831_v9 }
 0x26b   : > { %1039 = vrot.lane.b32.xlu0 %v3693_v58, %s3380_s7  ;;  %v943_v30 = vsel %vm284_vm2, %v3775_v53, 0.0 }
 0x26f   : > { %1231 = vrot.lane.b32.xlu0 %v3693_v58, %s3381_s8 }
 0x284   : > { %923 = vadd.xlane.f32.xlu1 %v922_v62  ;;  %v702_v62 = vmul.f32 0.5, %v620_v47  ;;  %v739_v47 = vmul.f32 0.70710677, %v645_v46 }
 0x286   : > { %v830_v2 = vmul.f32 %v798_v0, %v702_v62  ;;  %v707_v0 = vmul.f32 0.5, %v645_v46 }
 0x288   : > { %v3768_v3 = vmul.f32 %v3492_v32, %v830_v2 }
 0x28a   : > { %v940_v17 = vsel %vm284_vm2, %v3768_v3, 0.0 }
 0x28e   : > { %926 = vadd.xlane.f32.xlu0 %v925_v10  ;;  %v630_v10 = vadd.f32 %v3701_v61, %v3478_v15 }
 0x290   : > { %v736_v13 = vmul.f32 0.70710677, %v630_v10 }
 0x292   : > { %3302 = verf.f32 %v736_v13  ;;  %v655_v13 = vadd.f32 %v3478_v15, %v654_v16 }
 0x293   : > { %3304 = verf.f32 %v737_v21  ;;  %v708_v21 = vmul.f32 0.5, %v650_v5 }
 0x295   : > { %1041 = vrot.lane.b32.xlu1 %v3716_v14, %s3380_s7 }
 0x299   : > { %1233 = vrot.lane.b32.xlu1 %v3716_v14, %s3381_s8 }
 0x29c   : > { %v3303_v7 = vpop.eup %3302 }
 0x29d   : > { %v800_v28 = vadd.f32 1.0, %v3303_v7  ;;  %v3305_v34 = vpop.eup %3304 }
 0x29e   : > { %v801_v23 = vadd.f32 1.0, %v3305_v34 }
 0x2a0   : > { %v833_v39 = vmul.f32 %v801_v23, %v705_v35  ;;  %v660_v23 = vadd.f32 %v3783_v12, %v3478_v15 }
 0x2a2   : > { %v3798_v26 = vmul.f32 %v3492_v32, %v833_v39  ;;  %v742_v39 = vmul.f32 0.70710677, %v660_v23 }
 0x2a4   : > { %1043 = vrot.lane.b32.xlu0 %v3723_v19, %s3380_s7  ;;  %v949_v59 = vsel %vm284_vm2, %v3798_v26, 0.0 }
 0x2a8   : > { %1235 = vrot.lane.b32.xlu0 %v3723_v19, %s3381_s8 }
 0x2bd   : > { %929 = vadd.xlane.f32.xlu1 %v928_v27  ;;  %v704_v27 = vmul.f32 0.5, %v630_v10 }
 0x2bf   : > { %v832_v61 = vmul.f32 %v800_v28, %v704_v27 }
 0x2c1   : > { %v3791_v31 = vmul.f32 %v3492_v32, %v832_v61  ;;  %v709_v61 = vmul.f32 0.5, %v655_v13 }
 0x2c3   : > { %v946_v45 = vsel %vm284_vm2, %v3791_v31, 0.0 }
 0x2c7   : > { %932 = vadd.xlane.f32.xlu0 %v931_v11  ;;  %v640_v11 = vadd.f32 %v3731_v22, %v3478_v15 }
 0x2c9   : > { %v738_v40 = vmul.f32 0.70710677, %v640_v11 }
 0x2cb   : > { %3306 = verf.f32 %v738_v40  ;;  %v665_v40 = vadd.f32 %v3478_v15, %v664_v44 }
 0x2cc   : > { %3308 = verf.f32 %v739_v47  ;;  %v710_v47 = vmul.f32 0.5, %v660_v23 }
 0x2cd   : > { %3310 = verf.f32 %v740_v6  ;;  %v670_v6 = vadd.f32 %v3806_v38, %v3478_v15 }
 0x2ce   : > { %1045 = vrot.lane.b32.xlu1 %v3744_v41, %s3380_s7 }
 0x2cf   : > { %v712_v23 = vmul.f32 0.5, %v670_v6 }
 0x2d2   : > { %1237 = vrot.lane.b32.xlu1 %v3744_v41, %s3381_s8 }
 0x2d5   : > { %v3307_v51 = vpop.eup %3306 }
 0x2d6   : > { %v802_v57 = vadd.f32 1.0, %v3307_v51  ;;  %v3309_v62 = vpop.eup %3308 }
 0x2d7   : > { %v803_v55 = vadd.f32 1.0, %v3309_v62  ;;  %v3311_v18 = vpop.eup %3310 }
 0x2d8   : > { %v804_v7 = vadd.f32 1.0, %v3311_v18 }
 0x2da   : > { %v836_v54 = vmul.f32 %v804_v7, %v708_v21 }
 0x2dc   : > { %v3837_v28 = vmul.f32 %v3492_v32, %v836_v54 }
 0x2dd   : > { %1047 = vrot.lane.b32.xlu0 %v3751_v29, %s3380_s7 }
 0x2de   : > { %5581 = vst [vmem:[#allocation3_spill] sm:$0xff] %v3837_v28 }
 0x2e1   : > { %1239 = vrot.lane.b32.xlu0 %v3751_v29, %s3381_s8 }
 0x2f6   : > { %935 = vadd.xlane.f32.xlu1 %v934_v56  ;;  %v706_v56 = vmul.f32 0.5, %v640_v11  ;;  %v958_v11 = vsel %vm284_vm2, %v3837_v28, 0.0 }
 0x2f8   : > { %v834_v22 = vmul.f32 %v802_v57, %v706_v56 }
 0x2fa   : > { %v3814_v60 = vmul.f32 %v3492_v32, %v834_v22  ;;  %v711_v22 = vmul.f32 0.5, %v665_v40 }
 0x2fc   : > { %v952_v10 = vsel %vm284_vm2, %v3814_v60, 0.0 }
 0x300   : > { %938 = vadd.xlane.f32.xlu0 %v937_v37  ;;  %v835_v37 = vmul.f32 %v803_v55, %v707_v0  ;;  %v3867_v55 = vpop.permute.xlu1 %1013 }
 0x302   : > { %v3821_v2 = vmul.f32 %v3492_v32, %v835_v37 }
 0x304   : > { %v955_v27 = vsel %vm284_vm2, %v3821_v2, 0.0  ;;  %v3871_v37 = vpop.permute.xlu1 %1205 }
 0x307   : > { %1049 = vrot.lane.b32.xlu1 %v3768_v3, %s3380_s7 }
 0x308   : > { %v3875_v5 = vpop.permute.xlu1 %1017 }
 0x30b   : > { %1241 = vrot.lane.b32.xlu1 %v3768_v3, %s3381_s8 }
 0x316   : > { %1051 = vrot.lane.b32.xlu0 %v3775_v53, %s3380_s7 }
 0x31a   : > { %1243 = vrot.lane.b32.xlu0 %v3775_v53, %s3381_s8 }
 0x320   : > { %v3829_v50 = vpop.f32.mrb[30].mxu0 }
 0x321   : > { %v674_v9 = vpop.f32.mrb[31].mxu0 }
 0x32f   : > { %941 = vadd.xlane.f32.xlu1 %v940_v17  ;;  %v741_v17 = vmul.f32 0.70710677, %v655_v13  ;;  %v744_v13 = vmul.f32 0.70710677, %v670_v6 }
 0x331   : > { %3312 = verf.f32 %v741_v17  ;;  %v3881_v17 = vpop.xlane.xlu0 %887 }
 0x332   : > { %3314 = verf.f32 %v742_v39  ;;  %5583 = vst [vmem:[#allocation5_spill] sm:$0xff] %v3881_v17 }
 0x335   : > { %v1012_v21 = vpop.permute.xlu0 %1011 }
 0x339   : > { %944 = vadd.xlane.f32.xlu0 %v943_v30 }
 0x33b   : > { %v3313_v30 = vpop.eup %3312 }
 0x33c   : > { %v805_v16 = vadd.f32 1.0, %v3313_v30  ;;  %v3315_v46 = vpop.eup %3314  ;;  %v3890_v30 = vpop.permute.xlu0 %1203 }
 0x33d   : > { %v806_v51 = vadd.f32 1.0, %v3315_v46 }
 0x33e   : > { %v837_v34 = vmul.f32 %v805_v16, %v709_v61 }
 0x33f   : > { %v838_v57 = vmul.f32 %v806_v51, %v710_v47 }
 0x340   : > { %1053 = vrot.lane.b32.xlu1 %v3791_v31, %s3380_s7  ;;  %v3844_v35 = vmul.f32 %v3492_v32, %v837_v34  ;;  %v3894_v34 = vpop.xlane.xlu0 %884 }
 0x341   : > { %v3858_v12 = vmul.f32 %v3492_v32, %v838_v57  ;;  %5585 = vst [vmem:[#allocation7_spill] sm:$0xff] %v3894_v34 }
 0x342   : > { %v961_v56 = vsel %vm284_vm2, %v3844_v35, 0.0 }
 0x343   : > { %5582 = vst [vmem:[#allocation4_spill] sm:$0xff] %v3858_v12  ;;  %v964_v7 = vsel %vm284_vm2, %v3858_v12, 0.0 }
 0x344   : > { %1245 = vrot.lane.b32.xlu1 %v3791_v31, %s3381_s8 }
 0x34f   : > { %1055 = vrot.lane.b32.xlu0 %v3798_v26, %s3380_s7 }
 0x353   : > { %1247 = vrot.lane.b32.xlu0 %v3798_v26, %s3381_s8 }
 0x368   : > { %947 = vadd.xlane.f32.xlu1 %v946_v45  ;;  %v743_v45 = vmul.f32 0.70710677, %v665_v40 }
 0x36a   : > { %3316 = verf.f32 %v743_v45 }
 0x36b   : > { %3318 = verf.f32 %v744_v13 }
 0x372   : > { %950 = vadd.xlane.f32.xlu0 %v949_v59 }
 0x374   : > { %v3317_v59 = vpop.eup %3316 }
 0x375   : > { %v807_v44 = vadd.f32 1.0, %v3317_v59  ;;  %v3319_v61 = vpop.eup %3318 }
 0x376   : > { %v808_v39 = vadd.f32 1.0, %v3319_v61 }
 0x377   : > { %v839_v62 = vmul.f32 %v807_v44, %v711_v22 }
 0x378   : > { %v840_v45 = vmul.f32 %v808_v39, %v712_v23 }
 0x379   : > { %1057 = vrot.lane.b32.xlu1 %v3814_v60, %s3380_s7  ;;  %v3865_v0 = vmul.f32 %v3492_v32, %v839_v62 }
 0x37a   : > { %v3903_v46 = vmul.f32 %v3492_v32, %v840_v45  ;;  %v680_v45 = vadd.f32 %v3829_v50, %v3478_v15 }
 0x37c   : > { %5587 = vst [vmem:[#allocation9_spill] sm:$0xff] %v3903_v46  ;;  %v714_v17 = vmul.f32 0.5, %v680_v45 }
 0x37d   : > { %1249 = vrot.lane.b32.xlu1 %v3814_v60, %s3381_s8 }
 0x388   : > { %1059 = vrot.lane.b32.xlu0 %v3821_v2, %s3380_s7 }
 0x38c   : > { %1251 = vrot.lane.b32.xlu0 %v3821_v2, %s3381_s8 }
 0x3a1   : > { %953 = vadd.xlane.f32.xlu1 %v952_v10  ;;  %v3879_v10 = vpop.permute.xlu1 %1209 }
 0x3a5   : > { %v3883_v18 = vpop.xlane.xlu1 %893 }
 0x3a6   : > { %5584 = vst [vmem:[#allocation6_spill] sm:$0xff] %v3883_v18 }
 0x3a9   : > { %v3888_v54 = vpop.permute.xlu1 %1015 }
 0x3ab   : > { %956 = vadd.xlane.f32.xlu0 %v955_v27  ;;  %v675_v27 = vadd.f32 %v3478_v15, %v674_v9  ;;  %v3900_v9 = vpop.permute.xlu0 %1019 }
 0x3ad   : > { %v745_v38 = vmul.f32 0.70710677, %v675_v27  ;;  %v3892_v16 = vpop.permute.xlu1 %1207  ;;  %v713_v57 = vmul.f32 0.5, %v675_v27 }
 0x3af   : > { %3320 = verf.f32 %v745_v38 }
 0x3b1   : > { %v3898_v40 = vpop.xlane.xlu1 %890 }
 0x3b2   : > { %1061 = vrot.lane.b32.xlu1 %v3837_v28, %s3380_s7  ;;  %5586 = vst [vmem:[#allocation8_spill] sm:$0xff] %v3898_v40 }
 0x3b5   : > { %v3905_v47 = vpop.permute.xlu1 %1021 }
 0x3b6   : > { %1253 = vrot.lane.b32.xlu1 %v3837_v28, %s3381_s8 }
 0x3b9   : > { %v3321_v51 = vpop.eup %3320  ;;  %v3915_v44 = vpop.permute.xlu1 %1213 }
 0x3ba   : > { %v809_v59 = vadd.f32 1.0, %v3321_v51 }
 0x3bc   : > { %v841_v62 = vmul.f32 %v809_v59, %v713_v57  ;;  %v746_v57 = vmul.f32 0.70710677, %v680_v45  ;;  %v1299_v45 = vsel %vm284_vm2, %v3890_v30, 0.0  ;;  %v1113_v30 = vsel %vm284_vm2, %v3888_v54, 0.0 }
 0x3bd   : > { %v3919_v13 = vpop.xlane.xlu1 %899 }
 0x3be   : > { %5589 = vst [vmem:[#allocation11_spill] sm:$0xff] %v3919_v13  ;;  %3322 = verf.f32 %v746_v57 }
 0x3c1   : > { %1063 = vrot.lane.b32.xlu0 %v3844_v35, %s3380_s7  ;;  %v3926_v61 = vpop.permute.xlu1 %1025 }
 0x3c5   : > { %1255 = vrot.lane.b32.xlu0 %v3844_v35, %s3381_s8  ;;  %v3934_v23 = vpop.permute.xlu1 %1217 }
 0x3c8   : > { %v3323_v15 = vpop.eup %3322 }
 0x3da   : > { %959 = vadd.xlane.f32.xlu1 %v958_v11  ;;  %v967_v11 = vsel %vm284_vm2, %v3865_v0, 0.0 }
 0x3e4   : > { %962 = vadd.xlane.f32.xlu0 %v961_v56  ;;  %v3907_v56 = vpop.permute.xlu0 %1211 }
 0x3e5   : > { %v1311_v54 = vsel %vm284_vm2, %v3907_v56, 0.0 }
 0x3e8   : > { %v3911_v22 = vpop.xlane.xlu0 %896 }
 0x3e9   : > { %5588 = vst [vmem:[#allocation10_spill] sm:$0xff] %v3911_v22  ;;  %v970_v22 = vsel %vm284_vm2, %v3903_v46, 0.0 }
 0x3eb   : > { %1065 = vrot.lane.b32.xlu1 %v3858_v12, %s3380_s7 }
 0x3ec   : > { %v3917_v6 = vpop.permute.xlu0 %1023 }
 0x3ef   : > { %1257 = vrot.lane.b32.xlu1 %v3858_v12, %s3381_s8 }
 0x3f0   : > { %v3924_v38 = vpop.permute.xlu0 %1215 }
 0x3f4   : > { %v3930_v27 = vpop.xlane.xlu0 %902 }
 0x3f5   : > { %5590 = vst [vmem:[#allocation12_spill] sm:$0xff] %v3930_v27 }
 0x3f8   : > { %v3936_v39 = vpop.permute.xlu0 %1027 }
 0x3f9   : > { %v1131_v56 = vsel %vm284_vm2, %v3936_v39, 0.0 }
 0x3fa   : > { %1067 = vrot.lane.b32.xlu0 %v3865_v0, %s3380_s7 }
 0x3fc   : > { %v3942_v51 = vpop.permute.xlu0 %1219 }
 0x3fe   : > { %1259 = vrot.lane.b32.xlu0 %v3865_v0, %s3381_s8 }
 0x413   : > { %965 = vadd.xlane.f32.xlu1 %v964_v7  ;;  %v3922_v7 = vmul.f32 %v3492_v32, %v841_v62  ;;  %v3946_v62 = vpop.xlane.xlu0 %908 }
 0x414   : > { %5592 = vst [vmem:[#allocation14_spill] sm:$0xff] %v3946_v62  ;;  %v810_v62 = vadd.f32 1.0, %v3323_v15 }
 0x415   : > { %v973_v57 = vsel %vm284_vm2, %v3922_v7, 0.0 }
 0x416   : > { %v842_v12 = vmul.f32 %v810_v62, %v714_v17  ;;  %v1308_v62 = vsel %vm284_vm2, %v3879_v10, 0.0 }
 0x417   : > { %v3948_v27 = vpop.permute.xlu0 %1031 }
 0x418   : > { %v1137_v39 = vsel %vm284_vm2, %v3948_v27, 0.0 }
 0x41b   : > { %v3956_v18 = vpop.permute.xlu0 %1223 }
 0x41d   : > { %968 = vadd.xlane.f32.xlu0 %v967_v11  ;;  %v3938_v11 = vpop.xlane.xlu1 %905 }
 0x41e   : > { %5591 = vst [vmem:[#allocation13_spill] sm:$0xff] %v3938_v11 }
 0x41f   : > { %v3958_v50 = vpop.xlane.xlu0 %914 }
 0x420   : > { %5594 = vst [vmem:[#allocation16_spill] sm:$0xff] %v3958_v50 }
 0x421   : > { %v3944_v59 = vpop.permute.xlu1 %1029 }
 0x423   : > { %v3964_v34 = vpop.permute.xlu0 %1035 }
 0x424   : > { %1069 = vrot.lane.b32.xlu1 %v3903_v46, %s3380_s7  ;;  %v1143_v27 = vsel %vm284_vm2, %v3964_v34, 0.0 }
 0x425   : > { %v3950_v13 = vpop.permute.xlu1 %1221 }
 0x427   : > { %v3972_v50 = vpop.permute.xlu0 %1227 }
 0x428   : > { %1261 = vrot.lane.b32.xlu1 %v3903_v46, %s3381_s8 }
 0x429   : > { %v3954_v11 = vpop.xlane.xlu1 %911 }
 0x42a   : > { %5593 = vst [vmem:[#allocation15_spill] sm:$0xff] %v3954_v11  ;;  %v3970_v11 = vmul.f32 %v3492_v32, %v842_v12  ;;  %v1116_v32 = vsel %vm284_vm2, %v3875_v5, 0.0  ;;  %v1305_v5 = vsel %vm284_vm2, %v3892_v16, 0.0  ;;  %v1125_v16 = vsel %vm284_vm2, %v3917_v6, 0.0 }
 0x42b   : > { %v3980_v17 = vpop.xlane.xlu0 %920  ;;  %v1323_v6 = vsel %vm284_vm2, %v3942_v51, 0.0  ;;  %v1329_v51 = vsel %vm284_vm2, %v3956_v18, 0.0  ;;  %v1335_v18 = vsel %vm284_vm2, %v3972_v50, 0.0 }
 0x42c   : > { %5596 = vst [vmem:[#allocation18_spill] sm:$0xff] %v3980_v17 }
 0x42d   : > { %v3960_v40 = vpop.permute.xlu1 %1033 }
 0x431   : > { %v3966_v46 = vpop.permute.xlu1 %1225 }
 0x433   : > { %1071 = vrot.lane.b32.xlu0 %v3922_v7, %s3380_s7 }
 0x435   : > { %v3974_v28 = vpop.xlane.xlu1 %917 }
 0x436   : > { %5595 = vst [vmem:[#allocation17_spill] sm:$0xff] %v3974_v28 }
 0x437   : > { %1263 = vrot.lane.b32.xlu0 %v3922_v7, %s3381_s8 }
 0x439   : > { %v3986_v12 = vpop.permute.xlu1 %1037 }
 0x43d   : > { %v3990_v15 = vpop.permute.xlu1 %1229 }
 0x44c   : > { %971 = vadd.xlane.f32.xlu1 %v970_v22  ;;  %v1107_v22 = vsel %vm284_vm2, %v1012_v21, 0.0  ;;  %v1040_v21 = vpop.permute.xlu0 %1039 }
 0x44d   : > { %v1149_v34 = vsel %vm284_vm2, %v1040_v21, 0.0 }
 0x456   : > { %974 = vadd.xlane.f32.xlu0 %v973_v57  ;;  %v1232_v57 = vpop.permute.xlu0 %1231 }
 0x457   : > { %v1341_v50 = vsel %vm284_vm2, %v1232_v57, 0.0  ;;  %v1140_v57 = vsel %vm284_vm2, %v3960_v40, 0.0 }
 0x45a   : > { %1108 = vadd.xlane.f32.xlu0 %v1107_v22  ;;  %v3994_v22 = vpop.xlane.xlu1 %923 }
 0x45b   : > { %5597 = vst [vmem:[#allocation19_spill] sm:$0xff] %v3994_v22  ;;  %v976_v22 = vsel %vm284_vm2, %v3970_v11, 0.0 }
 0x45d   : > { %1073 = vrot.lane.b32.xlu1 %v3970_v11, %s3380_s7 }
 0x45e   : > { %1300 = vadd.xlane.f32.xlu0 %v1299_v45  ;;  %v3998_v45 = vpop.xlane.xlu0 %926 }
 0x45f   : > { %5598 = vst [vmem:[#allocation20_spill] sm:$0xff] %v3998_v45 }
 0x461   : > { %1265 = vrot.lane.b32.xlu1 %v3970_v11, %s3381_s8 }
 0x462   : > { %1117 = vadd.xlane.f32.xlu0 %v1116_v32  ;;  %v1119_v32 = vsel %vm284_vm2, %v3900_v9, 0.0  ;;  %v1044_v10 = vpop.permute.xlu0 %1043  ;;  %v1317_v9 = vsel %vm284_vm2, %v3924_v38, 0.0  ;;  %v1110_v38 = vsel %vm284_vm2, %v3867_v55, 0.0  ;;  %v1122_v55 = vsel %vm284_vm2, %v3905_v47, 0.0 }
 0x463   : > { %v1128_v47 = vsel %vm284_vm2, %v3926_v61, 0.0  ;;  %v1155_v61 = vsel %vm284_vm2, %v1044_v10, 0.0 }
 0x466   : > { %1309 = vadd.xlane.f32.xlu0 %v1308_v62  ;;  %v4002_v62 = vpop.permute.xlu1 %1041 }
 0x46a   : > { %1114 = vadd.xlane.f32.xlu0 %v1113_v30  ;;  %v1236_v30 = vpop.permute.xlu0 %1235  ;;  %v4006_v17 = vpop.permute.xlu1 %1233 }
 0x46e   : > { %1306 = vadd.xlane.f32.xlu0 %v1305_v5  ;;  %v4010_v45 = vpop.xlane.xlu0 %932  ;;  %v4012_v5 = vpop.xlane.xlu1 %929 }
 0x46f   : > { %5599 = vst [vmem:[#allocation21_spill] sm:$0xff] %v4012_v5 }
 0x472   : > { %1120 = vadd.xlane.f32.xlu0 %v1119_v32  ;;  %v1048_v32 = vpop.permute.xlu0 %1047 }
 0x473   : > { %v1161_v10 = vsel %vm284_vm2, %v1048_v32, 0.0 }
 0x476   : > { %1312 = vadd.xlane.f32.xlu0 %v1311_v54  ;;  %v4018_v54 = vpop.permute.xlu1 %1045 }
 0x47a   : > { %1126 = vadd.xlane.f32.xlu0 %v1125_v16  ;;  %v1240_v16 = vpop.permute.xlu0 %1239 }
 0x47e   : > { %1318 = vadd.xlane.f32.xlu0 %v1317_v9  ;;  %v4026_v9 = vpop.permute.xlu1 %1237 }
 0x482   : > { %1132 = vadd.xlane.f32.xlu0 %v1131_v56  ;;  %v4030_v56 = vpop.xlane.xlu0 %938  ;;  %v4034_v5 = vpop.xlane.xlu1 %935 }
 0x483   : > { %5600 = vst [vmem:[#allocation22_spill] sm:$0xff] %v4030_v56 }
 0x485   : > { %977 = vadd.xlane.f32.xlu1 %v976_v22  ;;  %v1302_v22 = vsel %vm284_vm2, %v3871_v37, 0.0  ;;  %v1314_v37 = vsel %vm284_vm2, %v3915_v44, 0.0  ;;  %v1320_v44 = vsel %vm284_vm2, %v3934_v23, 0.0  ;;  %v1347_v23 = vsel %vm284_vm2, %v1236_v30, 0.0 }
 0x486   : > { %1324 = vadd.xlane.f32.xlu0 %v1323_v6  ;;  %v1052_v6 = vpop.permute.xlu0 %1051 }
 0x487   : > { %v1167_v40 = vsel %vm284_vm2, %v1052_v6, 0.0  ;;  %v1344_v6 = vsel %vm284_vm2, %v4006_v17, 0.0  ;;  %v1350_v17 = vsel %vm284_vm2, %v4026_v9, 0.0 }
 0x489   : > { %1111 = vadd.xlane.f32.xlu1 %v1110_v38  ;;  %v4042_v38 = vpop.permute.xlu1 %1049 }
 0x48a   : > { %1138 = vadd.xlane.f32.xlu0 %v1137_v39  ;;  %v1244_v39 = vpop.permute.xlu0 %1243 }
 0x48d   : > { %1303 = vadd.xlane.f32.xlu1 %v1302_v22 }
 0x48e   : > { %1330 = vadd.xlane.f32.xlu0 %v1329_v51  ;;  %v4048_v22 = vpop.xlane.xlu0 %944  ;;  %v4052_v51 = vpop.permute.xlu1 %1241 }
 0x48f   : > { %5601 = vst [vmem:[#allocation23_spill] sm:$0xff] %v4048_v22 }
 0x491   : > { %1123 = vadd.xlane.f32.xlu1 %v1122_v55 }
 0x492   : > { %1144 = vadd.xlane.f32.xlu0 %v1143_v27  ;;  %v1056_v55 = vpop.permute.xlu0 %1055  ;;  %v4057_v27 = vpop.xlane.xlu1 %941 }
 0x493   : > { %5602 = vst [vmem:[#allocation24_spill] sm:$0xff] %v4057_v27 }
 0x495   : > { %1315 = vadd.xlane.f32.xlu1 %v1314_v37  ;;  %v1134_v37 = vsel %vm284_vm2, %v3944_v59, 0.0 }
 0x496   : > { %1336 = vadd.xlane.f32.xlu0 %v1335_v18  ;;  %v1248_v18 = vpop.permute.xlu0 %1247  ;;  %v4063_v21 = vpop.permute.xlu1 %1053 }
 0x499   : > { %1129 = vadd.xlane.f32.xlu1 %v1128_v47  ;;  %v1326_v47 = vsel %vm284_vm2, %v3950_v13, 0.0  ;;  %v1353_v13 = vsel %vm284_vm2, %v1240_v16, 0.0 }
 0x49a   : > { %1150 = vadd.xlane.f32.xlu0 %v1149_v34  ;;  %v4068_v34 = vpop.xlane.xlu0 %950  ;;  %v1246_v59 = vpop.permute.xlu1 %1245 }
 0x49b   : > { %5603 = vst [vmem:[#allocation25_spill] sm:$0xff] %v4068_v34 }
 0x49d   : > { %1321 = vadd.xlane.f32.xlu1 %v1320_v44 }
 0x49e   : > { %1342 = vadd.xlane.f32.xlu0 %v1341_v50  ;;  %v1060_v44 = vpop.permute.xlu0 %1059  ;;  %v1332_v50 = vsel %vm284_vm2, %v3966_v46, 0.0  ;;  %v1338_v46 = vsel %vm284_vm2, %v3990_v15, 0.0  ;;  %v1365_v15 = vsel %vm284_vm2, %v1248_v18, 0.0  ;;  %v1164_v18 = vsel %vm284_vm2, %v4042_v38, 0.0 }
 0x49f   : > { %v1170_v38 = vsel %vm284_vm2, %v4063_v21, 0.0 }
 0x4a1   : > { %1135 = vadd.xlane.f32.xlu1 %v1134_v37  ;;  %v4075_v37 = vpop.xlane.xlu1 %947 }
 0x4a2   : > { %1156 = vadd.xlane.f32.xlu0 %v1155_v61  ;;  %5604 = vst [vmem:[#allocation26_spill] sm:$0xff] %v4075_v37  ;;  %v1252_v30 = vpop.permute.xlu0 %1251  ;;  %v1146_v61 = vsel %vm284_vm2, %v3986_v12, 0.0  ;;  %v1173_v12 = vsel %vm284_vm2, %v1056_v55, 0.0 }
 0x4a5   : > { %1327 = vadd.xlane.f32.xlu1 %v1326_v47  ;;  %v1058_v32 = vpop.permute.xlu1 %1057 }
 0x4a6   : > { %1348 = vadd.xlane.f32.xlu0 %v1347_v23  ;;  %v4081_v47 = vpop.xlane.xlu0 %956  ;;  %v1359_v23 = vsel %vm284_vm2, %v1244_v39, 0.0  ;;  %v1158_v39 = vsel %vm284_vm2, %v4018_v54, 0.0 }
 0x4a7   : > { %5605 = vst [vmem:[#allocation27_spill] sm:$0xff] %v4081_v47  ;;  %v5644_v47 = vld [vmem:[#allocation4_spill] sm:$0xff] }
 0x4a9   : > { %1141 = vadd.xlane.f32.xlu1 %v1140_v57  ;;  %v1152_v57 = vsel %vm284_vm2, %v4002_v62, 0.0  ;;  %v1179_v62 = vsel %vm284_vm2, %v1060_v44, 0.0 }
 0x4aa   : > { %1162 = vadd.xlane.f32.xlu0 %v1161_v10  ;;  %v1064_v16 = vpop.permute.xlu0 %1063  ;;  %v1250_v10 = vpop.permute.xlu1 %1249 }
 0x4ab   : > { %v1185_v54 = vsel %vm284_vm2, %v1064_v16, 0.0  ;;  %v1368_v21 = vsel %vm284_vm2, %v1250_v10, 0.0 }
 0x4ad   : > { %1333 = vadd.xlane.f32.xlu1 %v1332_v50 }
 0x4ae   : > { %1354 = vadd.xlane.f32.xlu0 %v1353_v13  ;;  %v4091_v50 = vpop.xlane.xlu1 %953  ;;  %v1256_v13 = vpop.permute.xlu0 %1255 }
 0x4af   : > { %5606 = vst [vmem:[#allocation28_spill] sm:$0xff] %v4091_v50  ;;  %v1377_v9 = vsel %vm284_vm2, %v1256_v13, 0.0  ;;  %v1176_v13 = vsel %vm284_vm2, %v1058_v32, 0.0 }
 0x4b1   : > { %1147 = vadd.xlane.f32.xlu1 %v1146_v61 }
 0x4b2   : > { %1168 = vadd.xlane.f32.xlu0 %v1167_v40  ;;  %v4097_v61 = vpop.xlane.xlu0 %962  ;;  %v1062_v55 = vpop.permute.xlu1 %1061  ;;  %v1371_v40 = vsel %vm284_vm2, %v1252_v30, 0.0 }
 0x4b3   : > { %5607 = vst [vmem:[#allocation29_spill] sm:$0xff] %v4097_v61 }
 0x4b5   : > { %1339 = vadd.xlane.f32.xlu1 %v1338_v46 }
 0x4b6   : > { %1360 = vadd.xlane.f32.xlu0 %v1359_v23  ;;  %v1068_v46 = vpop.permute.xlu0 %1067  ;;  %v1254_v23 = vpop.permute.xlu1 %1253 }
 0x4b7   : > { %v1374_v32 = vsel %vm284_vm2, %v1254_v23, 0.0 }
 0x4b9   : > { %1153 = vadd.xlane.f32.xlu1 %v1152_v57  ;;  %v1356_v57 = vsel %vm284_vm2, %v4052_v51, 0.0 }
 0x4ba   : > { %1174 = vadd.xlane.f32.xlu0 %v1173_v12  ;;  %v1260_v44 = vpop.permute.xlu0 %1259  ;;  %v4107_v12 = vpop.xlane.xlu1 %959 }
 0x4bb   : > { %5608 = vst [vmem:[#allocation30_spill] sm:$0xff] %v4107_v12  ;;  %v1383_v51 = vsel %vm284_vm2, %v1260_v44, 0.0 }
 0x4bd   : > { %1345 = vadd.xlane.f32.xlu1 %v1344_v6  ;;  %v1191_v6 = vsel %vm284_vm2, %v1068_v46, 0.0 }
 0x4be   : > { %1366 = vadd.xlane.f32.xlu0 %v1365_v15  ;;  %v4110_v30 = vpop.xlane.xlu0 %968  ;;  %v1066_v16 = vpop.permute.xlu1 %1065 }
 0x4bf   : > { %5609 = vst [vmem:[#allocation31_spill] sm:$0xff] %v4110_v30 }
 0x4c1   : > { %1159 = vadd.xlane.f32.xlu1 %v1158_v39  ;;  %v1362_v39 = vsel %vm284_vm2, %v1246_v59, 0.0  ;;  %v1182_v59 = vsel %vm284_vm2, %v1062_v55, 0.0 }
 0x4c2   : > { %1180 = vadd.xlane.f32.xlu0 %v1179_v62  ;;  %v1072_v15 = vpop.permute.xlu0 %1071  ;;  %v1258_v62 = vpop.permute.xlu1 %1257 }
 0x4c5   : > { %1351 = vadd.xlane.f32.xlu1 %v1350_v17  ;;  %v1197_v17 = vsel %vm284_vm2, %v1072_v15, 0.0 }
 0x4c6   : > { %1372 = vadd.xlane.f32.xlu0 %v1371_v40  ;;  %v1264_v40 = vpop.permute.xlu0 %1263  ;;  %v4120_v46 = vpop.xlane.xlu1 %965 }
 0x4c7   : > { %5610 = vst [vmem:[#allocation32_spill] sm:$0xff] %v4120_v46 }
 0x4c9   : > { %1165 = vadd.xlane.f32.xlu1 %v1164_v18  ;;  %v1389_v18 = vsel %vm284_vm2, %v1264_v40, 0.0 }
 0x4ca   : > { %1186 = vadd.xlane.f32.xlu0 %v1185_v54  ;;  %v1070_v54 = vpop.permute.xlu1 %1069 }
 0x4cd   : > { %1357 = vadd.xlane.f32.xlu1 %v1356_v57 }
 0x4ce   : > { %1378 = vadd.xlane.f32.xlu0 %v1377_v9  ;;  %v1188_v9 = vsel %vm284_vm2, %v1066_v16, 0.0  ;;  %v1262_v10 = vpop.permute.xlu1 %1261 }
 0x4cf   : > { %v1386_v16 = vsel %vm284_vm2, %v1262_v10, 0.0 }
 0x4d1   : > { %1171 = vadd.xlane.f32.xlu1 %v1170_v38 }
 0x4d2   : > { %1192 = vadd.xlane.f32.xlu0 %v1191_v6  ;;  %v1380_v6 = vsel %vm284_vm2, %v1258_v62, 0.0 }
 0x4d5   : > { %1363 = vadd.xlane.f32.xlu1 %v1362_v39  ;;  %v1194_v39 = vsel %vm284_vm2, %v1070_v54, 0.0 }
 0x4d6   : > { %1384 = vadd.xlane.f32.xlu0 %v1383_v51 }
 0x4d9   : > { %1177 = vadd.xlane.f32.xlu1 %v1176_v13  ;;  %v4133_v15 = vpop.xlane.xlu1 %971 }
 0x4da   : > { %1198 = vadd.xlane.f32.xlu0 %v1197_v17  ;;  %5612 = vst [vmem:[#allocation34_spill] sm:$0xff] %v4133_v15 }
 0x4dd   : > { %1369 = vadd.xlane.f32.xlu1 %v1368_v21  ;;  %v1074_v23 = vpop.permute.xlu1 %1073 }
 0x4de   : > { %1390 = vadd.xlane.f32.xlu0 %v1389_v18  ;;  %v1200_v62 = vsel %vm284_vm2, %v1074_v23, 0.0 }
 0x4e1   : > { %1183 = vadd.xlane.f32.xlu1 %v1182_v59  ;;  %v1266_v17 = vpop.permute.xlu1 %1265 }
 0x4e2   : > { %v1392_v21 = vsel %vm284_vm2, %v1266_v17, 0.0 }
 0x4e3   : > { %v4124_v44 = vpop.xlane.xlu0 %974 }
 0x4e4   : > { %5611 = vst [vmem:[#allocation33_spill] sm:$0xff] %v4124_v44 }
 0x4e5   : > { %1375 = vadd.xlane.f32.xlu1 %v1374_v32 }
 0x4e7   : > { %v4127_v57 = vpop.xlane.xlu0 %1108 }
 0x4e9   : > { %1189 = vadd.xlane.f32.xlu1 %v1188_v9 }
 0x4eb   : > { %v4130_v38 = vpop.xlane.xlu0 %1300 }
 0x4ed   : > { %1381 = vadd.xlane.f32.xlu1 %v1380_v6 }
 0x4ef   : > { %v4135_v55 = vpop.xlane.xlu0 %1117 }
 0x4f0   : > { %5613 = vst [vmem:[#allocation35_spill] sm:$0xff] %v4135_v55 }
 0x4f1   : > { %1195 = vadd.xlane.f32.xlu1 %v1194_v39 }
 0x4f3   : > { %v4138_v51 = vpop.xlane.xlu0 %1309 }
 0x4f4   : > { %5614 = vst [vmem:[#allocation36_spill] sm:$0xff] %v4138_v51  ;;  %1395 = vrot.lane.b32.xlu0 %v3515_v48, %s3382_s9 }
 0x4f5   : > { %1387 = vadd.xlane.f32.xlu1 %v1386_v16 }
 0x4f7   : > { %v4143_v13 = vpop.xlane.xlu0 %1114 }
 0x4f8   : > { %5615 = vst [vmem:[#allocation37_spill] sm:$0xff] %v4143_v13  ;;  %1403 = vrot.lane.b32.xlu0 %v3543_v4, %s3382_s9 }
 0x4f9   : > { %1201 = vadd.xlane.f32.xlu1 %v1200_v62 }
 0x4fb   : > { %v4148_v40 = vpop.xlane.xlu0 %1306 }
 0x4fc   : > { %5616 = vst [vmem:[#allocation38_spill] sm:$0xff] %v4148_v40  ;;  %1407 = vrot.lane.b32.xlu0 %v3573_v25, %s3382_s9 }
 0x4fd   : > { %1393 = vadd.xlane.f32.xlu1 %v1392_v21 }
 0x4ff   : > { %v4153_v18 = vpop.xlane.xlu0 %1120 }
 0x500   : > { %5617 = vst [vmem:[#allocation39_spill] sm:$0xff] %v4153_v18  ;;  %1411 = vrot.lane.b32.xlu0 %v3603_v49, %s3382_s9 }
 0x503   : > { %v4157_v59 = vpop.xlane.xlu0 %1312 }
 0x504   : > { %5618 = vst [vmem:[#allocation40_spill] sm:$0xff] %v4157_v59  ;;  %1415 = vrot.lane.b32.xlu0 %v3633_v8, %s3382_s9 }
 0x507   : > { %v4161_v54 = vpop.xlane.xlu0 %1126 }
 0x508   : > { %5619 = vst [vmem:[#allocation41_spill] sm:$0xff] %v4161_v54  ;;  %1419 = vrot.lane.b32.xlu0 %v3663_v33, %s3382_s9 }
 0x50b   : > { %v4165_v32 = vpop.xlane.xlu0 %1318 }
 0x50c   : > { %5620 = vst [vmem:[#allocation42_spill] sm:$0xff] %v4165_v32  ;;  %1423 = vrot.lane.b32.xlu0 %v3693_v58, %s3382_s9 }
 0x50e   : > { %1397 = vrot.lane.b32.xlu1 %v3495_v36, %s3382_s9 }
 0x50f   : > { %v4171_v9 = vpop.xlane.xlu0 %1132 }
 0x510   : > { %5621 = vst [vmem:[#allocation43_spill] sm:$0xff] %v4171_v9  ;;  %1427 = vrot.lane.b32.xlu0 %v3723_v19, %s3382_s9 }
 0x512   : > { %1399 = vrot.lane.b32.xlu1 %v3536_v63, %s3382_s9  ;;  %v4177_v10 = vpop.xlane.xlu1 %977 }
 0x513   : > { %5622 = vst [vmem:[#allocation44_spill] sm:$0xff] %v4177_v10  ;;  %v4179_v6 = vpop.xlane.xlu0 %1324 }
 0x514   : > { %5623 = vst [vmem:[#allocation45_spill] sm:$0xff] %v4179_v6  ;;  %1431 = vrot.lane.b32.xlu0 %v3751_v29, %s3382_s9  ;;  %v5641_v6 = vld [vmem:[#allocation3_spill] sm:$0xff] }
 0x516   : > { %1401 = vrot.lane.b32.xlu1 %v3508_v43, %s3382_s9  ;;  %v4185_v39 = vpop.xlane.xlu1 %1111 }
 0x517   : > { %v4187_v23 = vpop.xlane.xlu0 %1138 }
 0x518   : > { %5624 = vst [vmem:[#allocation46_spill] sm:$0xff] %v4187_v23  ;;  %1435 = vrot.lane.b32.xlu0 %v3775_v53, %s3382_s9 }
 0x51a   : > { %1405 = vrot.lane.b32.xlu1 %v3566_v20, %s3382_s9  ;;  %v4193_v16 = vpop.xlane.xlu1 %1303 }
 0x51b   : > { %v4195_v62 = vpop.xlane.xlu0 %1330 }
 0x51c   : > { %5625 = vst [vmem:[#allocation47_spill] sm:$0xff] %v4195_v62  ;;  %1439 = vrot.lane.b32.xlu0 %v3798_v26, %s3382_s9 }
 0x51e   : > { %1409 = vrot.lane.b32.xlu1 %v3596_v42, %s3382_s9  ;;  %v4201_v17 = vpop.xlane.xlu1 %1123 }
 0x51f   : > { %5626 = vst [vmem:[#allocation48_spill] sm:$0xff] %v4201_v17  ;;  %v4203_v21 = vpop.xlane.xlu0 %1144 }
 0x520   : > { %5627 = vst [vmem:[#allocation49_spill] sm:$0xff] %v4203_v21  ;;  %1443 = vrot.lane.b32.xlu0 %v3821_v2, %s3382_s9 }
 0x522   : > { %1413 = vrot.lane.b32.xlu1 %v3626_v1, %s3382_s9  ;;  %v4209_v10 = vpop.xlane.xlu1 %1315 }
 0x523   : > { %5628 = vst [vmem:[#allocation50_spill] sm:$0xff] %v4209_v10  ;;  %v4211_v44 = vpop.xlane.xlu0 %1336 }
 0x524   : > { %5629 = vst [vmem:[#allocation51_spill] sm:$0xff] %v4211_v44  ;;  %1447 = vrot.lane.b32.xlu0 %v3844_v35, %s3382_s9 }
 0x526   : > { %1417 = vrot.lane.b32.xlu1 %v3656_v24, %s3382_s9  ;;  %v4217_v15 = vpop.xlane.xlu1 %1129 }
 0x527   : > { %5630 = vst [vmem:[#allocation52_spill] sm:$0xff] %v4217_v15  ;;  %v4219_v30 = vpop.xlane.xlu0 %1150  ;;  %v5647_v15 = vld [vmem:[#allocation9_spill] sm:$0xff] }
 0x528   : > { %5631 = vst [vmem:[#allocation53_spill] sm:$0xff] %v4219_v30  ;;  %1451 = vrot.lane.b32.xlu0 %v3865_v0, %s3382_s9 }
 0x52a   : > { %1421 = vrot.lane.b32.xlu1 %v3686_v52, %s3382_s9  ;;  %v4225_v21 = vpop.xlane.xlu1 %1321 }
 0x52b   : > { %5632 = vst [vmem:[#allocation54_spill] sm:$0xff] %v4225_v21  ;;  %v4227_v28 = vpop.xlane.xlu0 %1342 }
 0x52c   : > { %5633 = vst [vmem:[#allocation55_spill] sm:$0xff] %v4227_v28  ;;  %1455 = vrot.lane.b32.xlu0 %v3922_v7, %s3382_s9 }
 0x52e   : > { %1425 = vrot.lane.b32.xlu1 %v3716_v14, %s3382_s9  ;;  %v4233_v44 = vpop.xlane.xlu1 %1135 }
 0x52f   : > { %5634 = vst [vmem:[#allocation56_spill] sm:$0xff] %v4233_v44  ;;  %v4235_v46 = vpop.xlane.xlu0 %1156 }
 0x532   : > { %1429 = vrot.lane.b32.xlu1 %v3744_v41, %s3382_s9  ;;  %v4239_v30 = vpop.xlane.xlu1 %1327 }
 0x533   : > { %5635 = vst [vmem:[#allocation57_spill] sm:$0xff] %v4239_v30  ;;  %v4241_v62 = vpop.xlane.xlu0 %1348 }
 0x536   : > { %1433 = vrot.lane.b32.xlu1 %v3768_v3, %s3382_s9  ;;  %v4245_v28 = vpop.xlane.xlu1 %1141 }
 0x537   : > { %5636 = vst [vmem:[#allocation58_spill] sm:$0xff] %v4245_v28  ;;  %v4247_v23 = vpop.xlane.xlu0 %1162 }
 0x53a   : > { %1437 = vrot.lane.b32.xlu1 %v3791_v31, %s3382_s9  ;;  %v4251_v61 = vpop.xlane.xlu1 %1333 }
 0x53b   : > { %5637 = vst [vmem:[#allocation59_spill] sm:$0xff] %v4251_v61  ;;  %v4253_v44 = vpop.xlane.xlu0 %1354 }
 0x53c   : > { %5638 = vst [vmem:[#allocation60_spill] sm:$0xff] %v4253_v44 }
 0x53e   : > { %1441 = vrot.lane.b32.xlu1 %v3814_v60, %s3382_s9  ;;  %v4257_v30 = vpop.xlane.xlu1 %1147 }
 0x53f   : > { %5639 = vst [vmem:[#allocation61_spill] sm:$0xff] %v4257_v30  ;;  %v4259_v12 = vpop.xlane.xlu0 %1168 }
 0x540   : > { %5640 = vst [vmem:[#allocation62_spill] sm:$0xff] %v4259_v12 }
 0x542   : > { %1445 = vrot.lane.b32.xlu1 %v5641_v6, %s3382_s9  ;;  %v4263_v28 = vpop.xlane.xlu1 %1339 }
 0x543   : > { %5642 = vst [vmem:[#allocation3_spill] sm:$0xff] %v4263_v28  ;;  %v4265_v9 = vpop.xlane.xlu0 %1360 }
 0x544   : > { %5643 = vst [vmem:[#allocation63_spill] sm:$0xff] %v4265_v9 }
 0x546   : > { %1449 = vrot.lane.b32.xlu1 %v5644_v47, %s3382_s9  ;;  %v4269_v61 = vpop.xlane.xlu1 %1153 }
 0x547   : > { %5645 = vst [vmem:[#allocation4_spill] sm:$0xff] %v4269_v61  ;;  %v4271_v21 = vpop.xlane.xlu0 %1174 }
 0x548   : > { %5646 = vst [vmem:[#allocation64_spill] sm:$0xff] %v4271_v21 }
 0x54a   : > { %1453 = vrot.lane.b32.xlu1 %v5647_v15, %s3382_s9  ;;  %v4275_v30 = vpop.xlane.xlu1 %1345 }
 0x54b   : > { %5648 = vst [vmem:[#allocation9_spill] sm:$0xff] %v4275_v30  ;;  %v4277_v50 = vpop.xlane.xlu0 %1366 }
 0x54c   : > { %5649 = vst [vmem:[#allocation65_spill] sm:$0xff] %v4277_v50 }
 0x54e   : > { %1457 = vrot.lane.b32.xlu1 %v3970_v11, %s3382_s9  ;;  %v4281_v28 = vpop.xlane.xlu1 %1159 }
 0x54f   : > { %v4283_v32 = vpop.xlane.xlu0 %1180 }
 0x550   : > { %5650 = vst [vmem:[#allocation66_spill] sm:$0xff] %v4283_v32 }
 0x552   : > { %v4285_v54 = vpop.xlane.xlu1 %1351 }
 0x553   : > { %v4287_v34 = vpop.xlane.xlu0 %1372 }
 0x554   : > { %5651 = vst [vmem:[#allocation67_spill] sm:$0xff] %v4287_v34 }
 0x556   : > { %v4289_v61 = vpop.xlane.xlu1 %1165 }
 0x557   : > { %5652 = vst [vmem:[#allocation68_spill] sm:$0xff] %v4289_v61  ;;  %v4291_v21 = vpop.xlane.xlu0 %1186 }
 0x558   : > { %5653 = vst [vmem:[#allocation69_spill] sm:$0xff] %v4291_v21 }
 0x55a   : > { %v4293_v10 = vpop.xlane.xlu1 %1357 }
 0x55b   : > { %5654 = vst [vmem:[#allocation70_spill] sm:$0xff] %v4293_v10  ;;  %v4295_v30 = vpop.xlane.xlu0 %1378 }
 0x55c   : > { %5655 = vst [vmem:[#allocation71_spill] sm:$0xff] %v4295_v30 }
 0x55e   : > { %v4297_v50 = vpop.xlane.xlu1 %1171 }
 0x55f   : > { %5656 = vst [vmem:[#allocation72_spill] sm:$0xff] %v4297_v50  ;;  %v4299_v17 = vpop.xlane.xlu0 %1192 }
 0x560   : > { %5657 = vst [vmem:[#allocation73_spill] sm:$0xff] %v4299_v17 }
 0x562   : > { %v4301_v37 = vpop.xlane.xlu1 %1363 }
 0x563   : > { %5658 = vst [vmem:[#allocation74_spill] sm:$0xff] %v4301_v37  ;;  %v4303_v59 = vpop.xlane.xlu0 %1384 }
 0x564   : > { %5659 = vst [vmem:[#allocation75_spill] sm:$0xff] %v4303_v59 }
 0x566   : > { %v4305_v32 = vpop.xlane.xlu1 %1177 }
 0x567   : > { %5660 = vst [vmem:[#allocation76_spill] sm:$0xff] %v4305_v32  ;;  %v4307_v18 = vpop.xlane.xlu0 %1198 }
 0x568   : > { %5661 = vst [vmem:[#allocation77_spill] sm:$0xff] %v4307_v18 }
 0x56a   : > { %v4309_v34 = vpop.xlane.xlu1 %1369 }
 0x56b   : > { %5662 = vst [vmem:[#allocation78_spill] sm:$0xff] %v4309_v34  ;;  %v4311_v9 = vpop.xlane.xlu0 %1390 }
 0x56c   : > { %5663 = vst [vmem:[#allocation79_spill] sm:$0xff] %v4311_v9 }
 0x56e   : > { %v4313_v21 = vpop.xlane.xlu1 %1183 }
 0x56f   : > { %5664 = vst [vmem:[#allocation80_spill] sm:$0xff] %v4313_v21  ;;  %v1396_v22 = vpop.permute.xlu0 %1395 }
 0x570   : > { %v1491_v30 = vsel %vm284_vm2, %v1396_v22, 0.0 }
 0x571   : > { %1492 = vadd.xlane.f32.xlu0 %v1491_v30 }
 0x572   : > { %v4316_v50 = vpop.xlane.xlu1 %1375 }
 0x573   : > { %5665 = vst [vmem:[#allocation81_spill] sm:$0xff] %v4316_v50  ;;  %v1404_v59 = vpop.permute.xlu0 %1403 }
 0x574   : > { %v1503_v10 = vsel %vm284_vm2, %v1404_v59, 0.0 }
 0x576   : > { %v4318_v17 = vpop.xlane.xlu1 %1189 }
 0x577   : > { %5666 = vst [vmem:[#allocation82_spill] sm:$0xff] %v4318_v17  ;;  %v1408_v34 = vpop.permute.xlu0 %1407 }
 0x578   : > { %v1509_v27 = vsel %vm284_vm2, %v1408_v34, 0.0 }
 0x57a   : > { %v4320_v37 = vpop.xlane.xlu1 %1381 }
 0x57b   : > { %5667 = vst [vmem:[#allocation83_spill] sm:$0xff] %v4320_v37  ;;  %v1412_v9 = vpop.permute.xlu0 %1411 }
 0x57e   : > { %v4322_v32 = vpop.xlane.xlu1 %1195 }
 0x57f   : > { %5668 = vst [vmem:[#allocation84_spill] sm:$0xff] %v4322_v32  ;;  %v1416_v30 = vpop.permute.xlu0 %1415 }
 0x582   : > { %v4324_v18 = vpop.xlane.xlu1 %1387 }
 0x583   : > { %5669 = vst [vmem:[#allocation85_spill] sm:$0xff] %v4324_v18  ;;  %v1420_v37 = vpop.permute.xlu0 %1419 }
 0x586   : > { %v4326_v12 = vpop.xlane.xlu1 %1201 }
 0x587   : > { %5670 = vst [vmem:[#allocation86_spill] sm:$0xff] %v4326_v12 }
 0x58a   : > { %v4328_v21 = vpop.xlane.xlu1 %1393 }
 0x58b   : > { %5671 = vst [vmem:[#allocation87_spill] sm:$0xff] %v4328_v21  ;;  %v1424_v21 = vpop.permute.xlu0 %1423 }
 0x58e   : > { %v1398_v51 = vpop.permute.xlu1 %1397 }
 0x58f   : > { %v1494_v22 = vsel %vm284_vm2, %v1398_v51, 0.0 }
 0x590   : > { %1495 = vadd.xlane.f32.xlu1 %v1494_v22 }
 0x592   : > { %v1400_v50 = vpop.permute.xlu1 %1399 }
 0x593   : > { %v1497_v17 = vsel %vm284_vm2, %v1400_v50, 0.0  ;;  %v1428_v50 = vpop.permute.xlu0 %1427 }
 0x594   : > { %1498 = vadd.xlane.f32.xlu0 %v1497_v17 }
 0x596   : > { %v1402_v55 = vpop.permute.xlu1 %1401 }
 0x597   : > { %v1500_v32 = vsel %vm284_vm2, %v1402_v55, 0.0 }
 0x598   : > { %1501 = vadd.xlane.f32.xlu0 %v1500_v32  ;;  %v1515_v32 = vsel %vm284_vm2, %v1412_v9, 0.0 }
 0x59a   : > { %v1406_v18 = vpop.permute.xlu1 %1405 }
 0x59b   : > { %v1506_v12 = vsel %vm284_vm2, %v1406_v18, 0.0 }
 0x59c   : > { %1507 = vadd.xlane.f32.xlu1 %v1506_v12  ;;  %1504 = vadd.xlane.f32.xlu0 %v1503_v10  ;;  %v1521_v12 = vsel %vm284_vm2, %v1416_v30, 0.0  ;;  %v1432_v10 = vpop.permute.xlu0 %1431 }
 0x59e   : > { %v1410_v51 = vpop.permute.xlu1 %1409 }
 0x59f   : > { %v1512_v22 = vsel %vm284_vm2, %v1410_v51, 0.0 }
 0x5a0   : > { %1513 = vadd.xlane.f32.xlu1 %v1512_v22  ;;  %1510 = vadd.xlane.f32.xlu0 %v1509_v27  ;;  %v1527_v27 = vsel %vm284_vm2, %v1420_v37, 0.0  ;;  %v1436_v22 = vpop.permute.xlu0 %1435 }
 0x5a2   : > { %v1414_v17 = vpop.permute.xlu1 %1413 }
 0x5a3   : > { %v1518_v55 = vsel %vm284_vm2, %v1414_v17, 0.0 }
 0x5a4   : > { %1519 = vadd.xlane.f32.xlu1 %v1518_v55  ;;  %1516 = vadd.xlane.f32.xlu0 %v1515_v32  ;;  %v1533_v55 = vsel %vm284_vm2, %v1424_v21, 0.0 }
 0x5a6   : > { %v1418_v18 = vpop.permute.xlu1 %1417 }
 0x5a7   : > { %v1524_v59 = vsel %vm284_vm2, %v1418_v18, 0.0  ;;  %v1539_v18 = vsel %vm284_vm2, %v1428_v50, 0.0 }
 0x5a8   : > { %1525 = vadd.xlane.f32.xlu1 %v1524_v59  ;;  %1522 = vadd.xlane.f32.xlu0 %v1521_v12  ;;  %v1440_v59 = vpop.permute.xlu0 %1439 }
 0x5aa   : > { %v1422_v51 = vpop.permute.xlu1 %1421 }
 0x5ab   : > { %v1530_v34 = vsel %vm284_vm2, %v1422_v51, 0.0  ;;  %v1545_v51 = vsel %vm284_vm2, %v1432_v10, 0.0 }
 0x5ac   : > { %1531 = vadd.xlane.f32.xlu1 %v1530_v34  ;;  %1528 = vadd.xlane.f32.xlu0 %v1527_v27  ;;  %v1444_v34 = vpop.permute.xlu0 %1443 }
 0x5ae   : > { %v1426_v17 = vpop.permute.xlu1 %1425 }
 0x5af   : > { %v1536_v9 = vsel %vm284_vm2, %v1426_v17, 0.0  ;;  %v1551_v17 = vsel %vm284_vm2, %v1436_v22, 0.0 }
 0x5b0   : > { %1537 = vadd.xlane.f32.xlu1 %v1536_v9  ;;  %1534 = vadd.xlane.f32.xlu0 %v1533_v55  ;;  %v1557_v55 = vsel %vm284_vm2, %v1440_v59, 0.0 }
 0x5b2   : > { %v1430_v32 = vpop.permute.xlu1 %1429 }
 0x5b3   : > { %v1542_v30 = vsel %vm284_vm2, %v1430_v32, 0.0  ;;  %v1448_v32 = vpop.permute.xlu0 %1447 }
 0x5b4   : > { %1543 = vadd.xlane.f32.xlu1 %v1542_v30  ;;  %1540 = vadd.xlane.f32.xlu0 %v1539_v18  ;;  %v1563_v18 = vsel %vm284_vm2, %v1444_v34, 0.0 }
 0x5b6   : > { %v1434_v12 = vpop.permute.xlu1 %1433 }
 0x5b7   : > { %v1548_v37 = vsel %vm284_vm2, %v1434_v12, 0.0  ;;  %v1452_v12 = vpop.permute.xlu0 %1451 }
 0x5b8   : > { %1549 = vadd.xlane.f32.xlu1 %v1548_v37  ;;  %1546 = vadd.xlane.f32.xlu0 %v1545_v51  ;;  %v1569_v51 = vsel %vm284_vm2, %v1448_v32, 0.0 }
 0x5ba   : > { %v1438_v27 = vpop.permute.xlu1 %1437 }
 0x5bb   : > { %v1554_v21 = vsel %vm284_vm2, %v1438_v27, 0.0 }
 0x5bc   : > { %1555 = vadd.xlane.f32.xlu1 %v1554_v21  ;;  %1552 = vadd.xlane.f32.xlu0 %v1551_v17  ;;  %v1575_v21 = vsel %vm284_vm2, %v1452_v12, 0.0  ;;  %v1456_v17 = vpop.permute.xlu0 %1455 }
 0x5be   : > { %v1442_v9 = vpop.permute.xlu1 %1441 }
 0x5bf   : > { %v1560_v50 = vsel %vm284_vm2, %v1442_v9, 0.0 }
 0x5c0   : > { %1561 = vadd.xlane.f32.xlu1 %v1560_v50  ;;  %1558 = vadd.xlane.f32.xlu0 %v1557_v55  ;;  %v1581_v50 = vsel %vm284_vm2, %v1456_v17, 0.0 }
 0x5c2   : > { %v1446_v30 = vpop.permute.xlu1 %1445 }
 0x5c3   : > { %v1566_v10 = vsel %vm284_vm2, %v1446_v30, 0.0 }
 0x5c4   : > { %1567 = vadd.xlane.f32.xlu1 %v1566_v10  ;;  %1564 = vadd.xlane.f32.xlu0 %v1563_v18 }
 0x5c6   : > { %v1450_v37 = vpop.permute.xlu1 %1449 }
 0x5c7   : > { %v1572_v22 = vsel %vm284_vm2, %v1450_v37, 0.0 }
 0x5c8   : > { %1573 = vadd.xlane.f32.xlu1 %v1572_v22  ;;  %1570 = vadd.xlane.f32.xlu0 %v1569_v51 }
 0x5ca   : > { %v1454_v27 = vpop.permute.xlu1 %1453 }
 0x5cb   : > { %v1578_v59 = vsel %vm284_vm2, %v1454_v27, 0.0 }
 0x5cc   : > { %1579 = vadd.xlane.f32.xlu1 %v1578_v59  ;;  %1576 = vadd.xlane.f32.xlu0 %v1575_v21 }
 0x5ce   : > { %v1458_v9 = vpop.permute.xlu1 %1457 }
 0x5cf   : > { %v1584_v34 = vsel %vm284_vm2, %v1458_v9, 0.0 }
 0x5d0   : > { %1585 = vadd.xlane.f32.xlu1 %v1584_v34  ;;  %1582 = vadd.xlane.f32.xlu0 %v1581_v50 }
 0x5e1   : > { %1589 = vrot.lane.b32.xlu1 %v3495_v36, %s3383_s10 }
 0x5e5   : > { %1591 = vrot.lane.b32.xlu1 %v3536_v63, %s3383_s10 }
 0x5e6   : > { %1587 = vrot.lane.b32.xlu0 %v3515_v48, %s3383_s10 }
 0x5e9   : > { %1593 = vrot.lane.b32.xlu1 %v3508_v43, %s3383_s10 }
 0x5ea   : > { %1595 = vrot.lane.b32.xlu0 %v3543_v4, %s3383_s10 }
 0x5ed   : > { %1597 = vrot.lane.b32.xlu1 %v3566_v20, %s3383_s10 }
 0x5ee   : > { %1599 = vrot.lane.b32.xlu0 %v3573_v25, %s3383_s10 }
 0x5f1   : > { %1601 = vrot.lane.b32.xlu1 %v3596_v42, %s3383_s10 }
 0x5f2   : > { %1603 = vrot.lane.b32.xlu0 %v3603_v49, %s3383_s10 }
 0x5f5   : > { %1605 = vrot.lane.b32.xlu1 %v3626_v1, %s3383_s10 }
 0x5f6   : > { %1607 = vrot.lane.b32.xlu0 %v3633_v8, %s3383_s10 }
 0x5f9   : > { %1609 = vrot.lane.b32.xlu1 %v3656_v24, %s3383_s10 }
 0x5fa   : > { %1611 = vrot.lane.b32.xlu0 %v3663_v33, %s3383_s10 }
 0x5fd   : > { %1613 = vrot.lane.b32.xlu1 %v3686_v52, %s3383_s10 }
 0x5fe   : > { %1615 = vrot.lane.b32.xlu0 %v3693_v58, %s3383_s10  ;;  %v4419_v55 = vpop.xlane.xlu0 %1492 }
 0x601   : > { %1617 = vrot.lane.b32.xlu1 %v3716_v14, %s3383_s10 }
 0x602   : > { %1619 = vrot.lane.b32.xlu0 %v3723_v19, %s3383_s10 }
 0x605   : > { %1621 = vrot.lane.b32.xlu1 %v3744_v41, %s3383_s10 }
 0x606   : > { %1623 = vrot.lane.b32.xlu0 %v3751_v29, %s3383_s10 }
 0x609   : > { %1625 = vrot.lane.b32.xlu1 %v3768_v3, %s3383_s10 }
 0x60a   : > { %1627 = vrot.lane.b32.xlu0 %v3775_v53, %s3383_s10 }
 0x60d   : > { %1629 = vrot.lane.b32.xlu1 %v3791_v31, %s3383_s10 }
 0x60e   : > { %1631 = vrot.lane.b32.xlu0 %v3798_v26, %s3383_s10 }
 0x611   : > { %1633 = vrot.lane.b32.xlu1 %v3814_v60, %s3383_s10 }
 0x612   : > { %1635 = vrot.lane.b32.xlu0 %v3821_v2, %s3383_s10 }
 0x615   : > { %1637 = vrot.lane.b32.xlu1 %v5641_v6, %s3383_s10 }
 0x616   : > { %1639 = vrot.lane.b32.xlu0 %v3844_v35, %s3383_s10 }
 0x619   : > { %1641 = vrot.lane.b32.xlu1 %v5644_v47, %s3383_s10 }
 0x61a   : > { %1643 = vrot.lane.b32.xlu0 %v3865_v0, %s3383_s10 }
 0x61d   : > { %1645 = vrot.lane.b32.xlu1 %v5647_v15, %s3383_s10  ;;  %v4429_v30 = vpop.xlane.xlu1 %1495 }
 0x61e   : > { %1647 = vrot.lane.b32.xlu0 %v3922_v7, %s3383_s10 }
 0x621   : > { %1649 = vrot.lane.b32.xlu1 %v3970_v11, %s3383_s10  ;;  %v4427_v32 = vpop.xlane.xlu0 %1498 }
 0x622   : > { %5672 = vst [vmem:[#allocation88_spill] sm:$0xff] %v4427_v32 }
 0x625   : > { %v4431_v10 = vpop.xlane.xlu0 %1501 }
 0x626   : > { %5673 = vst [vmem:[#allocation89_spill] sm:$0xff] %v4431_v10 }
 0x629   : > { %v4433_v18 = vpop.xlane.xlu1 %1507  ;;  %v4435_v12 = vpop.xlane.xlu0 %1504 }
 0x62a   : > { %5674 = vst [vmem:[#allocation90_spill] sm:$0xff] %v4433_v18  ;;  %5675 = vst [vmem:[#allocation91_spill] sm:$0xff] %v4435_v12 }
 0x62d   : > { %v4437_v37 = vpop.xlane.xlu1 %1513  ;;  %v4439_v22 = vpop.xlane.xlu0 %1510 }
 0x62e   : > { %5676 = vst [vmem:[#allocation92_spill] sm:$0xff] %v4437_v37  ;;  %5677 = vst [vmem:[#allocation93_spill] sm:$0xff] %v4439_v22 }
 0x631   : > { %v4441_v51 = vpop.xlane.xlu1 %1519  ;;  %v4443_v27 = vpop.xlane.xlu0 %1516 }
 0x632   : > { %5678 = vst [vmem:[#allocation94_spill] sm:$0xff] %v4441_v51  ;;  %5679 = vst [vmem:[#allocation95_spill] sm:$0xff] %v4443_v27 }
 0x635   : > { %v4445_v59 = vpop.xlane.xlu1 %1525  ;;  %v4447_v21 = vpop.xlane.xlu0 %1522 }
 0x636   : > { %5680 = vst [vmem:[#allocation96_spill] sm:$0xff] %v4445_v59  ;;  %5681 = vst [vmem:[#allocation97_spill] sm:$0xff] %v4447_v21 }
 0x639   : > { %v4449_v17 = vpop.xlane.xlu1 %1531  ;;  %v4451_v9 = vpop.xlane.xlu0 %1528 }
 0x63a   : > { %5682 = vst [vmem:[#allocation98_spill] sm:$0xff] %v4449_v17  ;;  %5683 = vst [vmem:[#allocation99_spill] sm:$0xff] %v4451_v9 }
 0x63d   : > { %v4453_v34 = vpop.xlane.xlu1 %1537  ;;  %v4455_v50 = vpop.xlane.xlu0 %1534 }
 0x63e   : > { %5684 = vst [vmem:[#allocation100_spill] sm:$0xff] %v4453_v34  ;;  %5685 = vst [vmem:[#allocation101_spill] sm:$0xff] %v4455_v50 }
 0x641   : > { %v4457_v18 = vpop.xlane.xlu1 %1543  ;;  %v4459_v37 = vpop.xlane.xlu0 %1540 }
 0x645   : > { %v4461_v22 = vpop.xlane.xlu1 %1549  ;;  %v4463_v51 = vpop.xlane.xlu0 %1546 }
 0x646   : > { %5686 = vst [vmem:[#allocation102_spill] sm:$0xff] %v4461_v22  ;;  %5687 = vst [vmem:[#allocation103_spill] sm:$0xff] %v4463_v51 }
 0x649   : > { %v4465_v27 = vpop.xlane.xlu1 %1555  ;;  %v4467_v59 = vpop.xlane.xlu0 %1552 }
 0x64a   : > { %5688 = vst [vmem:[#allocation104_spill] sm:$0xff] %v4465_v27  ;;  %5689 = vst [vmem:[#allocation105_spill] sm:$0xff] %v4467_v59 }
 0x64d   : > { %v4469_v21 = vpop.xlane.xlu1 %1561  ;;  %v4471_v17 = vpop.xlane.xlu0 %1558 }
 0x64e   : > { %5690 = vst [vmem:[#allocation106_spill] sm:$0xff] %v4469_v21  ;;  %5691 = vst [vmem:[#allocation107_spill] sm:$0xff] %v4471_v17 }
 0x651   : > { %v4473_v9 = vpop.xlane.xlu1 %1567  ;;  %v4475_v34 = vpop.xlane.xlu0 %1564 }
 0x652   : > { %5692 = vst [vmem:[#allocation108_spill] sm:$0xff] %v4473_v9  ;;  %5693 = vst [vmem:[#allocation109_spill] sm:$0xff] %v4475_v34 }
 0x655   : > { %v4477_v50 = vpop.xlane.xlu1 %1573  ;;  %v4479_v12 = vpop.xlane.xlu0 %1570 }
 0x656   : > { %5694 = vst [vmem:[#allocation110_spill] sm:$0xff] %v4477_v50  ;;  %5695 = vst [vmem:[#allocation111_spill] sm:$0xff] %v4479_v12 }
 0x659   : > { %v4481_v10 = vpop.xlane.xlu1 %1579  ;;  %v4483_v22 = vpop.xlane.xlu0 %1576 }
 0x65a   : > { %5696 = vst [vmem:[#allocation112_spill] sm:$0xff] %v4481_v10  ;;  %5697 = vst [vmem:[#allocation113_spill] sm:$0xff] %v4483_v22 }
 0x65d   : > { %v4485_v61 = vpop.xlane.xlu1 %1585  ;;  %v4487_v27 = vpop.xlane.xlu0 %1582 }
 0x65e   : > { %5698 = vst [vmem:[#allocation114_spill] sm:$0xff] %v4485_v61  ;;  %5699 = vst [vmem:[#allocation115_spill] sm:$0xff] %v4487_v27 }
 0x661   : > { %v1590_v59 = vpop.permute.xlu1 %1589  ;;  %v1588_v21 = vpop.permute.xlu0 %1587 }
 0x662   : > { %v1686_v17 = vsel %vm284_vm2, %v1590_v59, 0.0  ;;  %v1683_v9 = vsel %vm284_vm2, %v1588_v21, 0.0 }
 0x663   : > { %1687 = vadd.xlane.f32.xlu1 %v1686_v17  ;;  %1684 = vadd.xlane.f32.xlu0 %v1683_v9 }
 0x665   : > { %v1592_v34 = vpop.permute.xlu1 %1591  ;;  %v1596_v50 = vpop.permute.xlu0 %1595 }
 0x666   : > { %v1689_v12 = vsel %vm284_vm2, %v1592_v34, 0.0  ;;  %v1695_v59 = vsel %vm284_vm2, %v1596_v50, 0.0 }
 0x667   : > { %1690 = vadd.xlane.f32.xlu0 %v1689_v12 }
 0x669   : > { %v1594_v10 = vpop.permute.xlu1 %1593  ;;  %v1600_v32 = vpop.permute.xlu0 %1599 }
 0x66a   : > { %v1692_v22 = vsel %vm284_vm2, %v1594_v10, 0.0  ;;  %v1701_v34 = vsel %vm284_vm2, %v1600_v32, 0.0 }
 0x66b   : > { %1693 = vadd.xlane.f32.xlu0 %v1692_v22 }
 0x66d   : > { %v1598_v61 = vpop.permute.xlu1 %1597  ;;  %v1604_v27 = vpop.permute.xlu0 %1603 }
 0x66e   : > { %v1698_v40 = vsel %vm284_vm2, %v1598_v61, 0.0  ;;  %v1707_v22 = vsel %vm284_vm2, %v1604_v27, 0.0 }
 0x66f   : > { %1699 = vadd.xlane.f32.xlu1 %v1698_v40  ;;  %1696 = vadd.xlane.f32.xlu0 %v1695_v59 }
 0x671   : > { %v1602_v21 = vpop.permute.xlu1 %1601  ;;  %v1608_v17 = vpop.permute.xlu0 %1607 }
 0x672   : > { %v1704_v9 = vsel %vm284_vm2, %v1602_v21, 0.0  ;;  %v1713_v59 = vsel %vm284_vm2, %v1608_v17, 0.0 }
 0x673   : > { %1705 = vadd.xlane.f32.xlu1 %v1704_v9  ;;  %1702 = vadd.xlane.f32.xlu0 %v1701_v34 }
 0x675   : > { %v1606_v12 = vpop.permute.xlu1 %1605  ;;  %v1612_v13 = vpop.permute.xlu0 %1611 }
 0x676   : > { %v1710_v10 = vsel %vm284_vm2, %v1606_v12, 0.0  ;;  %v1719_v34 = vsel %vm284_vm2, %v1612_v13, 0.0 }
 0x677   : > { %1711 = vadd.xlane.f32.xlu1 %v1710_v10  ;;  %1708 = vadd.xlane.f32.xlu0 %v1707_v22 }
 0x679   : > { %v1610_v61 = vpop.permute.xlu1 %1609  ;;  %v1616_v50 = vpop.permute.xlu0 %1615 }
 0x67a   : > { %v1716_v40 = vsel %vm284_vm2, %v1610_v61, 0.0  ;;  %v1725_v22 = vsel %vm284_vm2, %v1616_v50, 0.0 }
 0x67b   : > { %1717 = vadd.xlane.f32.xlu1 %v1716_v40  ;;  %1714 = vadd.xlane.f32.xlu0 %v1713_v59 }
 0x67d   : > { %v1614_v21 = vpop.permute.xlu1 %1613  ;;  %v1620_v32 = vpop.permute.xlu0 %1619 }
 0x67e   : > { %v1722_v9 = vsel %vm284_vm2, %v1614_v21, 0.0  ;;  %v1731_v59 = vsel %vm284_vm2, %v1620_v32, 0.0 }
 0x67f   : > { %1723 = vadd.xlane.f32.xlu1 %v1722_v9  ;;  %1720 = vadd.xlane.f32.xlu0 %v1719_v34 }
 0x681   : > { %v1618_v12 = vpop.permute.xlu1 %1617  ;;  %v1624_v27 = vpop.permute.xlu0 %1623 }
 0x682   : > { %v1728_v10 = vsel %vm284_vm2, %v1618_v12, 0.0  ;;  %v1737_v34 = vsel %vm284_vm2, %v1624_v27, 0.0 }
 0x683   : > { %1729 = vadd.xlane.f32.xlu1 %v1728_v10  ;;  %1726 = vadd.xlane.f32.xlu0 %v1725_v22 }
 0x685   : > { %v1622_v61 = vpop.permute.xlu1 %1621  ;;  %v1628_v17 = vpop.permute.xlu0 %1627 }
 0x686   : > { %v1734_v40 = vsel %vm284_vm2, %v1622_v61, 0.0  ;;  %v1743_v22 = vsel %vm284_vm2, %v1628_v17, 0.0 }
 0x687   : > { %1735 = vadd.xlane.f32.xlu1 %v1734_v40  ;;  %1732 = vadd.xlane.f32.xlu0 %v1731_v59 }
 0x689   : > { %v1626_v21 = vpop.permute.xlu1 %1625  ;;  %v1632_v13 = vpop.permute.xlu0 %1631 }
 0x68a   : > { %v1740_v9 = vsel %vm284_vm2, %v1626_v21, 0.0  ;;  %v1749_v40 = vsel %vm284_vm2, %v1632_v13, 0.0 }
 0x68b   : > { %1741 = vadd.xlane.f32.xlu1 %v1740_v9  ;;  %1738 = vadd.xlane.f32.xlu0 %v1737_v34 }
 0x68d   : > { %v1630_v12 = vpop.permute.xlu1 %1629  ;;  %v1636_v50 = vpop.permute.xlu0 %1635 }
 0x68e   : > { %v1746_v10 = vsel %vm284_vm2, %v1630_v12, 0.0  ;;  %v1755_v9 = vsel %vm284_vm2, %v1636_v50, 0.0 }
 0x68f   : > { %1747 = vadd.xlane.f32.xlu1 %v1746_v10  ;;  %1744 = vadd.xlane.f32.xlu0 %v1743_v22 }
 0x691   : > { %v1634_v61 = vpop.permute.xlu1 %1633  ;;  %v1640_v59 = vpop.permute.xlu0 %1639 }
 0x692   : > { %v1752_v32 = vsel %vm284_vm2, %v1634_v61, 0.0  ;;  %v1761_v10 = vsel %vm284_vm2, %v1640_v59, 0.0 }
 0x693   : > { %1753 = vadd.xlane.f32.xlu1 %v1752_v32  ;;  %1750 = vadd.xlane.f32.xlu0 %v1749_v40 }
 0x695   : > { %v1638_v21 = vpop.permute.xlu1 %1637  ;;  %v1644_v34 = vpop.permute.xlu0 %1643 }
 0x696   : > { %v1758_v27 = vsel %vm284_vm2, %v1638_v21, 0.0  ;;  %v1767_v61 = vsel %vm284_vm2, %v1644_v34, 0.0 }
 0x697   : > { %1759 = vadd.xlane.f32.xlu1 %v1758_v27  ;;  %1756 = vadd.xlane.f32.xlu0 %v1755_v9 }
 0x699   : > { %v1642_v12 = vpop.permute.xlu1 %1641  ;;  %v1648_v32 = vpop.permute.xlu0 %1647 }
 0x69a   : > { %v1764_v17 = vsel %vm284_vm2, %v1642_v12, 0.0  ;;  %v1773_v21 = vsel %vm284_vm2, %v1648_v32, 0.0 }
 0x69b   : > { %1765 = vadd.xlane.f32.xlu1 %v1764_v17  ;;  %1762 = vadd.xlane.f32.xlu0 %v1761_v10 }
 0x69d   : > { %v1646_v22 = vpop.permute.xlu1 %1645 }
 0x69e   : > { %v1770_v13 = vsel %vm284_vm2, %v1646_v22, 0.0 }
 0x69f   : > { %1771 = vadd.xlane.f32.xlu1 %v1770_v13  ;;  %1768 = vadd.xlane.f32.xlu0 %v1767_v61 }
 0x6a1   : > { %v1650_v40 = vpop.permute.xlu1 %1649 }
 0x6a2   : > { %v1776_v50 = vsel %vm284_vm2, %v1650_v40, 0.0 }
 0x6a3   : > { %1777 = vadd.xlane.f32.xlu1 %v1776_v50  ;;  %1774 = vadd.xlane.f32.xlu0 %v1773_v21 }
 0x6b4   : > { %1781 = vrot.lane.b32.xlu1 %v3495_v36, %s3384_s11 }
 0x6b8   : > { %1783 = vrot.lane.b32.xlu1 %v3536_v63, %s3384_s11 }
 0x6b9   : > { %1779 = vrot.lane.b32.xlu0 %v3515_v48, %s3384_s11 }
 0x6bc   : > { %1785 = vrot.lane.b32.xlu1 %v3508_v43, %s3384_s11 }
 0x6bd   : > { %1787 = vrot.lane.b32.xlu0 %v3543_v4, %s3384_s11 }
 0x6c0   : > { %1789 = vrot.lane.b32.xlu1 %v3566_v20, %s3384_s11 }
 0x6c1   : > { %1791 = vrot.lane.b32.xlu0 %v3573_v25, %s3384_s11 }
 0x6c4   : > { %1793 = vrot.lane.b32.xlu1 %v3596_v42, %s3384_s11 }
 0x6c5   : > { %1795 = vrot.lane.b32.xlu0 %v3603_v49, %s3384_s11 }
 0x6c8   : > { %1797 = vrot.lane.b32.xlu1 %v3626_v1, %s3384_s11 }
 0x6c9   : > { %1799 = vrot.lane.b32.xlu0 %v3633_v8, %s3384_s11 }
 0x6cc   : > { %1801 = vrot.lane.b32.xlu1 %v3656_v24, %s3384_s11 }
 0x6cd   : > { %1803 = vrot.lane.b32.xlu0 %v3663_v33, %s3384_s11 }
 0x6d0   : > { %1805 = vrot.lane.b32.xlu1 %v3686_v52, %s3384_s11 }
 0x6d1   : > { %1807 = vrot.lane.b32.xlu0 %v3693_v58, %s3384_s11 }
 0x6d4   : > { %1809 = vrot.lane.b32.xlu1 %v3716_v14, %s3384_s11 }
 0x6d5   : > { %1811 = vrot.lane.b32.xlu0 %v3723_v19, %s3384_s11 }
 0x6d8   : > { %1813 = vrot.lane.b32.xlu1 %v3744_v41, %s3384_s11 }
 0x6d9   : > { %1815 = vrot.lane.b32.xlu0 %v3751_v29, %s3384_s11 }
 0x6dc   : > { %1817 = vrot.lane.b32.xlu1 %v3768_v3, %s3384_s11 }
 0x6dd   : > { %1819 = vrot.lane.b32.xlu0 %v3775_v53, %s3384_s11 }
 0x6e0   : > { %1821 = vrot.lane.b32.xlu1 %v3791_v31, %s3384_s11 }
 0x6e1   : > { %1823 = vrot.lane.b32.xlu0 %v3798_v26, %s3384_s11 }
 0x6e4   : > { %1825 = vrot.lane.b32.xlu1 %v3814_v60, %s3384_s11 }
 0x6e5   : > { %1827 = vrot.lane.b32.xlu0 %v3821_v2, %s3384_s11 }
 0x6e8   : > { %1829 = vrot.lane.b32.xlu1 %v5641_v6, %s3384_s11 }
 0x6e9   : > { %1831 = vrot.lane.b32.xlu0 %v3844_v35, %s3384_s11 }
 0x6ec   : > { %1833 = vrot.lane.b32.xlu1 %v5644_v47, %s3384_s11 }
 0x6ed   : > { %1835 = vrot.lane.b32.xlu0 %v3865_v0, %s3384_s11 }
 0x6f0   : > { %1837 = vrot.lane.b32.xlu1 %v5647_v15, %s3384_s11  ;;  %v4581_v59 = vpop.xlane.xlu0 %1684  ;;  %v4589_v9 = vpop.xlane.xlu1 %1687 }
 0x6f1   : > { %1839 = vrot.lane.b32.xlu0 %v3922_v7, %s3384_s11 }
 0x6f4   : > { %1841 = vrot.lane.b32.xlu1 %v3970_v11, %s3384_s11  ;;  %v4587_v27 = vpop.xlane.xlu0 %1690 }
 0x6f5   : > { %5700 = vst [vmem:[#allocation116_spill] sm:$0xff] %v4587_v27 }
 0x6f8   : > { %v4591_v34 = vpop.xlane.xlu0 %1693 }
 0x6f9   : > { %5701 = vst [vmem:[#allocation117_spill] sm:$0xff] %v4591_v34 }
 0x6fc   : > { %v4593_v12 = vpop.xlane.xlu1 %1699  ;;  %v4595_v17 = vpop.xlane.xlu0 %1696 }
 0x6fd   : > { %5702 = vst [vmem:[#allocation118_spill] sm:$0xff] %v4593_v12  ;;  %5703 = vst [vmem:[#allocation119_spill] sm:$0xff] %v4595_v17 }
 0x700   : > { %v4597_v10 = vpop.xlane.xlu1 %1705  ;;  %v4599_v22 = vpop.xlane.xlu0 %1702 }
 0x701   : > { %5704 = vst [vmem:[#allocation120_spill] sm:$0xff] %v4597_v10  ;;  %5705 = vst [vmem:[#allocation121_spill] sm:$0xff] %v4599_v22 }
 0x704   : > { %v4601_v13 = vpop.xlane.xlu1 %1711  ;;  %v4603_v61 = vpop.xlane.xlu0 %1708 }
 0x705   : > { %5706 = vst [vmem:[#allocation122_spill] sm:$0xff] %v4601_v13  ;;  %5707 = vst [vmem:[#allocation123_spill] sm:$0xff] %v4603_v61 }
 0x708   : > { %v4605_v32 = vpop.xlane.xlu1 %1717  ;;  %v4607_v40 = vpop.xlane.xlu0 %1714 }
 0x709   : > { %5708 = vst [vmem:[#allocation124_spill] sm:$0xff] %v4605_v32  ;;  %5709 = vst [vmem:[#allocation125_spill] sm:$0xff] %v4607_v40 }
 0x70c   : > { %v4609_v50 = vpop.xlane.xlu1 %1723  ;;  %v4611_v21 = vpop.xlane.xlu0 %1720 }
 0x70d   : > { %5710 = vst [vmem:[#allocation126_spill] sm:$0xff] %v4609_v50  ;;  %5711 = vst [vmem:[#allocation127_spill] sm:$0xff] %v4611_v21 }
 0x710   : > { %v4613_v34 = vpop.xlane.xlu1 %1729  ;;  %v4615_v12 = vpop.xlane.xlu0 %1726 }
 0x711   : > { %5712 = vst [vmem:[#allocation128_spill] sm:$0xff] %v4613_v34  ;;  %5713 = vst [vmem:[#allocation129_spill] sm:$0xff] %v4615_v12 }
 0x714   : > { %v4617_v17 = vpop.xlane.xlu1 %1735  ;;  %v4619_v10 = vpop.xlane.xlu0 %1732 }
 0x718   : > { %v4621_v22 = vpop.xlane.xlu1 %1741  ;;  %v4623_v13 = vpop.xlane.xlu0 %1738 }
 0x719   : > { %5714 = vst [vmem:[#allocation130_spill] sm:$0xff] %v4621_v22  ;;  %5715 = vst [vmem:[#allocation131_spill] sm:$0xff] %v4623_v13 }
 0x71c   : > { %v4625_v61 = vpop.xlane.xlu1 %1747  ;;  %v4627_v32 = vpop.xlane.xlu0 %1744 }
 0x71d   : > { %5716 = vst [vmem:[#allocation132_spill] sm:$0xff] %v4625_v61  ;;  %5717 = vst [vmem:[#allocation133_spill] sm:$0xff] %v4627_v32 }
 0x720   : > { %v4629_v40 = vpop.xlane.xlu1 %1753  ;;  %v4631_v50 = vpop.xlane.xlu0 %1750 }
 0x721   : > { %5718 = vst [vmem:[#allocation134_spill] sm:$0xff] %v4629_v40  ;;  %5719 = vst [vmem:[#allocation135_spill] sm:$0xff] %v4631_v50 }
 0x724   : > { %v4633_v21 = vpop.xlane.xlu1 %1759  ;;  %v4635_v34 = vpop.xlane.xlu0 %1756 }
 0x725   : > { %5720 = vst [vmem:[#allocation136_spill] sm:$0xff] %v4633_v21  ;;  %5721 = vst [vmem:[#allocation137_spill] sm:$0xff] %v4635_v34 }
 0x728   : > { %v4637_v12 = vpop.xlane.xlu1 %1765  ;;  %v4639_v27 = vpop.xlane.xlu0 %1762 }
 0x729   : > { %5722 = vst [vmem:[#allocation138_spill] sm:$0xff] %v4637_v12  ;;  %5723 = vst [vmem:[#allocation139_spill] sm:$0xff] %v4639_v27 }
 0x72c   : > { %v4641_v51 = vpop.xlane.xlu1 %1771  ;;  %v4643_v22 = vpop.xlane.xlu0 %1768 }
 0x72d   : > { %5724 = vst [vmem:[#allocation140_spill] sm:$0xff] %v4641_v51  ;;  %5725 = vst [vmem:[#allocation141_spill] sm:$0xff] %v4643_v22 }
 0x730   : > { %v4645_v13 = vpop.xlane.xlu1 %1777  ;;  %v4647_v61 = vpop.xlane.xlu0 %1774 }
 0x731   : > { %5726 = vst [vmem:[#allocation142_spill] sm:$0xff] %v4645_v13  ;;  %5727 = vst [vmem:[#allocation143_spill] sm:$0xff] %v4647_v61 }
 0x734   : > { %v1782_v32 = vpop.permute.xlu1 %1781  ;;  %v1780_v40 = vpop.permute.xlu0 %1779 }
 0x735   : > { %v1878_v50 = vsel %vm284_vm2, %v1782_v32, 0.0  ;;  %v1875_v21 = vsel %vm284_vm2, %v1780_v40, 0.0 }
 0x736   : > { %1879 = vadd.xlane.f32.xlu1 %v1878_v50  ;;  %1876 = vadd.xlane.f32.xlu0 %v1875_v21 }
 0x738   : > { %v1784_v34 = vpop.permute.xlu1 %1783  ;;  %v1788_v12 = vpop.permute.xlu0 %1787 }
 0x739   : > { %v1881_v27 = vsel %vm284_vm2, %v1784_v34, 0.0  ;;  %v1887_v56 = vsel %vm284_vm2, %v1788_v12, 0.0 }
 0x73a   : > { %1882 = vadd.xlane.f32.xlu0 %v1881_v27 }
 0x73c   : > { %v1786_v51 = vpop.permute.xlu1 %1785  ;;  %v1792_v44 = vpop.permute.xlu0 %1791 }
 0x73d   : > { %v1884_v22 = vsel %vm284_vm2, %v1786_v51, 0.0  ;;  %v1893_v21 = vsel %vm284_vm2, %v1792_v44, 0.0 }
 0x73e   : > { %1885 = vadd.xlane.f32.xlu0 %v1884_v22 }
 0x740   : > { %v1790_v13 = vpop.permute.xlu1 %1789  ;;  %v1796_v32 = vpop.permute.xlu0 %1795 }
 0x741   : > { %v1890_v61 = vsel %vm284_vm2, %v1790_v13, 0.0  ;;  %v1899_v22 = vsel %vm284_vm2, %v1796_v32, 0.0 }
 0x742   : > { %1891 = vadd.xlane.f32.xlu1 %v1890_v61  ;;  %1888 = vadd.xlane.f32.xlu0 %v1887_v56 }
 0x744   : > { %v1794_v40 = vpop.permute.xlu1 %1793  ;;  %v1800_v27 = vpop.permute.xlu0 %1799 }
 0x745   : > { %v1896_v50 = vsel %vm284_vm2, %v1794_v40, 0.0  ;;  %v1905_v56 = vsel %vm284_vm2, %v1800_v27, 0.0 }
 0x746   : > { %1897 = vadd.xlane.f32.xlu1 %v1896_v50  ;;  %1894 = vadd.xlane.f32.xlu0 %v1893_v21 }
 0x748   : > { %v1798_v34 = vpop.permute.xlu1 %1797  ;;  %v1804_v61 = vpop.permute.xlu0 %1803 }
 0x749   : > { %v1902_v51 = vsel %vm284_vm2, %v1798_v34, 0.0  ;;  %v1911_v44 = vsel %vm284_vm2, %v1804_v61, 0.0 }
 0x74a   : > { %1903 = vadd.xlane.f32.xlu1 %v1902_v51  ;;  %1900 = vadd.xlane.f32.xlu0 %v1899_v22 }
 0x74c   : > { %v1802_v13 = vpop.permute.xlu1 %1801 }
 0x74d   : > { %v1908_v12 = vsel %vm284_vm2, %v1802_v13, 0.0 }
 0x74e   : > { %1909 = vadd.xlane.f32.xlu1 %v1908_v12  ;;  %1906 = vadd.xlane.f32.xlu0 %v1905_v56 }
 0x752   : > { %1912 = vadd.xlane.f32.xlu0 %v1911_v44 }
 0x75f   : > { %2003 = vrot.lane.b32.xlu1 %v3723_v19, %s3385_s12 }
 0x763   : > { %2195 = vrot.lane.b32.xlu1 %v3723_v19, %s3386_s13 }
 0x767   : > { %2005 = vrot.lane.b32.xlu1 %v3744_v41, %s3385_s12 }
 0x768   : > { %1971 = vrot.lane.b32.xlu0 %v3515_v48, %s3385_s12 }
 0x76b   : > { %2163 = vrot.lane.b32.xlu1 %v3515_v48, %s3386_s13 }
 0x76c   : > { %1973 = vrot.lane.b32.xlu0 %v3495_v36, %s3385_s12 }
 0x76f   : > { %2197 = vrot.lane.b32.xlu1 %v3744_v41, %s3386_s13 }
 0x770   : > { %2007 = vrot.lane.b32.xlu0 %v3751_v29, %s3385_s12 }
 0x773   : > { %2165 = vrot.lane.b32.xlu1 %v3495_v36, %s3386_s13  ;;  %v4706_v36 = vpop.permute.xlu0 %1807 }
 0x774   : > { %1975 = vrot.lane.b32.xlu0 %v3536_v63, %s3385_s12 }
 0x777   : > { %2199 = vrot.lane.b32.xlu1 %v3751_v29, %s3386_s13  ;;  %v4718_v48 = vpop.permute.xlu0 %1811 }
 0x778   : > { %2009 = vrot.lane.b32.xlu0 %v3768_v3, %s3385_s12 }
 0x77b   : > { %2167 = vrot.lane.b32.xlu1 %v3536_v63, %s3386_s13 }
 0x77c   : > { %1977 = vrot.lane.b32.xlu0 %v3508_v43, %s3385_s12 }
 0x77f   : > { %2201 = vrot.lane.b32.xlu1 %v3768_v3, %s3386_s13 }
 0x780   : > { %2011 = vrot.lane.b32.xlu0 %v3775_v53, %s3385_s12 }
 0x783   : > { %2169 = vrot.lane.b32.xlu1 %v3508_v43, %s3386_s13  ;;  %v4712_v43 = vpop.permute.xlu1 %1805 }
 0x784   : > { %1979 = vrot.lane.b32.xlu0 %v3543_v4, %s3385_s12 }
 0x787   : > { %2203 = vrot.lane.b32.xlu1 %v3775_v53, %s3386_s13  ;;  %v4720_v63 = vpop.permute.xlu1 %1809 }
 0x788   : > { %2013 = vrot.lane.b32.xlu0 %v3791_v31, %s3385_s12 }
 0x78b   : > { %2171 = vrot.lane.b32.xlu1 %v3543_v4, %s3386_s13  ;;  %v4726_v4 = vpop.permute.xlu0 %1815 }
 0x78c   : > { %1981 = vrot.lane.b32.xlu0 %v3566_v20, %s3385_s12 }
 0x78f   : > { %2205 = vrot.lane.b32.xlu1 %v3791_v31, %s3386_s13  ;;  %v4738_v19 = vpop.permute.xlu0 %1819 }
 0x790   : > { %2015 = vrot.lane.b32.xlu0 %v3798_v26, %s3385_s12 }
 0x793   : > { %2173 = vrot.lane.b32.xlu1 %v3566_v20, %s3386_s13  ;;  %v4732_v20 = vpop.permute.xlu1 %1813 }
 0x794   : > { %1983 = vrot.lane.b32.xlu0 %v3573_v25, %s3385_s12 }
 0x797   : > { %2207 = vrot.lane.b32.xlu1 %v3798_v26, %s3386_s13  ;;  %v4740_v41 = vpop.permute.xlu1 %1817 }
 0x798   : > { %2017 = vrot.lane.b32.xlu0 %v3814_v60, %s3385_s12 }
 0x79b   : > { %2175 = vrot.lane.b32.xlu1 %v3573_v25, %s3386_s13  ;;  %v4746_v25 = vpop.permute.xlu0 %1823  ;;  %v4752_v29 = vpop.permute.xlu1 %1821 }
 0x79c   : > { %1985 = vrot.lane.b32.xlu0 %v3596_v42, %s3385_s12 }
 0x79f   : > { %2209 = vrot.lane.b32.xlu1 %v3814_v60, %s3386_s13  ;;  %v4760_v3 = vpop.permute.xlu1 %1825 }
 0x7a0   : > { %2019 = vrot.lane.b32.xlu0 %v3821_v2, %s3385_s12 }
 0x7a3   : > { %2177 = vrot.lane.b32.xlu1 %v3596_v42, %s3386_s13  ;;  %v4758_v42 = vpop.permute.xlu0 %1827 }
 0x7a4   : > { %1987 = vrot.lane.b32.xlu0 %v3603_v49, %s3385_s12 }
 0x7a7   : > { %2211 = vrot.lane.b32.xlu1 %v3821_v2, %s3386_s13  ;;  %v4766_v53 = vpop.permute.xlu0 %1831 }
 0x7a8   : > { %2021 = vrot.lane.b32.xlu0 %v5641_v6, %s3385_s12 }
 0x7ab   : > { %2179 = vrot.lane.b32.xlu1 %v3603_v49, %s3386_s13  ;;  %v4772_v49 = vpop.permute.xlu1 %1829  ;;  %v4778_v31 = vpop.permute.xlu0 %1835 }
 0x7ac   : > { %1989 = vrot.lane.b32.xlu0 %v3626_v1, %s3385_s12 }
 0x7af   : > { %2213 = vrot.lane.b32.xlu1 %v5641_v6, %s3386_s13  ;;  %v4780_v26 = vpop.permute.xlu1 %1833 }
 0x7b0   : > { %2023 = vrot.lane.b32.xlu0 %v3844_v35, %s3385_s12 }
 0x7b3   : > { %2181 = vrot.lane.b32.xlu1 %v3626_v1, %s3386_s13  ;;  %v4786_v1 = vpop.permute.xlu0 %1839  ;;  %v4792_v60 = vpop.permute.xlu1 %1837 }
 0x7b4   : > { %1991 = vrot.lane.b32.xlu0 %v3633_v8, %s3385_s12 }
 0x7b7   : > { %2215 = vrot.lane.b32.xlu1 %v3844_v35, %s3386_s13 }
 0x7b8   : > { %2025 = vrot.lane.b32.xlu0 %v5644_v47, %s3385_s12 }
 0x7bb   : > { %2183 = vrot.lane.b32.xlu1 %v3633_v8, %s3386_s13  ;;  %v4800_v8 = vpop.permute.xlu1 %1841 }
 0x7bc   : > { %1993 = vrot.lane.b32.xlu0 %v3656_v24, %s3385_s12 }
 0x7bf   : > { %2217 = vrot.lane.b32.xlu1 %v5644_v47, %s3386_s13 }
 0x7c0   : > { %2027 = vrot.lane.b32.xlu0 %v3865_v0, %s3385_s12 }
 0x7c3   : > { %2185 = vrot.lane.b32.xlu1 %v3656_v24, %s3386_s13  ;;  %v4796_v2 = vpop.xlane.xlu0 %1876  ;;  %v4808_v47 = vpop.xlane.xlu1 %1879 }
 0x7c4   : > { %1995 = vrot.lane.b32.xlu0 %v3663_v33, %s3385_s12 }
 0x7c7   : > { %2219 = vrot.lane.b32.xlu1 %v3865_v0, %s3386_s13  ;;  %v4804_v35 = vpop.xlane.xlu0 %1882 }
 0x7c8   : > { %5728 = vst [vmem:[#allocation144_spill] sm:$0xff] %v4804_v35  ;;  %2029 = vrot.lane.b32.xlu0 %v5647_v15, %s3385_s12 }
 0x7cb   : > { %2187 = vrot.lane.b32.xlu1 %v3663_v33, %s3386_s13  ;;  %v4812_v24 = vpop.xlane.xlu0 %1885 }
 0x7cc   : > { %5729 = vst [vmem:[#allocation145_spill] sm:$0xff] %v4812_v24  ;;  %1997 = vrot.lane.b32.xlu0 %v3686_v52, %s3385_s12 }
 0x7cf   : > { %v4816_v6 = vpop.xlane.xlu1 %1891  ;;  %2221 = vrot.lane.b32.xlu1 %v5647_v15, %s3386_s13  ;;  %v4820_v0 = vpop.xlane.xlu0 %1888 }
 0x7d0   : > { %5730 = vst [vmem:[#allocation146_spill] sm:$0xff] %v4816_v6  ;;  %5731 = vst [vmem:[#allocation147_spill] sm:$0xff] %v4820_v0  ;;  %2031 = vrot.lane.b32.xlu0 %v3922_v7, %s3385_s12 }
 0x7d3   : > { %v4824_v32 = vpop.xlane.xlu1 %1897  ;;  %2189 = vrot.lane.b32.xlu1 %v3686_v52, %s3386_s13  ;;  %v4828_v33 = vpop.xlane.xlu0 %1894 }
 0x7d4   : > { %5732 = vst [vmem:[#allocation148_spill] sm:$0xff] %v4824_v32  ;;  %5733 = vst [vmem:[#allocation149_spill] sm:$0xff] %v4828_v33  ;;  %1999 = vrot.lane.b32.xlu0 %v3693_v58, %s3385_s12  ;;  %v1926_v32 = vsel %vm284_vm2, %v4732_v20, 0.0  ;;  %v1923_v33 = vsel %vm284_vm2, %v4718_v48, 0.0 }
 0x7d7   : > { %v4832_v40 = vpop.xlane.xlu1 %1903  ;;  %2223 = vrot.lane.b32.xlu1 %v3922_v7, %s3386_s13  ;;  %v4836_v15 = vpop.xlane.xlu0 %1900 }
 0x7d8   : > { %5734 = vst [vmem:[#allocation150_spill] sm:$0xff] %v4832_v40  ;;  %5735 = vst [vmem:[#allocation151_spill] sm:$0xff] %v4836_v15  ;;  %2033 = vrot.lane.b32.xlu0 %v3970_v11, %s3385_s12 }
 0x7db   : > { %v4840_v50 = vpop.xlane.xlu1 %1909  ;;  %2191 = vrot.lane.b32.xlu1 %v3693_v58, %s3386_s13  ;;  %v4844_v52 = vpop.xlane.xlu0 %1906 }
 0x7dc   : > { %5736 = vst [vmem:[#allocation152_spill] sm:$0xff] %v4840_v50  ;;  %5737 = vst [vmem:[#allocation153_spill] sm:$0xff] %v4844_v52  ;;  %2001 = vrot.lane.b32.xlu0 %v3716_v14, %s3385_s12 }
 0x7df   : > { %v2004_v21 = vpop.permute.xlu1 %2003  ;;  %2225 = vrot.lane.b32.xlu1 %v3970_v11, %s3386_s13  ;;  %v4850_v7 = vpop.xlane.xlu0 %1912 }
 0x7e0   : > { %5738 = vst [vmem:[#allocation154_spill] sm:$0xff] %v4850_v7  ;;  %2193 = vrot.lane.b32.xlu0 %v3716_v14, %s3386_s13  ;;  %v2115_v52 = vsel %vm284_vm2, %v2004_v21, 0.0 }
 0x7e3   : > { %v2196_v27 = vpop.permute.xlu1 %2195  ;;  %v1972_v34 = vpop.permute.xlu0 %1971 }
 0x7e4   : > { %v2307_v24 = vsel %vm284_vm2, %v2196_v27, 0.0  ;;  %v2067_v21 = vsel %vm284_vm2, %v1972_v34, 0.0  ;;  %v3387_v34 = vmov 0.0  }
 0x7e5   : > { %301 = vst.msk [vmem:[#allocation2 + $0x80] sm:$0xff] %vm284_vm2, %v3387_v34  ;;  %285 = vst.msk [vmem:[#allocation2] sm:$0xff] %vm284_vm2, %v3387_v34 }
 0x7e6   : > { %286 = vst.msk [vmem:[#allocation2 + $0x8] sm:$0xff] %vm284_vm2, %v3387_v34  ;;  %287 = vst.msk [vmem:[#allocation2 + $0x10] sm:$0xff] %vm284_vm2, %v3387_v34 }
 0x7e7   : > { %v2006_v51 = vpop.permute.xlu1 %2005  ;;  %v1974_v22 = vpop.permute.xlu0 %1973  ;;  %288 = vst.msk [vmem:[#allocation2 + $0x18] sm:$0xff] %vm284_vm2, %v3387_v34  ;;  %289 = vst.msk [vmem:[#allocation2 + $0x20] sm:$0xff] %vm284_vm2, %v3387_v34 }
 0x7e8   : > { %v2118_v48 = vsel %vm284_vm2, %v2006_v51, 0.0  ;;  %v2070_v27 = vsel %vm284_vm2, %v1974_v22, 0.0  ;;  %290 = vst.msk [vmem:[#allocation2 + $0x28] sm:$0xff] %vm284_vm2, %v3387_v34  ;;  %291 = vst.msk [vmem:[#allocation2 + $0x30] sm:$0xff] %vm284_vm2, %v3387_v34 }
 0x7e9   : > { %292 = vst.msk [vmem:[#allocation2 + $0x38] sm:$0xff] %vm284_vm2, %v3387_v34  ;;  %293 = vst.msk [vmem:[#allocation2 + $0x40] sm:$0xff] %vm284_vm2, %v3387_v34 }
 0x7ea   : > { %294 = vst.msk [vmem:[#allocation2 + $0x48] sm:$0xff] %vm284_vm2, %v3387_v34  ;;  %295 = vst.msk [vmem:[#allocation2 + $0x50] sm:$0xff] %vm284_vm2, %v3387_v34 }
 0x7eb   : > { %v2164_v13 = vpop.permute.xlu1 %2163  ;;  %v4854_v58 = vpop.permute.xlu0 %2007  ;;  %296 = vst.msk [vmem:[#allocation2 + $0x58] sm:$0xff] %vm284_vm2, %v3387_v34  ;;  %297 = vst.msk [vmem:[#allocation2 + $0x60] sm:$0xff] %vm284_vm2, %v3387_v34 }
 0x7ec   : > { %v2259_v20 = vsel %vm284_vm2, %v2164_v13, 0.0  ;;  %298 = vst.msk [vmem:[#allocation2 + $0x68] sm:$0xff] %vm284_vm2, %v3387_v34  ;;  %299 = vst.msk [vmem:[#allocation2 + $0x70] sm:$0xff] %vm284_vm2, %v3387_v34  ;;  %v2121_v51 = vsel %vm284_vm2, %v4854_v58, 0.0 }
 0x7ed   : > { %300 = vst.msk [vmem:[#allocation2 + $0x78] sm:$0xff] %vm284_vm2, %v3387_v34  ;;  %302 = vst.msk [vmem:[#allocation2 + $0x88] sm:$0xff] %vm284_vm2, %v3387_v34 }
 0x7ee   : > { %303 = vst.msk [vmem:[#allocation2 + $0x90] sm:$0xff] %vm284_vm2, %v3387_v34  ;;  %304 = vst.msk [vmem:[#allocation2 + $0x98] sm:$0xff] %vm284_vm2, %v3387_v34 }
 0x7ef   : > { %v4856_v12 = vpop.permute.xlu1 %2197  ;;  %v4858_v56 = vpop.permute.xlu0 %1975  ;;  %305 = vst.msk [vmem:[#allocation2 + $0xa0] sm:$0xff] %vm284_vm2, %v3387_v34  ;;  %306 = vst.msk [vmem:[#allocation2 + $0xa8] sm:$0xff] %vm284_vm2, %v3387_v34 }
 0x7f0   : > { %307 = vst.msk [vmem:[#allocation2 + $0xb0] sm:$0xff] %vm284_vm2, %v3387_v34  ;;  %308 = vst.msk [vmem:[#allocation2 + $0xb8] sm:$0xff] %vm284_vm2, %v3387_v34 }
 0x7f1   : > { %309 = vst.msk [vmem:[#allocation2 + $0xc0] sm:$0xff] %vm284_vm2, %v3387_v34  ;;  %310 = vst.msk [vmem:[#allocation2 + $0xc8] sm:$0xff] %vm284_vm2, %v3387_v34 }
 0x7f2   : > { %311 = vst.msk [vmem:[#allocation2 + $0xd0] sm:$0xff] %vm284_vm2, %v3387_v34  ;;  %312 = vst.msk [vmem:[#allocation2 + $0xd8] sm:$0xff] %vm284_vm2, %v3387_v34 }
 0x7f3   : > { %v4860_v61 = vpop.permute.xlu1 %2165  ;;  %v4862_v44 = vpop.permute.xlu0 %2009  ;;  %313 = vst.msk [vmem:[#allocation2 + $0xe0] sm:$0xff] %vm284_vm2, %v3387_v34  ;;  %314 = vst.msk [vmem:[#allocation2 + $0xe8] sm:$0xff] %vm284_vm2, %v3387_v34 }
 0x7f4   : > { %315 = vst.msk [vmem:[#allocation2 + $0xf0] sm:$0xff] %vm284_vm2, %v3387_v34  ;;  %316 = vst.msk [vmem:[#allocation2 + $0xf8] sm:$0xff] %vm284_vm2, %v3387_v34 }
 0x7f7   : > { %v4864_v11 = vpop.permute.xlu1 %2199  ;;  %v4866_v7 = vpop.permute.xlu0 %1977 }
 0x7fb   : > { %v4868_v14 = vpop.permute.xlu1 %2167  ;;  %v4870_v50 = vpop.permute.xlu0 %2011 }
 0x7ff   : > { %v4873_v40 = vpop.permute.xlu1 %2201  ;;  %2116 = vadd.xlane.f32.xlu0 %v2115_v52  ;;  %v4875_v15 = vpop.permute.xlu0 %1979 }
 0x803   : > { %v4881_v6 = vpop.permute.xlu1 %2169  ;;  %1927 = vadd.xlane.f32.xlu0 %v1926_v32  ;;  %1924 = vadd.xlane.f32.xlu1 %v1923_v33  ;;  %v4883_v0 = vpop.permute.xlu0 %2013  ;;  %v1929_v33 = vsel %vm284_vm2, %v4726_v4, 0.0 }
 0x807   : > { %2308 = vadd.xlane.f32.xlu1 %v2307_v24  ;;  %2068 = vadd.xlane.f32.xlu0 %v2067_v21  ;;  %v4887_v52 = vpop.permute.xlu1 %2203  ;;  %v4889_v35 = vpop.permute.xlu0 %1981  ;;  %v2310_v24 = vsel %vm284_vm2, %v4856_v12, 0.0  ;;  %v2262_v21 = vsel %vm284_vm2, %v4860_v61, 0.0  ;;  %v2073_v12 = vsel %vm284_vm2, %v4858_v56, 0.0  ;;  %v2124_v61 = vsel %vm284_vm2, %v4862_v44, 0.0 }
 0x80b   : > { %2260 = vadd.xlane.f32.xlu1 %v2259_v20  ;;  %2119 = vadd.xlane.f32.xlu0 %v2118_v48  ;;  %v4893_v32 = vpop.permute.xlu1 %2171  ;;  %v2016_v4 = vpop.permute.xlu0 %2015  ;;  %v1932_v20 = vsel %vm284_vm2, %v4740_v41, 0.0 }
 0x80f   : > { %1930 = vadd.xlane.f32.xlu0 %v1929_v33  ;;  %2071 = vadd.xlane.f32.xlu1 %v2070_v27  ;;  %v2206_v22 = vpop.permute.xlu1 %2205  ;;  %v1984_v13 = vpop.permute.xlu0 %1983  ;;  %v2313_v33 = vsel %vm284_vm2, %v4864_v11, 0.0  ;;  %v2265_v27 = vsel %vm284_vm2, %v4868_v14, 0.0  ;;  %v2076_v11 = vsel %vm284_vm2, %v4866_v7, 0.0  ;;  %v2127_v14 = vsel %vm284_vm2, %v4870_v50, 0.0 }
 0x813   : > { %2311 = vadd.xlane.f32.xlu0 %v2310_v24  ;;  %2122 = vadd.xlane.f32.xlu1 %v2121_v51  ;;  %v2174_v48 = vpop.permute.xlu1 %2173  ;;  %v2018_v58 = vpop.permute.xlu0 %2017  ;;  %v1935_v24 = vsel %vm284_vm2, %v4738_v19, 0.0  ;;  %v2316_v51 = vsel %vm284_vm2, %v4873_v40, 0.0  ;;  %v1938_v19 = vsel %vm284_vm2, %v4752_v29, 0.0  ;;  %v2079_v40 = vsel %vm284_vm2, %v4875_v15, 0.0 }
 0x817   : > { %2263 = vadd.xlane.f32.xlu0 %v2262_v21  ;;  %1933 = vadd.xlane.f32.xlu1 %v1932_v20  ;;  %v2208_v41 = vpop.permute.xlu1 %2207  ;;  %v1986_v34 = vpop.permute.xlu0 %1985  ;;  %v2268_v21 = vsel %vm284_vm2, %v4881_v6, 0.0  ;;  %v2130_v6 = vsel %vm284_vm2, %v4883_v0, 0.0 }
 0x81b   : > { %2314 = vadd.xlane.f32.xlu1 %v2313_v33  ;;  %2074 = vadd.xlane.f32.xlu0 %v2073_v12  ;;  %v2176_v56 = vpop.permute.xlu1 %2175  ;;  %v2020_v44 = vpop.permute.xlu0 %2019  ;;  %v2319_v33 = vsel %vm284_vm2, %v4887_v52, 0.0  ;;  %v2271_v12 = vsel %vm284_vm2, %v4893_v32, 0.0  ;;  %v2082_v52 = vsel %vm284_vm2, %v4889_v35, 0.0  ;;  %v2133_v32 = vsel %vm284_vm2, %v2016_v4, 0.0 }
 0x81c   : > { %v2325_v35 = vsel %vm284_vm2, %v2208_v41, 0.0  ;;  %v2277_v4 = vsel %vm284_vm2, %v2176_v56, 0.0 }
 0x81f   : > { %2266 = vadd.xlane.f32.xlu1 %v2265_v27  ;;  %2125 = vadd.xlane.f32.xlu0 %v2124_v61  ;;  %v2210_v7 = vpop.permute.xlu1 %2209  ;;  %v1988_v20 = vpop.permute.xlu0 %1987  ;;  %v1941_v27 = vsel %vm284_vm2, %v4746_v25, 0.0 }
 0x823   : > { %1936 = vadd.xlane.f32.xlu0 %v1935_v24  ;;  %2077 = vadd.xlane.f32.xlu1 %v2076_v11  ;;  %v2178_v50 = vpop.permute.xlu1 %2177  ;;  %v2022_v29 = vpop.permute.xlu0 %2021  ;;  %v2322_v24 = vsel %vm284_vm2, %v2206_v22, 0.0  ;;  %v2274_v11 = vsel %vm284_vm2, %v2174_v48, 0.0 }
 0x827   : > { %2317 = vadd.xlane.f32.xlu0 %v2316_v51  ;;  %2128 = vadd.xlane.f32.xlu1 %v2127_v14  ;;  %v2212_v15 = vpop.permute.xlu1 %2211  ;;  %v1990_v61 = vpop.permute.xlu0 %1989  ;;  %v1944_v51 = vsel %vm284_vm2, %v4760_v3, 0.0  ;;  %v2085_v14 = vsel %vm284_vm2, %v1984_v13, 0.0  ;;  %v1947_v3 = vsel %vm284_vm2, %v4758_v42, 0.0  ;;  %v2328_v13 = vsel %vm284_vm2, %v2210_v7, 0.0 }
 0x82b   : > { %2269 = vadd.xlane.f32.xlu0 %v2268_v21  ;;  %1939 = vadd.xlane.f32.xlu1 %v1938_v19  ;;  %v2180_v0 = vpop.permute.xlu1 %2179  ;;  %v2024_v25 = vpop.permute.xlu0 %2023  ;;  %v2136_v19 = vsel %vm284_vm2, %v2018_v58, 0.0  ;;  %v2280_v58 = vsel %vm284_vm2, %v2178_v50, 0.0 }
 0x82f   : > { %2320 = vadd.xlane.f32.xlu1 %v2319_v33  ;;  %2080 = vadd.xlane.f32.xlu0 %v2079_v40  ;;  %v2214_v22 = vpop.permute.xlu1 %2213  ;;  %v1992_v21 = vpop.permute.xlu0 %1991  ;;  %v2088_v33 = vsel %vm284_vm2, %v1986_v34, 0.0  ;;  %v2139_v40 = vsel %vm284_vm2, %v2020_v44, 0.0  ;;  %v2331_v34 = vsel %vm284_vm2, %v2212_v15, 0.0  ;;  %v2283_v44 = vsel %vm284_vm2, %v2180_v0, 0.0 }
 0x833   : > { %2272 = vadd.xlane.f32.xlu1 %v2271_v12  ;;  %2131 = vadd.xlane.f32.xlu0 %v2130_v6  ;;  %v2182_v48 = vpop.permute.xlu1 %2181  ;;  %v2026_v41 = vpop.permute.xlu0 %2025  ;;  %v1950_v6 = vsel %vm284_vm2, %v4772_v49, 0.0  ;;  %v1953_v49 = vsel %vm284_vm2, %v4766_v53, 0.0 }
 0x837   : > { %1942 = vadd.xlane.f32.xlu0 %v1941_v27  ;;  %2083 = vadd.xlane.f32.xlu1 %v2082_v52  ;;  %v2216_v56 = vpop.permute.xlu1 %2215  ;;  %v1994_v12 = vpop.permute.xlu0 %1993  ;;  %v2091_v27 = vsel %vm284_vm2, %v1988_v20, 0.0  ;;  %v2142_v52 = vsel %vm284_vm2, %v2022_v29, 0.0  ;;  %v2334_v20 = vsel %vm284_vm2, %v2214_v22, 0.0  ;;  %v2286_v29 = vsel %vm284_vm2, %v2182_v48, 0.0 }
 0x838   : > { %v2100_v48 = vsel %vm284_vm2, %v1994_v12, 0.0 }
 0x83b   : > { %2323 = vadd.xlane.f32.xlu0 %v2322_v24  ;;  %2134 = vadd.xlane.f32.xlu1 %v2133_v32  ;;  %v2184_v42 = vpop.permute.xlu1 %2183  ;;  %v2028_v7 = vpop.permute.xlu0 %2027  ;;  %v2094_v32 = vsel %vm284_vm2, %v1990_v61, 0.0  ;;  %v2337_v61 = vsel %vm284_vm2, %v2216_v56, 0.0  ;;  %v1962_v56 = vsel %vm284_vm2, %v4792_v60, 0.0 }
 0x83f   : > { %2275 = vadd.xlane.f32.xlu0 %v2274_v11  ;;  %1945 = vadd.xlane.f32.xlu1 %v1944_v51  ;;  %v2218_v50 = vpop.permute.xlu1 %2217  ;;  %v1996_v24 = vpop.permute.xlu0 %1995  ;;  %v2145_v11 = vsel %vm284_vm2, %v2024_v25, 0.0  ;;  %v1956_v51 = vsel %vm284_vm2, %v4780_v26, 0.0  ;;  %v2289_v25 = vsel %vm284_vm2, %v2184_v42, 0.0  ;;  %v1959_v26 = vsel %vm284_vm2, %v4778_v31, 0.0 }
 0x843   : > { %2326 = vadd.xlane.f32.xlu1 %v2325_v35  ;;  %2086 = vadd.xlane.f32.xlu0 %v2085_v14  ;;  %v2186_v15 = vpop.permute.xlu1 %2185  ;;  %v2030_v0 = vpop.permute.xlu0 %2029  ;;  %v2097_v14 = vsel %vm284_vm2, %v1992_v21, 0.0  ;;  %v2340_v21 = vsel %vm284_vm2, %v2218_v50, 0.0 }
 0x847   : > { %2278 = vadd.xlane.f32.xlu1 %v2277_v4  ;;  %2137 = vadd.xlane.f32.xlu0 %v2136_v19  ;;  %v2220_v53 = vpop.permute.xlu1 %2219  ;;  %v1998_v35 = vpop.permute.xlu0 %1997  ;;  %v2148_v4 = vsel %vm284_vm2, %v2026_v41, 0.0  ;;  %v2292_v41 = vsel %vm284_vm2, %v2186_v15, 0.0 }
 0x848   : > { %v2343_v12 = vsel %vm284_vm2, %v2220_v53, 0.0  ;;  %v2106_v50 = vsel %vm284_vm2, %v1998_v35, 0.0  ;;  %v2371_v53 = vld [vmem:[#allocation2 + $0x80] sm:$0xff] }
 0x84b   : > { %1948 = vadd.xlane.f32.xlu0 %v1947_v3  ;;  %2089 = vadd.xlane.f32.xlu1 %v2088_v33  ;;  %v2188_v22 = vpop.permute.xlu1 %2187  ;;  %v2032_v19 = vpop.permute.xlu0 %2031 }
 0x84c   : > { %v2295_v60 = vsel %vm284_vm2, %v2188_v22, 0.0  ;;  %v2157_v15 = vsel %vm284_vm2, %v2032_v19, 0.0 }
 0x84f   : > { %2329 = vadd.xlane.f32.xlu0 %v2328_v13  ;;  %2140 = vadd.xlane.f32.xlu1 %v2139_v40  ;;  %v2222_v3 = vpop.permute.xlu1 %2221  ;;  %v5006_v33 = vpop.permute.xlu0 %1999  ;;  %v2151_v13 = vsel %vm284_vm2, %v2028_v7, 0.0 }
 0x853   : > { %2281 = vadd.xlane.f32.xlu0 %v2280_v58  ;;  %1951 = vadd.xlane.f32.xlu1 %v1950_v6  ;;  %v2190_v40 = vpop.permute.xlu1 %2189  ;;  %v5013_v31 = vpop.permute.xlu0 %2033  ;;  %v2103_v58 = vsel %vm284_vm2, %v1996_v24, 0.0  ;;  %v2346_v24 = vsel %vm284_vm2, %v2222_v3, 0.0 }
 0x857   : > { %2332 = vadd.xlane.f32.xlu1 %v2331_v34  ;;  %2092 = vadd.xlane.f32.xlu0 %v2091_v27  ;;  %v2224_v6 = vpop.permute.xlu1 %2223  ;;  %v5017_v42 = vpop.permute.xlu0 %2001  ;;  %v1914_v34 = vsel %vm284_vm2, %v4712_v43, 0.0  ;;  %v2154_v27 = vsel %vm284_vm2, %v2030_v0, 0.0 }
 0x85b   : > { %2284 = vadd.xlane.f32.xlu1 %v2283_v44  ;;  %2143 = vadd.xlane.f32.xlu0 %v2142_v52  ;;  %v5023_v7 = vpop.permute.xlu1 %2191  ;;  %v1965_v44 = vsel %vm284_vm2, %v4786_v1, 0.0  ;;  %v5027_v52 = vpop.permute.xlu0 %2193 }
 0x85f   : > { %1954 = vadd.xlane.f32.xlu0 %v1953_v49  ;;  %2095 = vadd.xlane.f32.xlu1 %v2094_v32  ;;  %v5031_v43 = vpop.permute.xlu1 %2225  ;;  %v2404_v32 = vsel %vm2387_vm3, %v4010_v45, %v4235_v46 }
 0x860   : > { %v2437_v1 = vsel %vm2420_vm4, %v2404_v32, %v4241_v62  ;;  %v2298_v62 = vsel %vm284_vm2, %v2190_v40, 0.0  ;;  %v5742_v32 = vld [vmem:[#allocation60_spill] sm:$0xff] }
 0x863   : > { %2335 = vadd.xlane.f32.xlu0 %v2334_v20  ;;  %2146 = vadd.xlane.f32.xlu1 %v2145_v11  ;;  %v1917_v20 = vsel %vm284_vm2, %v4706_v36, 0.0  ;;  %v2470_v11 = vsel %vm2453_vm5, %v2437_v1, %v4459_v37  ;;  %v5739_v36 = vld [vmem:[#allocation7_spill] sm:$0xff] }
 0x864   : > { %v2502_v0 = vsel %vm357_vm1, %v2470_v11, %v4619_v10  ;;  %v2388_v37 = vsel %vm2387_vm3, %v5739_v36, %v4127_v57  ;;  %v2109_v57 = vsel %vm284_vm2, %v5006_v33, 0.0  ;;  %v2160_v33 = vsel %vm284_vm2, %v5013_v31, 0.0  ;;  %v5744_v11 = vld [vmem:[#allocation131_spill] sm:$0xff]  ;;  %v5747_v36 = vld [vmem:[#allocation38_spill] sm:$0xff] }
 0x865   : > { %v2421_v10 = vsel %vm2420_vm4, %v2388_v37, %v4130_v38 }
 0x866   : > { %v2454_v22 = vsel %vm2453_vm5, %v2421_v10, %v4419_v55 }
 0x867   : > { %2287 = vadd.xlane.f32.xlu0 %v2286_v29  ;;  %1957 = vadd.xlane.f32.xlu1 %v1956_v51  ;;  %v1968_v51 = vsel %vm284_vm2, %v4800_v8, 0.0 }
 0x86b   : > { %2338 = vadd.xlane.f32.xlu1 %v2337_v61  ;;  %2098 = vadd.xlane.f32.xlu0 %v2097_v14 }
 0x86f   : > { %2290 = vadd.xlane.f32.xlu1 %v2289_v25  ;;  %2149 = vadd.xlane.f32.xlu0 %v2148_v4  ;;  %v2486_v25 = vsel %vm357_vm1, %v2454_v22, %v4581_v59  ;;  %v2349_v4 = vsel %vm284_vm2, %v2224_v6, 0.0  ;;  %v2372_v6 = vld [vmem:[#allocation2 + $0x88] sm:$0xff] }
 0x870   : > { %v2519_v38 = vsel %vm2518_vm6, %v2486_v25, %v4796_v2  ;;  %v2405_v2 = vsel %vm2387_vm3, %v4034_v5, %v4281_v28  ;;  %v2301_v28 = vsel %vm284_vm2, %v5023_v7, 0.0  ;;  %v5740_v5 = vld [vmem:[#allocation5_spill] sm:$0xff]  ;;  %v2304_v7 = vsel %vm284_vm2, %v5027_v52, 0.0 }
 0x873   : > { %1960 = vadd.xlane.f32.xlu0 %v1959_v26  ;;  %2101 = vadd.xlane.f32.xlu1 %v2100_v48  ;;  %v2355_v26 = vld [vmem:[#allocation2] sm:$0xff] }
 0x877   : > { %2341 = vadd.xlane.f32.xlu0 %v2340_v21  ;;  %2152 = vadd.xlane.f32.xlu1 %v2151_v13  ;;  %v1920_v13 = vsel %vm284_vm2, %v4720_v63, 0.0  ;;  %v2112_v63 = vsel %vm284_vm2, %v5017_v42, 0.0 }
 0x87b   : > { %2293 = vadd.xlane.f32.xlu0 %v2292_v41  ;;  %1963 = vadd.xlane.f32.xlu1 %v1962_v56  ;;  %v2438_v41 = vsel %vm2420_vm4, %v2405_v2, %v4285_v54  ;;  %v2389_v54 = vsel %vm2387_vm3, %v5740_v5, %v4185_v39  ;;  %v5753_v2 = vld [vmem:[#allocation70_spill] sm:$0xff]  ;;  %v5756_v5 = vld [vmem:[#allocation35_spill] sm:$0xff] }
 0x87c   : > { %v2471_v31 = vsel %vm2453_vm5, %v2438_v41, %v4457_v18  ;;  %v2422_v18 = vsel %vm2420_vm4, %v2389_v54, %v4193_v16  ;;  %v5741_v16 = vld [vmem:[#allocation22_spill] sm:$0xff] }
 0x87d   : > { %v2455_v42 = vsel %vm2453_vm5, %v2422_v18, %v4429_v30  ;;  %v2356_v30 = vld [vmem:[#allocation2 + $0x8] sm:$0xff]  ;;  %v5757_v54 = vld [vmem:[#allocation6_spill] sm:$0xff] }
 0x87e   : > { %v2487_v39 = vsel %vm357_vm1, %v2455_v42, %v4589_v9  ;;  %v2374_v18 = vld [vmem:[#allocation2 + $0x98] sm:$0xff] }
 0x87f   : > { %2344 = vadd.xlane.f32.xlu1 %v2343_v12  ;;  %2104 = vadd.xlane.f32.xlu0 %v2103_v58  ;;  %v2503_v12 = vsel %vm357_vm1, %v2471_v31, %v4617_v17  ;;  %v5754_v31 = vld [vmem:[#allocation102_spill] sm:$0xff] }
 0x883   : > { %1915 = vadd.xlane.f32.xlu0 %v1914_v34  ;;  %2155 = vadd.xlane.f32.xlu1 %v2154_v27 }
 0x887   : > { %2296 = vadd.xlane.f32.xlu0 %v2295_v60  ;;  %1966 = vadd.xlane.f32.xlu1 %v1965_v44  ;;  %v2352_v44 = vsel %vm284_vm2, %v5031_v43, 0.0 }
 0x88b   : > { %2347 = vadd.xlane.f32.xlu1 %v2346_v24  ;;  %2107 = vadd.xlane.f32.xlu0 %v2106_v50  ;;  %v2406_v24 = vsel %vm2387_vm3, %v5741_v16, %v4247_v23 }
 0x88c   : > { %v2117_v49 = vpop.xlane.xlu0 %2116  ;;  %v2439_v9 = vsel %vm2420_vm4, %v2406_v24, %v5742_v32 }
 0x88f   : > { %1918 = vadd.xlane.f32.xlu0 %v1917_v20  ;;  %2158 = vadd.xlane.f32.xlu1 %v2157_v15  ;;  %v5743_v15 = vld [vmem:[#allocation103_spill] sm:$0xff] }
 0x890   : > { %v1925_v29 = vpop.xlane.xlu1 %1924  ;;  %v1928_v45 = vpop.xlane.xlu0 %1927  ;;  %v2472_v20 = vsel %vm2453_vm5, %v2439_v9, %v5743_v15  ;;  %v5763_v9 = vld [vmem:[#allocation145_spill] sm:$0xff] }
 0x891   : > { %v2535_v46 = vsel %vm2518_vm6, %v2502_v0, %v1925_v29  ;;  %v2536_v58 = vsel %vm2518_vm6, %v2503_v12, %v1928_v45  ;;  %v5745_v29 = vld [vmem:[#allocation37_spill] sm:$0xff]  ;;  %v5746_v45 = vld [vmem:[#allocation8_spill] sm:$0xff] }
 0x892   : > { %v2568_v61 = vsel %vm2551_vm7, %v2535_v46, %v2117_v49  ;;  %v2520_v49 = vsel %vm2518_vm6, %v2487_v39, %v4808_v47  ;;  %v2504_v47 = vsel %vm357_vm1, %v2472_v20, %v5744_v11  ;;  %v2390_v46 = vsel %vm2387_vm3, %v5746_v45, %v5745_v29  ;;  %v5759_v39 = vld [vmem:[#allocation89_spill] sm:$0xff] }
 0x893   : > { %2299 = vadd.xlane.f32.xlu0 %v2298_v62  ;;  %1969 = vadd.xlane.f32.xlu1 %v1968_v51  ;;  %v2373_v51 = vld [vmem:[#allocation2 + $0x90] sm:$0xff]  ;;  %v2423_v37 = vsel %vm2420_vm4, %v2390_v46, %v5747_v36  ;;  %v5768_v36 = vld [vmem:[#allocation10_spill] sm:$0xff] }
 0x894   : > { %v2309_v35 = vpop.xlane.xlu1 %2308  ;;  %v2069_v14 = vpop.xlane.xlu0 %2068  ;;  %v5766_v45 = vld [vmem:[#allocation133_spill] sm:$0xff] }
 0x895   : > { %v2601_v8 = vsel %vm2584_vm8, %v2568_v61, %v2309_v35  ;;  %v2552_v55 = vsel %vm2551_vm7, %v2519_v38, %v2069_v14  ;;  %v5748_v61 = vld [vmem:[#allocation88_spill] sm:$0xff]  ;;  %v2357_v38 = vld [vmem:[#allocation2 + $0x10] sm:$0xff] }
 0x896   : > { %v2633_v19 = vadd.f32 %v2601_v8, %v2371_v53  ;;  %v2456_v14 = vsel %vm2453_vm5, %v2423_v37, %v5748_v61  ;;  %v5749_v8 = vld [vmem:[#allocation116_spill] sm:$0xff] }
 0x897   : > { %2350 = vadd.xlane.f32.xlu1 %v2349_v4  ;;  %2110 = vadd.xlane.f32.xlu0 %v2109_v57  ;;  %v2488_v25 = vsel %vm357_vm1, %v2456_v14, %v5749_v8  ;;  %v5750_v4 = vld [vmem:[#allocation144_spill] sm:$0xff] }
 0x898   : > { %2665 = vst.msk [vmem:[#allocation2 + $0x80] sm:$0xff] %vm284_vm2, %v2633_v19  ;;  %v2261_v48 = vpop.xlane.xlu1 %2260  ;;  %v2120_v3 = vpop.xlane.xlu0 %2119  ;;  %v2521_v19 = vsel %vm2518_vm6, %v2488_v25, %v5750_v4  ;;  %v5770_v25 = vld [vmem:[#allocation91_spill] sm:$0xff] }
 0x899   : > { %v2585_v59 = vsel %vm2584_vm8, %v2552_v55, %v2261_v48  ;;  %v2569_v17 = vsel %vm2551_vm7, %v2536_v58, %v2120_v3  ;;  %v2391_v58 = vsel %vm2387_vm3, %v5757_v54, %v5756_v5 }
 0x89a   : > { %v2617_v21 = vadd.f32 %v2585_v59, %v2355_v26 }
 0x89b   : > { %1921 = vadd.xlane.f32.xlu0 %v1920_v13  ;;  %2161 = vadd.xlane.f32.xlu1 %v2160_v33  ;;  %v5751_v33 = vld [vmem:[#allocation68_spill] sm:$0xff] }
 0x89c   : > { %2649 = vst.msk [vmem:[#allocation2] sm:$0xff] %vm284_vm2, %v2617_v21  ;;  %v2072_v40 = vpop.xlane.xlu1 %2071  ;;  %v1931_v56 = vpop.xlane.xlu0 %1930  ;;  %v5752_v21 = vld [vmem:[#allocation24_spill] sm:$0xff] }
 0x89d   : > { %v2553_v1 = vsel %vm2551_vm7, %v2520_v49, %v2072_v40  ;;  %v2537_v62 = vsel %vm2518_vm6, %v2504_v47, %v1931_v56  ;;  %v2407_v13 = vsel %vm2387_vm3, %v5752_v21, %v5751_v33  ;;  %v5761_v49 = vld [vmem:[#allocation62_spill] sm:$0xff]  ;;  %v5765_v47 = vld [vmem:[#allocation105_spill] sm:$0xff] }
 0x89e   : > { %v2440_v41 = vsel %vm2420_vm4, %v2407_v13, %v5753_v2  ;;  %v3324_v13 = vld [vmem:[%s3445_s27 + $0x80] sm:$0xff]  ;;  %v3325_v2 = vld [vmem:[%s3445_s27 + $0x88] sm:$0xff] }
 0x89f   : > { %2302 = vadd.xlane.f32.xlu0 %v2301_v28  ;;  %2113 = vadd.xlane.f32.xlu1 %v2112_v63  ;;  %v2473_v12 = vsel %vm2453_vm5, %v2440_v41, %v5754_v31  ;;  %v5755_v63 = vld [vmem:[#allocation130_spill] sm:$0xff]  ;;  %v3159_v41 = vpack.c.bf16 %v3325_v2, %v3324_v13  ;;  %v5786_v13 = vld [vmem:[#allocation65_spill] sm:$0xff] }
 0x8a0   : > { %v2123_v34 = vpop.xlane.xlu1 %2122  ;;  %v2312_v27 = vpop.xlane.xlu0 %2311  ;;  %v2505_v28 = vsel %vm357_vm1, %v2473_v12, %v5755_v63  ;;  %v3328_v12 = vld [vmem:[%s3445_s27 + $0x90] sm:$0xff]  ;;  %v3329_v63 = vld [vmem:[%s3445_s27 + $0x98] sm:$0xff] }
 0x8a1   : > { %v2602_v60 = vsel %vm2584_vm8, %v2569_v17, %v2312_v27  ;;  %v2570_v53 = vsel %vm2551_vm7, %v2537_v62, %v2123_v34  ;;  %v5758_v17 = vld [vmem:[#allocation36_spill] sm:$0xff]  ;;  %3160 = vmatprep.subr.bf16.mxu1 %v3159_v41 }
 0x8a2   : > { %v2634_v50 = vadd.f32 %v2602_v60, %v2372_v6  ;;  %v2424_v34 = vsel %vm2420_vm4, %v2391_v58, %v5758_v17  ;;  %v5773_v58 = vld [vmem:[#allocation72_spill] sm:$0xff]  ;;  %v3330_v17 = vld [vmem:[%s3445_s27 + $0x10] sm:$0xff] }
 0x8a3   : > { %2353 = vadd.xlane.f32.xlu0 %v2352_v44  ;;  %2305 = vadd.xlane.f32.xlu1 %v2304_v7  ;;  %v2457_v7 = vsel %vm2453_vm5, %v2424_v34, %v5759_v39  ;;  %v3331_v34 = vld [vmem:[%s3445_s27 + $0x18] sm:$0xff] }
 0x8a4   : > { %2666 = vst.msk [vmem:[#allocation2 + $0x88] sm:$0xff] %vm284_vm2, %v2634_v50  ;;  %v1934_v52 = vpop.xlane.xlu1 %1933  ;;  %v2264_v43 = vpop.xlane.xlu0 %2263  ;;  %v5760_v50 = vld [vmem:[#allocation117_spill] sm:$0xff] }
 0x8a5   : > { %v2586_v23 = vsel %vm2584_vm8, %v2553_v1, %v2264_v43  ;;  %v2538_v6 = vsel %vm2518_vm6, %v2505_v28, %v1934_v52  ;;  %v2489_v16 = vsel %vm357_vm1, %v2457_v7, %v5760_v50  ;;  %v2358_v52 = vld [vmem:[#allocation2 + $0x18] sm:$0xff]  ;;  %v5764_v43 = vld [vmem:[#allocation63_spill] sm:$0xff]  ;;  %v3163_v28 = vpack.c.bf16 %v3329_v63, %v3328_v12  ;;  %v3333_v50 = vld [vmem:[%s3445_s27 + $0xa8] sm:$0xff] }
 0x8a6   : > { %v2618_v0 = vadd.f32 %v2586_v23, %v2356_v30  ;;  %v5762_v30 = vld [vmem:[#allocation23_spill] sm:$0xff]  ;;  %v2522_v1 = vsel %vm2518_vm6, %v2489_v16, %v5763_v9  ;;  %v5778_v9 = vld [vmem:[#allocation48_spill] sm:$0xff] }
 0x8a7   : > { %v2408_v32 = vsel %vm2387_vm3, %v5762_v30, %v5761_v49  ;;  %v5777_v30 = vld [vmem:[#allocation132_spill] sm:$0xff]  ;;  %v3340_v12 = vld [vmem:[%s3445_s27 + $0xc0] sm:$0xff] }
 0x8a8   : > { %2650 = vst.msk [vmem:[#allocation2 + $0x8] sm:$0xff] %vm284_vm2, %v2618_v0  ;;  %v2315_v10 = vpop.xlane.xlu1 %2314  ;;  %v2075_v35 = vpop.xlane.xlu0 %2074  ;;  %v2441_v15 = vsel %vm2420_vm4, %v2408_v32, %v5764_v43  ;;  %v3341_v63 = vld [vmem:[%s3445_s27 + $0xc8] sm:$0xff] }
 0x8a9   : > { %v2603_v22 = vsel %vm2584_vm8, %v2570_v53, %v2315_v10  ;;  %v2554_v26 = vsel %vm2551_vm7, %v2521_v19, %v2075_v35  ;;  %v2474_v0 = vsel %vm2453_vm5, %v2441_v15, %v5765_v47  ;;  %v2375_v10 = vld [vmem:[#allocation2 + $0xa0] sm:$0xff]  ;;  %v5769_v35 = vld [vmem:[#allocation40_spill] sm:$0xff] }
 0x8aa   : > { %v2635_v57 = vadd.f32 %v2603_v22, %v2373_v51  ;;  %v2506_v46 = vsel %vm357_vm1, %v2474_v0, %v5766_v45  ;;  %v5767_v51 = vld [vmem:[#allocation39_spill] sm:$0xff]  ;;  %v2376_v15 = vld [vmem:[#allocation2 + $0xa8] sm:$0xff] }
 0x8ab   : > { %v2392_v37 = vsel %vm2387_vm3, %v5768_v36, %v5767_v51  ;;  %v5771_v19 = vld [vmem:[#allocation119_spill] sm:$0xff]  ;;  %v3335_v47 = vld [vmem:[%s3445_s27 + $0x28] sm:$0xff]  ;;  %v3336_v36 = vld [vmem:[%s3445_s27 + $0xb0] sm:$0xff] }
 0x8ac   : > { %2667 = vst.msk [vmem:[#allocation2 + $0x90] sm:$0xff] %vm284_vm2, %v2635_v57  ;;  %v2267_v55 = vpop.xlane.xlu1 %2266  ;;  %v2126_v48 = vpop.xlane.xlu0 %2125  ;;  %v2425_v61 = vsel %vm2420_vm4, %v2392_v37, %v5769_v35  ;;  %v3337_v37 = vld [vmem:[%s3445_s27 + $0xb8] sm:$0xff] }
 0x8ad   : > { %v2587_v3 = vsel %vm2584_vm8, %v2554_v26, %v2267_v55  ;;  %v2571_v27 = vsel %vm2551_vm7, %v2538_v6, %v2126_v48  ;;  %v2458_v57 = vsel %vm2453_vm5, %v2425_v61, %v5770_v25  ;;  %v5772_v55 = vld [vmem:[#allocation147_spill] sm:$0xff]  ;;  %v5774_v6 = vld [vmem:[#allocation26_spill] sm:$0xff] }
 0x8ae   : > { %v2619_v59 = vadd.f32 %v2587_v3, %v2357_v38  ;;  %v2490_v38 = vsel %vm357_vm1, %v2458_v57, %v5771_v19  ;;  %v2359_v3 = vld [vmem:[#allocation2 + $0x20] sm:$0xff]  ;;  %v5784_v19 = vld [vmem:[#allocation25_spill] sm:$0xff] }
 0x8af   : > { %v2523_v48 = vsel %vm2518_vm6, %v2490_v38, %v5772_v55  ;;  %v2700_v61 = vld [vmem:[#allocation2 + $0x80] sm:$0xff] }
 0x8b0   : > { %2651 = vst.msk [vmem:[#allocation2 + $0x10] sm:$0xff] %vm284_vm2, %v2619_v59  ;;  %v2078_v40 = vpop.xlane.xlu1 %2077  ;;  %v1937_v56 = vpop.xlane.xlu0 %1936 }
 0x8b1   : > { %v2555_v20 = vsel %vm2551_vm7, %v2522_v1, %v2078_v40  ;;  %v2539_v53 = vsel %vm2518_vm6, %v2506_v46, %v1937_v56  ;;  %v3326_v40 = vld [vmem:[%s3445_s27] sm:$0xff]  ;;  %v3327_v56 = vld [vmem:[%s3445_s27 + $0x8] sm:$0xff] }
 0x8b2   : > { %v3161_v31 = vpack.c.bf16 %v3327_v56, %v3326_v40  ;;  %v5779_v1 = vld [vmem:[#allocation11_spill] sm:$0xff] }
 0x8b4   : > { %v2129_v42 = vpop.xlane.xlu1 %2128  ;;  %v2318_v60 = vpop.xlane.xlu0 %2317  ;;  %3162 = vmatpush3.bf16.msra.mxu1 %v3161_v31 }
 0x8b5   : > { %v2604_v44 = vsel %vm2584_vm8, %v2571_v27, %v2318_v60  ;;  %v2572_v14 = vsel %vm2551_vm7, %v2539_v53, %v2129_v42  ;;  %v3165_v27 = vpack.c.bf16 %v3331_v34, %v3330_v17  ;;  %v5775_v42 = vld [vmem:[#allocation74_spill] sm:$0xff]  ;;  %3164 = vmatprep.subr.bf16.mxu1 %v3163_v28  ;;  %v3171_v53 = vpack.c.bf16 %v3337_v37, %v3336_v36  ;;  %v2701_v34 = vld [vmem:[#allocation2 + $0x88] sm:$0xff] }
 0x8b6   : > { %v2636_v24 = vadd.f32 %v2604_v44, %v2374_v18  ;;  %v2409_v18 = vsel %vm2387_vm3, %v5774_v6, %v5773_v58  ;;  %v3332_v44 = vld [vmem:[%s3445_s27 + $0xa0] sm:$0xff]  ;;  %v3175_v28 = vpack.c.bf16 %v3341_v63, %v3340_v12  ;;  %v3351_v63 = vld [vmem:[%s3445_s27 + $0x68] sm:$0xff] }
 0x8b7   : > { %v2442_v60 = vsel %vm2420_vm4, %v2409_v18, %v5775_v42  ;;  %v3167_v16 = vpack.c.bf16 %v3333_v50, %v3332_v44  ;;  %v5789_v6 = vld [vmem:[#allocation107_spill] sm:$0xff]  ;;  %v5791_v50 = vld [vmem:[#allocation42_spill] sm:$0xff] }
 0x8b8   : > { %2668 = vst.msk [vmem:[#allocation2 + $0x98] sm:$0xff] %vm284_vm2, %v2636_v24  ;;  %v1940_v23 = vpop.xlane.xlu1 %1939  ;;  %v2270_v11 = vpop.xlane.xlu0 %2269  ;;  %v5776_v24 = vld [vmem:[#allocation104_spill] sm:$0xff]  ;;  %3166 = vmatpush3.bf16.msra.mxu1 %v3165_v27  ;;  %v5790_v27 = vld [vmem:[#allocation135_spill] sm:$0xff] }
 0x8b9   : > { %v2588_v29 = vsel %vm2584_vm8, %v2555_v20, %v2270_v11  ;;  %v2475_v49 = vsel %vm2453_vm5, %v2442_v60, %v5776_v24  ;;  %v2684_v20 = vld [vmem:[#allocation2] sm:$0xff]  ;;  %3168 = vmatprep.subr.bf16.mxu1 %v3167_v16 }
 0x8ba   : > { %v2620_v62 = vadd.f32 %v2588_v29, %v2358_v52  ;;  %v2507_v32 = vsel %vm357_vm1, %v2475_v49, %v5777_v30  ;;  %v2393_v52 = vsel %vm2387_vm3, %v5779_v1, %v5778_v9  ;;  %v3334_v11 = vld [vmem:[%s3445_s27 + $0x20] sm:$0xff]  ;;  %v5780_v29 = vld [vmem:[#allocation50_spill] sm:$0xff]  ;;  %v2377_v49 = vld [vmem:[#allocation2 + $0xb0] sm:$0xff] }
 0x8bb   : > { %v2540_v43 = vsel %vm2518_vm6, %v2507_v32, %v1940_v23  ;;  %v3169_v0 = vpack.c.bf16 %v3335_v47, %v3334_v11  ;;  %v2426_v45 = vsel %vm2420_vm4, %v2393_v52, %v5780_v29  ;;  %v5781_v23 = vld [vmem:[#allocation90_spill] sm:$0xff]  ;;  %v2686_v30 = vld [vmem:[#allocation2 + $0x10] sm:$0xff]  ;;  %v3342_v32 = vld [vmem:[%s3445_s27 + $0x40] sm:$0xff] }
 0x8bc   : > { %2652 = vst.msk [vmem:[#allocation2 + $0x18] sm:$0xff] %vm284_vm2, %v2620_v62  ;;  %v2321_v22 = vpop.xlane.xlu1 %2320  ;;  %v2081_v8 = vpop.xlane.xlu0 %2080  ;;  %v3343_v9 = vld [vmem:[%s3445_s27 + $0x48] sm:$0xff]  ;;  %v3344_v11 = vld [vmem:[%s3445_s27 + $0xd0] sm:$0xff]  ;;  %v3350_v12 = vld [vmem:[%s3445_s27 + $0x60] sm:$0xff] }
 0x8bd   : > { %v2605_v4 = vsel %vm2584_vm8, %v2572_v14, %v2321_v22  ;;  %v2556_v59 = vsel %vm2551_vm7, %v2523_v48, %v2081_v8  ;;  %v5225_v14 = vld [vmem:[%s5573_s4] ss:$0 sm:$0xff]  ;;  %v5782_v22 = vld [vmem:[#allocation118_spill] sm:$0xff]  ;;  %v2360_v48 = vld [vmem:[#allocation2 + $0x28] sm:$0xff]  ;;  %3170 = vmatpush3.bf16.msra.mxu1 %v3169_v0  ;;  %v3177_v1 = vpack.c.bf16 %v3343_v9, %v3342_v32 }
 0x8be   : > { %v2637_v26 = vadd.f32 %v2605_v4, %v2375_v10  ;;  %v2459_v10 = vsel %vm2453_vm5, %v2426_v45, %v5781_v23  ;;  %v2723_v57 = vadd.f32 %v5225_v14, %v2684_v20  ;;  %v5783_v4 = vld [vmem:[#allocation64_spill] sm:$0xff]  ;;  %v2739_v31 = vadd.f32 %v5225_v14, %v2700_v61  ;;  %3172 = vmatprep.subr.bf16.mxu1 %v3171_v53  ;;  %v5792_v0 = vld [vmem:[#allocation93_spill] sm:$0xff] }
 0x8bf   : > { %v2491_v8 = vsel %vm357_vm1, %v2459_v10, %v5782_v22  ;;  %v2410_v38 = vsel %vm2387_vm3, %v5784_v19, %v5783_v4  ;;  %v2740_v20 = vadd.f32 %v5225_v14, %v2701_v34  ;;  %v2725_v53 = vadd.f32 %v5225_v14, %v2686_v30  ;;  %v5794_v23 = vld [vmem:[#allocation149_spill] sm:$0xff]  ;;  %v3353_v34 = vld [vmem:[%s3445_s27 + $0xf8] sm:$0xff] }
 0x8c0   : > { %2669 = vst.msk [vmem:[#allocation2 + $0xa0] sm:$0xff] %vm284_vm2, %v2637_v26  ;;  %v2273_v33 = vpop.xlane.xlu1 %2272  ;;  %v2132_v21 = vpop.xlane.xlu0 %2131  ;;  %v5785_v26 = vld [vmem:[#allocation146_spill] sm:$0xff]  ;;  %v2443_v2 = vsel %vm2420_vm4, %v2410_v38, %v5786_v13  ;;  %v3346_v22 = vld [vmem:[%s3445_s27 + $0x50] sm:$0xff] }
 0x8c1   : > { %v2589_v5 = vsel %vm2584_vm8, %v2556_v59, %v2273_v33  ;;  %v2573_v46 = vsel %vm2551_vm7, %v2540_v43, %v2132_v21  ;;  %v2524_v55 = vsel %vm2518_vm6, %v2491_v8, %v5785_v26  ;;  %v3338_v59 = vld [vmem:[%s3445_s27 + $0x30] sm:$0xff]  ;;  %v3339_v33 = vld [vmem:[%s3445_s27 + $0x38] sm:$0xff]  ;;  %v2476_v18 = vsel %vm2453_vm5, %v2443_v2, %v5789_v6  ;;  %v3348_v26 = vld [vmem:[%s3445_s27 + $0xe0] sm:$0xff] }
 0x8c2   : > { %v2621_v54 = vadd.f32 %v2589_v5, %v2359_v3  ;;  %v2685_v3 = vld [vmem:[#allocation2 + $0x8] sm:$0xff]  ;;  %v3173_v21 = vpack.c.bf16 %v3339_v33, %v3338_v59  ;;  %v5787_v5 = vld [vmem:[#allocation41_spill] sm:$0xff]  ;;  %v2508_v42 = vsel %vm357_vm1, %v2476_v18, %v5790_v27  ;;  %v3347_v8 = vld [vmem:[%s3445_s27 + $0x58] sm:$0xff] }
 0x8c3   : > { %v2724_v44 = vadd.f32 %v5225_v14, %v2685_v3  ;;  %v2687_v61 = vld [vmem:[#allocation2 + $0x18] sm:$0xff]  ;;  %v5795_v2 = vld [vmem:[#allocation76_spill] sm:$0xff]  ;;  %v5801_v30 = vld [vmem:[#allocation13_spill] sm:$0xff] }
 0x8c4   : > { %2653 = vst.msk [vmem:[#allocation2 + $0x20] sm:$0xff] %vm284_vm2, %v2621_v54  ;;  %v2084_v39 = vpop.xlane.xlu1 %2083  ;;  %v1943_v7 = vpop.xlane.xlu0 %1942  ;;  %v5788_v54 = vld [vmem:[#allocation12_spill] sm:$0xff]  ;;  %3174 = vmatpush3.bf16.msra.mxu1 %v3173_v21  ;;  %v2703_v59 = vld [vmem:[#allocation2 + $0x98] sm:$0xff]  ;;  %v2726_v13 = vadd.f32 %v5225_v14, %v2687_v61 }
 0x8c5   : > { %v2557_v41 = vsel %vm2551_vm7, %v2524_v55, %v2084_v39  ;;  %v2394_v58 = vsel %vm2387_vm3, %v5788_v54, %v5787_v5  ;;  %v3223_v39 = vpack.i.bf16 %v2723_v57, %v2739_v31  ;;  %v2541_v24 = vsel %vm2518_vm6, %v2508_v42, %v1943_v7  ;;  %3176 = vmatprep.subr.bf16.mxu1 %v3175_v28  ;;  %v3345_v7 = vld [vmem:[%s3445_s27 + $0xd8] sm:$0xff]  ;;  %v3349_v55 = vld [vmem:[%s3445_s27 + $0xe8] sm:$0xff] }
 0x8c6   : > { %v2427_v16 = vsel %vm2420_vm4, %v2394_v58, %v5791_v50  ;;  %v3179_v47 = vpack.c.bf16 %v3345_v7, %v3344_v11  ;;  %v3225_v37 = vpack.i.bf16 %v2724_v44, %v2740_v20  ;;  %v3185_v28 = vpack.c.bf16 %v3351_v63, %v3350_v12  ;;  %v5797_v5 = vld [vmem:[#allocation78_spill] sm:$0xff] }
 0x8c7   : > { %v2460_v29 = vsel %vm2453_vm5, %v2427_v16, %v5792_v0  ;;  %v2742_v18 = vadd.f32 %v5225_v14, %v2703_v59  ;;  %v5798_v42 = vld [vmem:[#allocation106_spill] sm:$0xff]  ;;  %v5803_v0 = vld [vmem:[#allocation92_spill] sm:$0xff] }
 0x8c8   : > { %v2135_v62 = vpop.xlane.xlu1 %2134  ;;  %v2324_v51 = vpop.xlane.xlu0 %2323  ;;  %3178 = vmatpush3.bf16.msra.mxu1 %v3177_v1  ;;  %v5799_v44 = vld [vmem:[#allocation134_spill] sm:$0xff] }
 0x8c9   : > { %v2606_v35 = vsel %vm2584_vm8, %v2573_v46, %v2324_v51  ;;  %v2574_v52 = vsel %vm2551_vm7, %v2541_v24, %v2135_v62  ;;  %v2702_v46 = vld [vmem:[#allocation2 + $0x90] sm:$0xff]  ;;  %3180 = vmatprep.subr.bf16.mxu1 %v3179_v47  ;;  %v3229_v16 = vpack.i.bf16 %v2726_v13, %v2742_v18  ;;  %v2378_v1 = vld [vmem:[#allocation2 + $0xb8] sm:$0xff] }
 0x8ca   : > { %v2638_v25 = vadd.f32 %v2606_v35, %v2376_v15  ;;  %v5793_v62 = vld [vmem:[#allocation121_spill] sm:$0xff]  ;;  %v2741_v38 = vadd.f32 %v5225_v14, %v2702_v46  ;;  %v5804_v46 = vld [vmem:[#allocation120_spill] sm:$0xff] }
 0x8cb   : > { %v2492_v51 = vsel %vm357_vm1, %v2460_v29, %v5793_v62  ;;  %v2361_v35 = vld [vmem:[#allocation2 + $0x30] sm:$0xff]  ;;  %v2688_v31 = vld [vmem:[#allocation2 + $0x20] sm:$0xff] }
 0x8cc   : > { %2670 = vst.msk [vmem:[#allocation2 + $0xa8] sm:$0xff] %vm284_vm2, %v2638_v25  ;;  %v5241_v40 = vpop.xlane.xlu1 %1945  ;;  %v2276_v56 = vpop.xlane.xlu0 %2275  ;;  %v2525_v10 = vsel %vm2518_vm6, %v2492_v51, %v5794_v23  ;;  %v3181_v25 = vpack.c.bf16 %v3347_v8, %v3346_v22  ;;  %v3227_v21 = vpack.i.bf16 %v2725_v53, %v2741_v38  ;;  %v2727_v24 = vadd.f32 %v5225_v14, %v2688_v31  ;;  %v5805_v53 = vld [vmem:[#allocation66_spill] sm:$0xff]  ;;  %v5806_v23 = vld [vmem:[#allocation27_spill] sm:$0xff] }
 0x8cd   : > { %v2590_v17 = vsel %vm2584_vm8, %v2557_v41, %v2276_v56  ;;  %v5796_v41 = vld [vmem:[#allocation28_spill] sm:$0xff]  ;;  %v2362_v22 = vld [vmem:[#allocation2 + $0x38] sm:$0xff] }
 0x8ce   : > { %v2622_v60 = vadd.f32 %v2590_v17, %v2360_v48  ;;  %v3183_v48 = vpack.c.bf16 %v3349_v55, %v3348_v26  ;;  %v2411_v56 = vsel %vm2387_vm3, %v5796_v41, %v5795_v2  ;;  %3182 = vmatpush3.bf16.msra.mxu1 %v3181_v25  ;;  %v3352_v17 = vld [vmem:[%s3445_s27 + $0xf0] sm:$0xff]  ;;  %v5808_v25 = vld [vmem:[#allocation67_spill] sm:$0xff]  ;;  %v5812_v31 = vld [vmem:[#allocation14_spill] sm:$0xff] }
 0x8cf   : > { %v2444_v54 = vsel %vm2420_vm4, %v2411_v56, %v5797_v5  ;;  %v3187_v27 = vpack.c.bf16 %v3353_v34, %v3352_v17  ;;  %v5809_v55 = vld [vmem:[#allocation109_spill] sm:$0xff]  ;;  %v5811_v56 = vld [vmem:[#allocation43_spill] sm:$0xff] }
 0x8d0   : > { %2654 = vst.msk [vmem:[#allocation2 + $0x28] sm:$0xff] %vm284_vm2, %v2622_v60  ;;  %v2327_v43 = vpop.xlane.xlu1 %2326  ;;  %3224 = vxpose.xlu0.b32.start [1/16] (narrow) %v3223_v39, 8  ;;  %v2087_v15 = vpop.xlane.xlu0 %2086  ;;  %3184 = vmatprep.subr.bf16.mxu1 %v3183_v48  ;;  %v2477_v60 = vsel %vm2453_vm5, %v2444_v54, %v5798_v42  ;;  %v2704_v39 = vld [vmem:[#allocation2 + $0xa0] sm:$0xff]  ;;  %v2396_v12 = vsel %vm2387_vm3, %v5812_v31, %v5811_v56  ;;  %v5813_v5 = vld [vmem:[#allocation45_spill] sm:$0xff]  ;;  %v2364_v31 = vld [vmem:[#allocation2 + $0x48] sm:$0xff] }
 0x8d1   : > { %v2607_v45 = vsel %vm2584_vm8, %v2574_v52, %v2327_v43  ;;  %v2558_v57 = vsel %vm2551_vm7, %v2525_v10, %v2087_v15  ;;  %v2509_v50 = vsel %vm357_vm1, %v2477_v60, %v5799_v44  ;;  %v5802_v43 = vld [vmem:[#allocation54_spill] sm:$0xff]  ;;  %v2743_v47 = vadd.f32 %v5225_v14, %v2704_v39  ;;  %v5815_v39 = vld [vmem:[#allocation123_spill] sm:$0xff] }
 0x8d2   : > { %v2639_v36 = vadd.f32 %v2607_v45, %v2377_v49  ;;  %v5800_v49 = vld [vmem:[#allocation52_spill] sm:$0xff]  ;;  %v2542_v9 = vsel %vm2518_vm6, %v2509_v50, %v5241_v40  ;;  %3186 = vmatpush3.bf16.msra.mxu1 %v3185_v28  ;;  %v2412_v10 = vsel %vm2387_vm3, %v5806_v23, %v5805_v53  ;;  %v2379_v28 = vld [vmem:[#allocation2 + $0xc0] sm:$0xff]  ;;  %v2429_v54 = vsel %vm2420_vm4, %v2396_v12, %v5813_v5 }
 0x8d3   : > { %v2395_v32 = vsel %vm2387_vm3, %v5801_v30, %v5800_v49  ;;  %3188 = vmatprep.subr.bf16.mxu1 %v3187_v27  ;;  %v2705_v40 = vld [vmem:[#allocation2 + $0xa8] sm:$0xff]  ;;  %v5814_v27 = vld [vmem:[#allocation95_spill] sm:$0xff] }
 0x8d4   : > { %2671 = vst.msk [vmem:[#allocation2 + $0xb0] sm:$0xff] %vm284_vm2, %v2639_v36  ;;  %v2279_v4 = vpop.xlane.xlu1 %2278  ;;  %3226 = vxpose.xlu0.b32.cont [2/16] (narrow) %v3225_v37, 8  ;;  %v2138_v19 = vpop.xlane.xlu0 %2137  ;;  %v2428_v15 = vsel %vm2420_vm4, %v2395_v32, %v5802_v43  ;;  %v3231_v36 = vpack.i.bf16 %v2727_v24, %v2743_v47  ;;  %v2744_v26 = vadd.f32 %v5225_v14, %v2705_v40  ;;  %v2363_v49 = vld [vmem:[#allocation2 + $0x40] sm:$0xff]  ;;  %v5819_v47 = vld [vmem:[#allocation81_spill] sm:$0xff]  ;;  %v5822_v23 = vld [vmem:[#allocation56_spill] sm:$0xff] }
 0x8d5   : > { %v2591_v3 = vsel %vm2584_vm8, %v2558_v57, %v2279_v4  ;;  %v2575_v20 = vsel %vm2551_vm7, %v2542_v9, %v2138_v19  ;;  %v2461_v29 = vsel %vm2453_vm5, %v2428_v15, %v5803_v0  ;;  %v2445_v57 = vsel %vm2420_vm4, %v2412_v10, %v5808_v25  ;;  %v5817_v15 = vld [vmem:[#allocation80_spill] sm:$0xff]  ;;  %v5823_v10 = vld [vmem:[#allocation15_spill] sm:$0xff] }
 0x8d6   : > { %v2623_v33 = vadd.f32 %v2591_v3, %v2361_v35  ;;  %v2493_v62 = vsel %vm357_vm1, %v2461_v29, %v5804_v46  ;;  %v5807_v35 = vld [vmem:[#allocation148_spill] sm:$0xff]  ;;  %v2478_v48 = vsel %vm2453_vm5, %v2445_v57, %v5809_v55  ;;  %v2462_v42 = vsel %vm2453_vm5, %v2429_v54, %v5814_v27 }
 0x8d7   : > { %v2689_v52 = vld [vmem:[#allocation2 + $0x28] sm:$0xff]  ;;  %v2526_v61 = vsel %vm2518_vm6, %v2493_v62, %v5807_v35  ;;  %v2397_v35 = vsel %vm2387_vm3, %v5823_v10, %v5822_v23  ;;  %v5839_v23 = vld [vmem:[#allocation82_spill] sm:$0xff] }
 0x8d8   : > { %2655 = vst.msk [vmem:[#allocation2 + $0x30] sm:$0xff] %vm284_vm2, %v2623_v33  ;;  %v2090_v58 = vpop.xlane.xlu1 %2089  ;;  %3228 = vxpose.xlu0.b32.cont [3/16] (narrow) %v3227_v21, 8  ;;  %v1949_v6 = vpop.xlane.xlu0 %1948  ;;  %v2728_v37 = vadd.f32 %v5225_v14, %v2689_v52  ;;  %v5810_v33 = vld [vmem:[#allocation137_spill] sm:$0xff]  ;;  %v5820_v62 = vld [vmem:[#allocation108_spill] sm:$0xff] }
 0x8d9   : > { %v2559_v4 = vsel %vm2551_vm7, %v2526_v61, %v2090_v58  ;;  %v2510_v21 = vsel %vm357_vm1, %v2478_v48, %v5810_v33  ;;  %v5840_v10 = vld [vmem:[#allocation32_spill] sm:$0xff] }
 0x8da   : > { %v3233_v2 = vpack.i.bf16 %v2728_v37, %v2744_v26  ;;  %v2543_v63 = vsel %vm2518_vm6, %v2510_v21, %v1949_v6  ;;  %v2494_v6 = vsel %vm357_vm1, %v2462_v42, %v5815_v39  ;;  %v5825_v26 = vld [vmem:[#allocation94_spill] sm:$0xff] }
 0x8db   : > { %v2706_v59 = vld [vmem:[#allocation2 + $0xb0] sm:$0xff] }
 0x8dc   : > { %v2141_v11 = vpop.xlane.xlu1 %2140  ;;  %3230 = vxpose.xlu0.b32.cont [4/16] (narrow) %v3229_v16, 8  ;;  %v2330_v7 = vpop.xlane.xlu0 %2329  ;;  %v2745_v34 = vadd.f32 %v5225_v14, %v2706_v59  ;;  %v5816_v16 = vld [vmem:[#allocation151_spill] sm:$0xff]  ;;  %v5826_v59 = vld [vmem:[#allocation122_spill] sm:$0xff] }
 0x8dd   : > { %v2608_v45 = vsel %vm2584_vm8, %v2575_v20, %v2330_v7  ;;  %v2576_v58 = vsel %vm2551_vm7, %v2543_v63, %v2141_v11  ;;  %v2527_v24 = vsel %vm2518_vm6, %v2494_v6, %v5816_v16  ;;  %v5818_v20 = vld [vmem:[#allocation30_spill] sm:$0xff]  ;;  %v5830_v63 = vld [vmem:[#allocation71_spill] sm:$0xff]  ;;  %v5834_v16 = vld [vmem:[#allocation16_spill] sm:$0xff] }
 0x8de   : > { %v2640_v51 = vadd.f32 %v2608_v45, %v2378_v1  ;;  %v2413_v11 = vsel %vm2387_vm3, %v5818_v20, %v5817_v15  ;;  %v5836_v15 = vld [vmem:[#allocation97_spill] sm:$0xff] }
 0x8df   : > { %v2690_v8 = vld [vmem:[#allocation2 + $0x30] sm:$0xff]  ;;  %v2446_v0 = vsel %vm2420_vm4, %v2413_v11, %v5819_v47 }
 0x8e0   : > { %2672 = vst.msk [vmem:[#allocation2 + $0xb8] sm:$0xff] %vm284_vm2, %v2640_v51  ;;  %v1952_v19 = vpop.xlane.xlu1 %1951  ;;  %3232 = vxpose.xlu0.b32.cont [5/16] (narrow) %v3231_v36, 8  ;;  %v2282_v38 = vpop.xlane.xlu0 %2281  ;;  %v2729_v41 = vadd.f32 %v5225_v14, %v2690_v8  ;;  %v2479_v51 = vsel %vm2453_vm5, %v2446_v0, %v5820_v62  ;;  %v5821_v36 = vld [vmem:[#allocation136_spill] sm:$0xff]  ;;  %v5824_v8 = vld [vmem:[#allocation57_spill] sm:$0xff] }
 0x8e1   : > { %v2592_v3 = vsel %vm2584_vm8, %v2559_v4, %v2282_v38  ;;  %v2511_v37 = vsel %vm357_vm1, %v2479_v51, %v5821_v36  ;;  %v2430_v25 = vsel %vm2420_vm4, %v2397_v35, %v5824_v8  ;;  %v2415_v35 = vsel %vm2387_vm3, %v5840_v10, %v5839_v23  ;;  %v5855_v23 = vld [vmem:[#allocation49_spill] sm:$0xff]  ;;  %v5856_v10 = vld [vmem:[#allocation18_spill] sm:$0xff] }
 0x8e2   : > { %v2624_v13 = vadd.f32 %v2592_v3, %v2362_v22  ;;  %v3235_v50 = vpack.i.bf16 %v2729_v41, %v2745_v34  ;;  %v2544_v61 = vsel %vm2518_vm6, %v2511_v37, %v1952_v19  ;;  %v2380_v22 = vld [vmem:[#allocation2 + $0xc8] sm:$0xff]  ;;  %v2463_v55 = vsel %vm2453_vm5, %v2430_v25, %v5825_v26  ;;  %v5827_v19 = vld [vmem:[#allocation69_spill] sm:$0xff]  ;;  %v5829_v41 = vld [vmem:[#allocation150_spill] sm:$0xff] }
 0x8e3   : > { %v2495_v33 = vsel %vm357_vm1, %v2463_v55, %v5826_v59  ;;  %v5831_v34 = vld [vmem:[#allocation111_spill] sm:$0xff]  ;;  %v5842_v26 = vld [vmem:[#allocation110_spill] sm:$0xff] }
 0x8e4   : > { %2656 = vst.msk [vmem:[#allocation2 + $0x38] sm:$0xff] %vm284_vm2, %v2624_v13  ;;  %v2333_v18 = vpop.xlane.xlu1 %2332  ;;  %3234 = vxpose.xlu0.b32.cont [6/16] (narrow) %v3233_v2, 8  ;;  %v2093_v17 = vpop.xlane.xlu0 %2092  ;;  %v5828_v13 = vld [vmem:[#allocation29_spill] sm:$0xff]  ;;  %v2528_v56 = vsel %vm2518_vm6, %v2495_v33, %v5829_v41  ;;  %v5844_v33 = vld [vmem:[#allocation58_spill] sm:$0xff] }
 0x8e5   : > { %v2609_v60 = vsel %vm2584_vm8, %v2576_v58, %v2333_v18  ;;  %v2560_v30 = vsel %vm2551_vm7, %v2527_v24, %v2093_v17  ;;  %v2414_v2 = vsel %vm2387_vm3, %v5828_v13, %v5827_v19  ;;  %v3354_v41 = vld [vmem:[%s3445_s27 + $0x70] sm:$0xff] }
 0x8e6   : > { %v2641_v44 = vadd.f32 %v2609_v60, %v2379_v28  ;;  %v2447_v28 = vsel %vm2420_vm4, %v2414_v2, %v5830_v63  ;;  %v5832_v60 = vld [vmem:[#allocation139_spill] sm:$0xff]  ;;  %v2382_v2 = vld [vmem:[#allocation2 + $0xd8] sm:$0xff] }
 0x8e7   : > { %v2707_v52 = vld [vmem:[#allocation2 + $0xb8] sm:$0xff]  ;;  %v2480_v27 = vsel %vm2453_vm5, %v2447_v28, %v5831_v34 }
 0x8e8   : > { %2673 = vst.msk [vmem:[#allocation2 + $0xc0] sm:$0xff] %vm284_vm2, %v2641_v44  ;;  %v2285_v32 = vpop.xlane.xlu1 %2284  ;;  %3236 = vxpose.xlu0.b32.cont [7/16] (narrow) %v3235_v50, 8  ;;  %v2144_v9 = vpop.xlane.xlu0 %2143  ;;  %v2746_v46 = vadd.f32 %v5225_v14, %v2707_v52  ;;  %v2512_v39 = vsel %vm357_vm1, %v2480_v27, %v5832_v60  ;;  %v5833_v50 = vld [vmem:[#allocation46_spill] sm:$0xff] }
 0x8e9   : > { %v2593_v1 = vsel %vm2584_vm8, %v2560_v30, %v2285_v32  ;;  %v2577_v57 = vsel %vm2551_vm7, %v2544_v61, %v2144_v9  ;;  %v2398_v24 = vsel %vm2387_vm3, %v5834_v16, %v5833_v50  ;;  %v2381_v30 = vld [vmem:[#allocation2 + $0xd0] sm:$0xff]  ;;  %v5835_v32 = vld [vmem:[#allocation47_spill] sm:$0xff]  ;;  %v5851_v50 = vld [vmem:[#allocation152_spill] sm:$0xff] }
 0x8ea   : > { %v2625_v43 = vadd.f32 %v2593_v1, %v2363_v49  ;;  %v2431_v9 = vsel %vm2420_vm4, %v2398_v24, %v5835_v32  ;;  %v2366_v24 = vld [vmem:[#allocation2 + $0x58] sm:$0xff] }
 0x8eb   : > { %v2691_v7 = vld [vmem:[#allocation2 + $0x38] sm:$0xff]  ;;  %v2464_v20 = vsel %vm2453_vm5, %v2431_v9, %v5836_v15 }
 0x8ec   : > { %2657 = vst.msk [vmem:[#allocation2 + $0x40] sm:$0xff] %vm284_vm2, %v2625_v43  ;;  %v2096_v29 = vpop.xlane.xlu1 %2095  ;;  %v1955_v45 = vpop.xlane.xlu0 %1954  ;;  %v2730_v40 = vadd.f32 %v5225_v14, %v2691_v7  ;;  %v5837_v7 = vld [vmem:[#allocation125_spill] sm:$0xff] }
 0x8ed   : > { %v2561_v5 = vsel %vm2551_vm7, %v2528_v56, %v2096_v29  ;;  %v2545_v49 = vsel %vm2518_vm6, %v2512_v39, %v1955_v45  ;;  %v2496_v47 = vsel %vm357_vm1, %v2464_v20, %v5837_v7  ;;  %v5838_v29 = vld [vmem:[#allocation153_spill] sm:$0xff]  ;;  %v3355_v56 = vld [vmem:[%s3445_s27 + $0x78] sm:$0xff] }
 0x8ee   : > { %v3237_v53 = vpack.i.bf16 %v2730_v40, %v2746_v46  ;;  %v2529_v45 = vsel %vm2518_vm6, %v2496_v47, %v5838_v29  ;;  %v2365_v40 = vld [vmem:[#allocation2 + $0x50] sm:$0xff] }
 0x8ef   : > { %v2708_v3 = vld [vmem:[#allocation2 + $0xc0] sm:$0xff]  ;;  %v5849_v39 = vld [vmem:[#allocation73_spill] sm:$0xff] }
 0x8f0   : > { %v2147_v4 = vpop.xlane.xlu1 %2146  ;;  %3238 = vxpose.xlu0.b32.cont [8/16] (narrow) %v3237_v53, 8  ;;  %v2336_v38 = vpop.xlane.xlu0 %2335  ;;  %v2747_v17 = vadd.f32 %v5225_v14, %v2708_v3  ;;  %v5853_v20 = vld [vmem:[#allocation113_spill] sm:$0xff] }
 0x8f1   : > { %v2610_v48 = vsel %vm2584_vm8, %v2577_v57, %v2336_v38  ;;  %v2578_v1 = vsel %vm2551_vm7, %v2545_v49, %v2147_v4  ;;  %v5854_v47 = vld [vmem:[#allocation141_spill] sm:$0xff] }
 0x8f2   : > { %v2642_v21 = vadd.f32 %v2610_v48, %v2380_v22  ;;  %v5841_v22 = vld [vmem:[#allocation83_spill] sm:$0xff]  ;;  %v5843_v48 = vld [vmem:[#allocation138_spill] sm:$0xff] }
 0x8f3   : > { %v2692_v12 = vld [vmem:[#allocation2 + $0x40] sm:$0xff]  ;;  %v2448_v8 = vsel %vm2420_vm4, %v2415_v35, %v5841_v22  ;;  %v2400_v35 = vsel %vm2387_vm3, %v5856_v10, %v5855_v23 }
 0x8f4   : > { %2674 = vst.msk [vmem:[#allocation2 + $0xc8] sm:$0xff] %vm284_vm2, %v2642_v21  ;;  %v1958_v54 = vpop.xlane.xlu1 %1957  ;;  %v2288_v58 = vpop.xlane.xlu0 %2287  ;;  %v2731_v18 = vadd.f32 %v5225_v14, %v2692_v12  ;;  %v2481_v55 = vsel %vm2453_vm5, %v2448_v8, %v5842_v26  ;;  %v5845_v21 = vld [vmem:[#allocation17_spill] sm:$0xff]  ;;  %v5846_v12 = vld [vmem:[#allocation59_spill] sm:$0xff] }
 0x8f5   : > { %v2594_v42 = vsel %vm2584_vm8, %v2561_v5, %v2288_v58  ;;  %v2513_v3 = vsel %vm357_vm1, %v2481_v55, %v5843_v48  ;;  %v2399_v19 = vsel %vm2387_vm3, %v5845_v21, %v5844_v33  ;;  %v5859_v26 = vld [vmem:[#allocation127_spill] sm:$0xff]  ;;  %v5860_v48 = vld [vmem:[#allocation84_spill] sm:$0xff]  ;;  %v5862_v33 = vld [vmem:[#allocation154_spill] sm:$0xff] }
 0x8f6   : > { %v2626_v6 = vadd.f32 %v2594_v42, %v2364_v31  ;;  %v3239_v44 = vpack.i.bf16 %v2731_v18, %v2747_v17  ;;  %v2546_v13 = vsel %vm2518_vm6, %v2513_v3, %v1958_v54  ;;  %v3189_v31 = vpack.c.bf16 %v3355_v56, %v3354_v41  ;;  %v5847_v18 = vld [vmem:[#allocation96_spill] sm:$0xff]  ;;  %v5861_v3 = vld [vmem:[#allocation34_spill] sm:$0xff] }
 0x8f7   : > { %v2432_v63 = vsel %vm2420_vm4, %v2399_v19, %v5846_v12  ;;  %v5848_v54 = vld [vmem:[#allocation124_spill] sm:$0xff]  ;;  %v2367_v19 = vld [vmem:[#allocation2 + $0x60] sm:$0xff] }
 0x8f8   : > { %2658 = vst.msk [vmem:[#allocation2 + $0x48] sm:$0xff] %vm284_vm2, %v2626_v6  ;;  %v2339_v52 = vpop.xlane.xlu1 %2338  ;;  %3240 = vxpose.xlu0.b32.cont [9/16] (narrow) %v3239_v44, 8  ;;  %v2099_v43 = vpop.xlane.xlu0 %2098  ;;  %v2465_v17 = vsel %vm2453_vm5, %v2432_v63, %v5847_v18  ;;  %3190 = vmatpush3.bf16.msra.mxu1 %v3189_v31  ;;  %v5850_v6 = vld [vmem:[#allocation31_spill] sm:$0xff] }
 0x8f9   : > { %v2611_v11 = vsel %vm2584_vm8, %v2578_v1, %v2339_v52  ;;  %v2562_v46 = vsel %vm2551_vm7, %v2529_v45, %v2099_v43  ;;  %v2497_v42 = vsel %vm357_vm1, %v2465_v17, %v5848_v54  ;;  %v2416_v44 = vsel %vm2387_vm3, %v5850_v6, %v5849_v39  ;;  %v5865_v17 = vld [vmem:[#allocation140_spill] sm:$0xff] }
 0x8fa   : > { %v2643_v0 = vadd.f32 %v2611_v11, %v2381_v30  ;;  %v2530_v16 = vsel %vm2518_vm6, %v2497_v42, %v5851_v50  ;;  %v5852_v30 = vld [vmem:[#allocation75_spill] sm:$0xff] }
 0x8fb   : > { %v2709_v37 = vld [vmem:[#allocation2 + $0xc8] sm:$0xff]  ;;  %v2449_v32 = vsel %vm2420_vm4, %v2416_v44, %v5852_v30 }
 0x8fc   : > { %2675 = vst.msk [vmem:[#allocation2 + $0xd0] sm:$0xff] %vm284_vm2, %v2643_v0  ;;  %v2291_v62 = vpop.xlane.xlu1 %2290  ;;  %v2150_v51 = vpop.xlane.xlu0 %2149  ;;  %v2748_v38 = vadd.f32 %v5225_v14, %v2709_v37  ;;  %v2482_v11 = vsel %vm2453_vm5, %v2449_v32, %v5853_v20  ;;  %v5868_v32 = vld [vmem:[#allocation3_spill] sm:$0xff] }
 0x8fd   : > { %v2595_v36 = vsel %vm2584_vm8, %v2562_v46, %v2291_v62  ;;  %v2579_v28 = vsel %vm2551_vm7, %v2546_v13, %v2150_v51  ;;  %v2514_v0 = vsel %vm357_vm1, %v2482_v11, %v5854_v47  ;;  %v2383_v46 = vld [vmem:[#allocation2 + $0xe0] sm:$0xff]  ;;  %v5870_v11 = vld [vmem:[#allocation126_spill] sm:$0xff]  ;;  %v5871_v47 = vld [vmem:[#allocation77_spill] sm:$0xff] }
 0x8fe   : > { %v2627_v53 = vadd.f32 %v2595_v36, %v2365_v40 }
 0x8ff   : > { %v2693_v61 = vld [vmem:[#allocation2 + $0x48] sm:$0xff] }
 0x900   : > { %2659 = vst.msk [vmem:[#allocation2 + $0x50] sm:$0xff] %vm284_vm2, %v2627_v53  ;;  %v2102_v25 = vpop.xlane.xlu1 %2101  ;;  %v1961_v57 = vpop.xlane.xlu0 %1960  ;;  %v2732_v4 = vadd.f32 %v5225_v14, %v2693_v61  ;;  %v5857_v61 = vld [vmem:[#allocation51_spill] sm:$0xff] }
 0x901   : > { %v2563_v9 = vsel %vm2551_vm7, %v2530_v16, %v2102_v25  ;;  %v2547_v40 = vsel %vm2518_vm6, %v2514_v0, %v1961_v57  ;;  %v2433_v22 = vsel %vm2420_vm4, %v2400_v35, %v5857_v61  ;;  %v5858_v57 = vld [vmem:[#allocation99_spill] sm:$0xff]  ;;  %v5872_v0 = vld [vmem:[#allocation33_spill] sm:$0xff] }
 0x902   : > { %v3241_v59 = vpack.i.bf16 %v2732_v4, %v2748_v38  ;;  %v2466_v4 = vsel %vm2453_vm5, %v2433_v22, %v5858_v57  ;;  %v5874_v35 = vld [vmem:[#allocation115_spill] sm:$0xff] }
 0x903   : > { %v2710_v27 = vld [vmem:[#allocation2 + $0xd0] sm:$0xff]  ;;  %v2498_v55 = vsel %vm357_vm1, %v2466_v4, %v5859_v26 }
 0x904   : > { %v2153_v5 = vpop.xlane.xlu1 %2152  ;;  %3242 = vxpose.xlu0.b32.cont [10/16] (narrow) %v3241_v59, 8  ;;  %v2342_v58 = vpop.xlane.xlu0 %2341  ;;  %v2749_v15 = vadd.f32 %v5225_v14, %v2710_v27  ;;  %v2417_v59 = vsel %vm2387_vm3, %v5861_v3, %v5860_v48  ;;  %v2531_v21 = vsel %vm2518_vm6, %v2498_v55, %v5862_v33  ;;  %v2385_v26 = vld [vmem:[#allocation2 + $0xf0] sm:$0xff] }
 0x905   : > { %v2612_v34 = vsel %vm2584_vm8, %v2579_v28, %v2342_v58  ;;  %v2580_v62 = vsel %vm2551_vm7, %v2547_v40, %v2153_v5  ;;  %v5864_v5 = vld [vmem:[#allocation112_spill] sm:$0xff] }
 0x906   : > { %v2644_v60 = vadd.f32 %v2612_v34, %v2382_v2  ;;  %v5863_v2 = vld [vmem:[#allocation85_spill] sm:$0xff]  ;;  %v2368_v40 = vld [vmem:[#allocation2 + $0x68] sm:$0xff] }
 0x907   : > { %v2694_v49 = vld [vmem:[#allocation2 + $0x50] sm:$0xff]  ;;  %v2450_v41 = vsel %vm2420_vm4, %v2417_v59, %v5863_v2  ;;  %v5878_v2 = vld [vmem:[#allocation55_spill] sm:$0xff] }
 0x908   : > { %2676 = vst.msk [vmem:[#allocation2 + $0xd8] sm:$0xff] %vm284_vm2, %v2644_v60  ;;  %v1964_v1 = vpop.xlane.xlu1 %1963  ;;  %v2294_v52 = vpop.xlane.xlu0 %2293  ;;  %v2733_v43 = vadd.f32 %v5225_v14, %v2694_v49  ;;  %v2483_v58 = vsel %vm2453_vm5, %v2450_v41, %v5864_v5  ;;  %v2384_v60 = vld [vmem:[#allocation2 + $0xe8] sm:$0xff]  ;;  %v5867_v49 = vld [vmem:[#allocation19_spill] sm:$0xff] }
 0x909   : > { %v2596_v7 = vsel %vm2584_vm8, %v2563_v9, %v2294_v52  ;;  %v2515_v34 = vsel %vm357_vm1, %v2483_v58, %v5865_v17  ;;  %v5880_v5 = vld [vmem:[#allocation4_spill] sm:$0xff]  ;;  %v5881_v58 = vld [vmem:[#allocation21_spill] sm:$0xff] }
 0x90a   : > { %v2628_v29 = vadd.f32 %v2596_v7, %v2366_v24  ;;  %v3243_v45 = vpack.i.bf16 %v2733_v43, %v2749_v15  ;;  %v2548_v42 = vsel %vm2518_vm6, %v2515_v34, %v1964_v1  ;;  %v5866_v24 = vld [vmem:[#allocation61_spill] sm:$0xff]  ;;  %v5869_v43 = vld [vmem:[#allocation98_spill] sm:$0xff] }
 0x90b   : > { %v2401_v30 = vsel %vm2387_vm3, %v5867_v49, %v5866_v24  ;;  %v5882_v17 = vld [vmem:[#allocation129_spill] sm:$0xff] }
 0x90c   : > { %2660 = vst.msk [vmem:[#allocation2 + $0x58] sm:$0xff] %vm284_vm2, %v2628_v29  ;;  %v2345_v51 = vpop.xlane.xlu1 %2344  ;;  %3244 = vxpose.xlu0.b32.cont [11/16] (narrow) %v3243_v45, 8  ;;  %v2105_v36 = vpop.xlane.xlu0 %2104  ;;  %v2434_v9 = vsel %vm2420_vm4, %v2401_v30, %v5868_v32  ;;  %v2418_v29 = vsel %vm2387_vm3, %v5872_v0, %v5871_v47  ;;  %v5890_v0 = vld [vmem:[#allocation142_spill] sm:$0xff] }
 0x90d   : > { %v2613_v37 = vsel %vm2584_vm8, %v2580_v62, %v2345_v51  ;;  %v2564_v56 = vsel %vm2551_vm7, %v2531_v21, %v2105_v36  ;;  %v2467_v15 = vsel %vm2453_vm5, %v2434_v9, %v5869_v43  ;;  %v5873_v62 = vld [vmem:[#allocation79_spill] sm:$0xff]  ;;  %v5876_v21 = vld [vmem:[#allocation53_spill] sm:$0xff]  ;;  %v5887_v43 = vld [vmem:[#allocation100_spill] sm:$0xff] }
 0x90e   : > { %v2645_v53 = vadd.f32 %v2613_v37, %v2383_v46  ;;  %v2499_v7 = vsel %vm357_vm1, %v2467_v15, %v5870_v11  ;;  %v2451_v51 = vsel %vm2420_vm4, %v2418_v29, %v5873_v62 }
 0x90f   : > { %v2711_v38 = vld [vmem:[#allocation2 + $0xd8] sm:$0xff]  ;;  %v2484_v61 = vsel %vm2453_vm5, %v2451_v51, %v5874_v35 }
 0x910   : > { %2677 = vst.msk [vmem:[#allocation2 + $0xe0] sm:$0xff] %vm284_vm2, %v2645_v53  ;;  %v2156_v8 = vpop.xlane.xlu1 %2155  ;;  %v1916_v25 = vpop.xlane.xlu0 %1915  ;;  %v2750_v28 = vadd.f32 %v5225_v14, %v2711_v38  ;;  %v2370_v51 = vld [vmem:[#allocation2 + $0x78] sm:$0xff] }
 0x911   : > { %v2581_v39 = vsel %vm2551_vm7, %v2548_v42, %v2156_v8  ;;  %v2532_v45 = vsel %vm2518_vm6, %v2499_v7, %v1916_v25  ;;  %v5875_v8 = vld [vmem:[#allocation143_spill] sm:$0xff]  ;;  %v5884_v42 = vld [vmem:[#allocation86_spill] sm:$0xff]  ;;  %v5889_v7 = vld [vmem:[#allocation128_spill] sm:$0xff] }
 0x912   : > { %v2516_v25 = vsel %vm357_vm1, %v2484_v61, %v5875_v8 }
 0x913   : > { %v2695_v13 = vld [vmem:[#allocation2 + $0x58] sm:$0xff] }
 0x914   : > { %v1967_v31 = vpop.xlane.xlu1 %1966  ;;  %v2297_v12 = vpop.xlane.xlu0 %2296  ;;  %v2734_v63 = vadd.f32 %v5225_v14, %v2695_v13 }
 0x915   : > { %v2597_v18 = vsel %vm2584_vm8, %v2564_v56, %v2297_v12  ;;  %v2549_v38 = vsel %vm2518_vm6, %v2516_v25, %v1967_v31  ;;  %v5879_v12 = vld [vmem:[#allocation101_spill] sm:$0xff] }
 0x916   : > { %v2629_v27 = vadd.f32 %v2597_v18, %v2367_v19  ;;  %v3245_v54 = vpack.i.bf16 %v2734_v63, %v2750_v28  ;;  %v5877_v19 = vld [vmem:[#allocation20_spill] sm:$0xff]  ;;  %v2403_v18 = vsel %vm2387_vm3, %v5881_v58, %v5880_v5 }
 0x917   : > { %v2712_v20 = vld [vmem:[#allocation2 + $0xe0] sm:$0xff]  ;;  %v2402_v13 = vsel %vm2387_vm3, %v5877_v19, %v5876_v21 }
 0x918   : > { %2661 = vst.msk [vmem:[#allocation2 + $0x60] sm:$0xff] %vm284_vm2, %v2629_v27  ;;  %v2348_v6 = vpop.xlane.xlu1 %2347  ;;  %3246 = vxpose.xlu0.b32.cont [12/16] (narrow) %v3245_v54, 8  ;;  %v2108_v44 = vpop.xlane.xlu0 %2107  ;;  %v2751_v10 = vadd.f32 %v5225_v14, %v2712_v20  ;;  %v2435_v41 = vsel %vm2420_vm4, %v2402_v13, %v5878_v2  ;;  %v5883_v27 = vld [vmem:[#allocation9_spill] sm:$0xff]  ;;  %v5888_v20 = vld [vmem:[#allocation114_spill] sm:$0xff] }
 0x919   : > { %v2614_v50 = vsel %vm2584_vm8, %v2581_v39, %v2348_v6  ;;  %v2565_v36 = vsel %vm2551_vm7, %v2532_v45, %v2108_v44  ;;  %v2468_v63 = vsel %vm2453_vm5, %v2435_v41, %v5879_v12  ;;  %v2436_v54 = vsel %vm2420_vm4, %v2403_v18, %v5883_v27  ;;  %v2369_v44 = vld [vmem:[#allocation2 + $0x70] sm:$0xff] }
 0x91a   : > { %v2646_v16 = vadd.f32 %v2614_v50, %v2384_v60  ;;  %v2500_v34 = vsel %vm357_vm1, %v2468_v63, %v5882_v17  ;;  %v5885_v60 = vld [vmem:[#allocation44_spill] sm:$0xff]  ;;  %v2469_v15 = vsel %vm2453_vm5, %v2436_v54, %v5887_v43 }
 0x91b   : > { %v2419_v39 = vsel %vm2387_vm3, %v5885_v60, %v5884_v42  ;;  %v2501_v47 = vsel %vm357_vm1, %v2469_v15, %v5889_v7 }
 0x91c   : > { %2678 = vst.msk [vmem:[#allocation2 + $0xe8] sm:$0xff] %vm284_vm2, %v2646_v16  ;;  %v2159_v1 = vpop.xlane.xlu1 %2158  ;;  %v1919_v52 = vpop.xlane.xlu0 %1918  ;;  %v5886_v16 = vld [vmem:[#allocation87_spill] sm:$0xff] }
 0x91d   : > { %v2582_v55 = vsel %vm2551_vm7, %v2549_v38, %v2159_v1  ;;  %v2533_v6 = vsel %vm2518_vm6, %v2500_v34, %v1919_v52  ;;  %v2452_v24 = vsel %vm2420_vm4, %v2419_v39, %v5886_v16 }
 0x91e   : > { %v2485_v11 = vsel %vm2453_vm5, %v2452_v24, %v5888_v20 }
 0x91f   : > { %v2696_v46 = vld [vmem:[#allocation2 + $0x60] sm:$0xff]  ;;  %v2517_v29 = vsel %vm357_vm1, %v2485_v11, %v5890_v0 }
 0x920   : > { %v1970_v37 = vpop.xlane.xlu1 %1969  ;;  %v2300_v53 = vpop.xlane.xlu0 %2299  ;;  %v2735_v23 = vadd.f32 %v5225_v14, %v2696_v46 }
 0x921   : > { %v2598_v22 = vsel %vm2584_vm8, %v2565_v36, %v2300_v53  ;;  %v2550_v46 = vsel %vm2518_vm6, %v2517_v29, %v1970_v37  ;;  %v2386_v36 = vld [vmem:[#allocation2 + $0xf8] sm:$0xff] }
 0x922   : > { %v2630_v57 = vadd.f32 %v2598_v22, %v2368_v40  ;;  %v3247_v4 = vpack.i.bf16 %v2735_v23, %v2751_v10 }
 0x923   : > { %v2713_v28 = vld [vmem:[#allocation2 + $0xe8] sm:$0xff] }
 0x924   : > { %2662 = vst.msk [vmem:[#allocation2 + $0x68] sm:$0xff] %vm284_vm2, %v2630_v57  ;;  %v2351_v48 = vpop.xlane.xlu1 %2350  ;;  %3248 = vxpose.xlu0.b32.cont [13/16] (narrow) %v3247_v4, 8  ;;  %v2111_v3 = vpop.xlane.xlu0 %2110  ;;  %v2752_v1 = vadd.f32 %v5225_v14, %v2713_v28 }
 0x925   : > { %v2615_v59 = vsel %vm2584_vm8, %v2582_v55, %v2351_v48  ;;  %v2566_v49 = vsel %vm2551_vm7, %v2533_v6, %v2111_v3 }
 0x926   : > { %v2647_v33 = vadd.f32 %v2615_v59, %v2385_v26 }
 0x928   : > { %2679 = vst.msk [vmem:[#allocation2 + $0xf0] sm:$0xff] %vm284_vm2, %v2647_v33  ;;  %v2162_v56 = vpop.xlane.xlu1 %2161  ;;  %v1922_v31 = vpop.xlane.xlu0 %1921 }
 0x929   : > { %v2534_v62 = vsel %vm2518_vm6, %v2501_v47, %v1922_v31  ;;  %v2583_v53 = vsel %vm2551_vm7, %v2550_v46, %v2162_v56 }
 0x92b   : > { %v2697_v50 = vld [vmem:[#allocation2 + $0x68] sm:$0xff] }
 0x92c   : > { %v2114_v30 = vpop.xlane.xlu1 %2113  ;;  %v2303_v32 = vpop.xlane.xlu0 %2302  ;;  %v2736_v9 = vadd.f32 %v5225_v14, %v2697_v50 }
 0x92d   : > { %v2599_v52 = vsel %vm2584_vm8, %v2566_v49, %v2303_v32  ;;  %v2567_v23 = vsel %vm2551_vm7, %v2534_v62, %v2114_v30 }
 0x92e   : > { %v2631_v45 = vadd.f32 %v2599_v52, %v2369_v44  ;;  %v3249_v40 = vpack.i.bf16 %v2736_v9, %v2752_v1 }
 0x92f   : > { %v2714_v37 = vld [vmem:[#allocation2 + $0xf0] sm:$0xff] }
 0x930   : > { %2663 = vst.msk [vmem:[#allocation2 + $0x70] sm:$0xff] %vm284_vm2, %v2631_v45  ;;  %v2306_v10 = vpop.xlane.xlu1 %2305  ;;  %3250 = vxpose.xlu0.b32.cont [14/16] (narrow) %v3249_v40, 8  ;;  %v2354_v35 = vpop.xlane.xlu0 %2353  ;;  %v2753_v38 = vadd.f32 %v5225_v14, %v2714_v37 }
 0x931   : > { %v2600_v61 = vsel %vm2584_vm8, %v2567_v23, %v2306_v10  ;;  %v2616_v22 = vsel %vm2584_vm8, %v2583_v53, %v2354_v35 }
 0x932   : > { %v2632_v8 = vadd.f32 %v2600_v61, %v2370_v51  ;;  %v2648_v25 = vadd.f32 %v2616_v22, %v2386_v36 }
 0x934   : > { %2664 = vst.msk [vmem:[#allocation2 + $0x78] sm:$0xff] %vm284_vm2, %v2632_v8  ;;  %2680 = vst.msk [vmem:[#allocation2 + $0xf8] sm:$0xff] %vm284_vm2, %v2648_v25 }
 0x937   : > { %v2698_v57 = vld [vmem:[#allocation2 + $0x70] sm:$0xff] }
 0x938   : > { %v2737_v4 = vadd.f32 %v5225_v14, %v2698_v57 }
 0x93a   : > { %v3251_v26 = vpack.i.bf16 %v2737_v4, %v2753_v38 }
 0x93b   : > { %v2699_v55 = vld [vmem:[#allocation2 + $0x78] sm:$0xff] }
 0x93c   : > { %v2715_v48 = vld [vmem:[#allocation2 + $0xf8] sm:$0xff]  ;;  %3252 = vxpose.xlu0.b32.cont [15/16] (narrow) %v3251_v26, 8  ;;  %v2738_v3 = vadd.f32 %v5225_v14, %v2699_v55 }
 0x93d   : > { %v2754_v59 = vadd.f32 %v5225_v14, %v2715_v48 }
 0x93f   : > { %v3253_v33 = vpack.i.bf16 %v2738_v3, %v2754_v59 }
 0x941   : > { %3254 = vxpose.xlu0.b32.end [16/16] (narrow) %v3253_v33, 8 }
 0x985   : > { %v3255_v21 = vpop.trf.xlu0 }
 0x986   : > { %v3259_v19 = vunpack.i.h.bf16 %v3255_v21  ;;  %v3256_v13 = vunpack.i.l.bf16 %v3255_v21 }
 0x988   : > { %2883 = vmatprep.mubr.f32.mxu1 %v3256_v13 }
 0x989   : > { %2884 = vmatmul.mubr.f32.vlgmr.msra.gmra.mrb[0].mxu1 %v3259_v19 }
 0xa5c   : > { %v3106_v2 = vpop.f32.mrb[0].mxu1 }
 0xa5d   : > { %v3107_v41 = vpop.f32.mrb[1].mxu1 }
 0xa5e   : > { %v3108_v56 = vadd.f32 %v3107_v41, %v3106_v2 }
 0xa60   : > { %2889 = vst.msk [vmem:[%s279_s23] sm:$0xff] %vm357_vm1, %v3108_v56 }
 0xa61 PF: > { %s15_s20 = sadd.s32 1, %s3378_s20   ;;  %s5891_s18 = smov %s3374_s19 }
 0xa62   : > { %p12_p5 = scmp.ge.s32.totalorder %s15_s20, 4   ;;  %s5892_s19 = smov %s5894_s21 }
 0xa64   :  { %14 = sbr.rel (!%p12_p5) target bundleno = 2 (0x2), region = 87 }

</bundles_post_ra>
